<compile_context>
chip_gen: v7x
topology: tpu7x:2x2x1
jax: 0.10.0
libtpu: 0.0.40
codegen_flags: <defaults>
</compile_context>

<pallas_src>
import functools

import jax
import jax.numpy as jnp
from jax import lax
from jax.experimental import pallas as pl
from jax.experimental.pallas import tpu as pltpu


def relu_grouped_conv3x3_kernel(x_ref, w_ref, o_ref):
    # x_ref: (1, N, H+2, W+2, Cg_in)  bf16, spatially zero-padded, pre-ReLU
    # w_ref: (1, 9*Cg_in, Cg_out)     bf16, K ordered as (kh, kw, cin)
    # o_ref: (1, M, Cg_out)           f32, M = N*H*W
    _, N, Hp, Wp, Cg_in = x_ref.shape
    H, W = Hp - 2, Wp - 2
    M = N * H * W

    # Fused ReLU (padding zeros unaffected).
    xr = jnp.maximum(x_ref[0], 0)

    # im2col: fuse the 9 taps into the K dimension -> one MXU matmul.
    cols = []
    for kh in range(3):          # statically unrolled 3x3 taps
        for kw in range(3):
            cols.append(xr[:, kh:kh + H, kw:kw + W, :].reshape(M, Cg_in))
    patches = jnp.concatenate(cols, axis=-1)            # (M, 9*Cg_in) bf16

    acc = jnp.dot(patches, w_ref[0],
                  preferred_element_type=jnp.float32)   # (M, Cg_out) f32
    o_ref[0] = acc.astype(o_ref.dtype)


def prepare_weights(weight, groups):
    """One-time weight re-layout (call at init, NOT per forward).

    (C_out, C_in/groups, 3, 3) f32 -> (G, 9*Cg_in, Cg_out) bf16, with the K
    axis ordered (kh, kw, cin) to match the kernel's im2col ordering.
    """
    C_out, Cg_in = weight.shape[0], weight.shape[1]
    Cg_out = C_out // groups
    w = weight.reshape(groups, Cg_out, Cg_in, 3, 3)
    w = jnp.transpose(w, (0, 3, 4, 2, 1))               # (G, 3, 3, Cg_in, Cg_out)
    w = w.reshape(groups, 9 * Cg_in, Cg_out)
    return w.astype(jnp.bfloat16)


@functools.partial(jax.jit, static_argnums=2)
def relu_grouped_conv2d(x_nchw, w_kernel, groups):
    """x_nchw: (N, C, H, W) f32; w_kernel: prepare_weights() output.
    Returns conv2d(relu(x)) with stride 1, padding 1, no bias, NCHW f32."""
    N, C, H, W = x_nchw.shape
    Cg_in = C // groups
    Cg_out = w_kernel.shape[-1]
    C_out = Cg_out * groups
    M = N * H * W

    # NCHW -> (G, N, H, W, Cg_in), bf16, zero halo. XLA fuses cast into the
    # transpose/pad so the kernel reads half the HBM bytes of f32.
    x = jnp.transpose(x_nchw.reshape(N, groups, Cg_in, H, W), (1, 0, 3, 4, 2))
    x = jnp.pad(x.astype(jnp.bfloat16), ((0, 0), (0, 0), (1, 1), (1, 1), (0, 0)))

    out = pl.pallas_call(
        relu_grouped_conv3x3_kernel,
        out_shape=jax.ShapeDtypeStruct((groups, M, Cg_out), jnp.float32),
        grid=(groups,),
        in_specs=[
            pl.BlockSpec((1, N, H + 2, W + 2, Cg_in), lambda g: (g, 0, 0, 0, 0)),
            pl.BlockSpec((1, 9 * Cg_in, Cg_out), lambda g: (g, 0, 0)),
        ],
        out_specs=pl.BlockSpec((1, M, Cg_out), lambda g: (g, 0, 0)),
        compiler_params=pltpu.CompilerParams(
            dimension_semantics=("parallel",),
            vmem_limit_bytes=64 * 1024 * 1024),
    )(x, w_kernel)

    # (G, N*H*W, Cg_out) -> (N, C_out, H, W)
    out = out.reshape(groups, N, H, W, Cg_out)
    return jnp.transpose(out, (1, 0, 4, 2, 3)).reshape(N, C_out, H, W)


if __name__ == "__main__":
    # Small shapes consistent with the module: groups=11, 3x3, stride 1, pad 1,
    # spatial 14x14. (Original uses C=2904 => 264 channels/group; here 16.)
    GROUPS = 11
    CG = 16
    C = GROUPS * CG        # 176
    N, H, W = 1, 14, 14

    key = jax.random.PRNGKey(0)
    kx, kw = jax.random.split(key)
    x = jax.random.normal(kx, (N, C, H, W), dtype=jnp.float32)
    weight = jax.random.normal(kw, (C, CG, 3, 3), dtype=jnp.float32) * 0.05

    # One-time weight re-layout (init-time, outside the forward hot path).
    w_kernel = prepare_weights(weight, GROUPS)

    y = relu_grouped_conv2d(x, w_kernel, GROUPS)
    y = jax.block_until_ready(y)
    assert y.shape == (N, C, H, W)

    # Reference: XLA grouped conv of ReLU(x) on the same bf16-rounded operands
    # (kernel uses bf16 MXU inputs with f32 accumulation).
    x_b = jnp.maximum(x, 0.0).astype(jnp.bfloat16).astype(jnp.float32)
    w_b = weight.astype(jnp.bfloat16).astype(jnp.float32)
    y_ref = lax.conv_general_dilated(
        x_b, w_b,
        window_strides=(1, 1), padding=((1, 1), (1, 1)),
        dimension_numbers=("NCHW", "OIHW", "NCHW"),
        feature_group_count=GROUPS)
    assert jnp.allclose(y, y_ref, atol=1e-2, rtol=1e-2), "mismatch vs reference"

    print("KERNEL_OK")
</pallas_src>

<mosaic_0001>
module attributes {stable_mosaic.version = 11 : i64} {
  func.func @relu_grouped_conv3x3_kernel(%arg0: i32, %arg1: memref<1x1x16x16x16xbf16, #tpu.memory_space<vmem>>, %arg2: memref<1x144x16xbf16, #tpu.memory_space<vmem>>, %arg3: memref<1x196x16xf32, #tpu.memory_space<vmem>>) attributes {dimension_semantics = [#tpu.dimension_semantics<parallel>], iteration_bounds = array<i64: 11>, scalar_prefetch = 0 : i64, scratch_operands = 0 : i64, tpu.core_type = #tpu.core_type<tc>, window_params = [{transform_indices = @transform_0, window_bounds = array<i64: 1, 1, 16, 16, 16>}, {transform_indices = @transform_1, window_bounds = array<i64: 1, 144, 16>}, {transform_indices = @transform_2, window_bounds = array<i64: 1, 196, 16>}]} {
    %c0 = arith.constant 0 : index
    %c0_0 = arith.constant 0 : index
    %c0_1 = arith.constant 0 : index
    %c0_2 = arith.constant 0 : index
    %c0_3 = arith.constant 0 : index
    %0 = vector.load %arg1[%c0, %c0_0, %c0_1, %c0_2, %c0_3] : memref<1x1x16x16x16xbf16, #tpu.memory_space<vmem>>, vector<1x1x16x16x16xbf16>
    %1 = vector.shape_cast %0 : vector<1x1x16x16x16xbf16> to vector<1x16x16x16xbf16>
    %cst = arith.constant 0.000000e+00 : bf16
    %2 = vector.broadcast %cst : bf16 to vector<1x16x16x16xbf16>
    %3 = arith.maximumf %1, %2 : vector<1x16x16x16xbf16>
    %4 = vector.extract_strided_slice %3 {offsets = [0, 0, 0, 0], sizes = [1, 14, 14, 16], strides = [1, 1, 1, 1]} : vector<1x16x16x16xbf16> to vector<1x14x14x16xbf16>
    %5 = vector.shape_cast %4 : vector<1x14x14x16xbf16> to vector<196x16xbf16>
    %6 = vector.extract_strided_slice %3 {offsets = [0, 0, 1, 0], sizes = [1, 14, 14, 16], strides = [1, 1, 1, 1]} : vector<1x16x16x16xbf16> to vector<1x14x14x16xbf16>
    %7 = vector.shape_cast %6 : vector<1x14x14x16xbf16> to vector<196x16xbf16>
    %8 = vector.extract_strided_slice %3 {offsets = [0, 0, 2, 0], sizes = [1, 14, 14, 16], strides = [1, 1, 1, 1]} : vector<1x16x16x16xbf16> to vector<1x14x14x16xbf16>
    %9 = vector.shape_cast %8 : vector<1x14x14x16xbf16> to vector<196x16xbf16>
    %10 = vector.extract_strided_slice %3 {offsets = [0, 1, 0, 0], sizes = [1, 14, 14, 16], strides = [1, 1, 1, 1]} : vector<1x16x16x16xbf16> to vector<1x14x14x16xbf16>
    %11 = vector.shape_cast %10 : vector<1x14x14x16xbf16> to vector<196x16xbf16>
    %12 = vector.extract_strided_slice %3 {offsets = [0, 1, 1, 0], sizes = [1, 14, 14, 16], strides = [1, 1, 1, 1]} : vector<1x16x16x16xbf16> to vector<1x14x14x16xbf16>
    %13 = vector.shape_cast %12 : vector<1x14x14x16xbf16> to vector<196x16xbf16>
    %14 = vector.extract_strided_slice %3 {offsets = [0, 1, 2, 0], sizes = [1, 14, 14, 16], strides = [1, 1, 1, 1]} : vector<1x16x16x16xbf16> to vector<1x14x14x16xbf16>
    %15 = vector.shape_cast %14 : vector<1x14x14x16xbf16> to vector<196x16xbf16>
    %16 = vector.extract_strided_slice %3 {offsets = [0, 2, 0, 0], sizes = [1, 14, 14, 16], strides = [1, 1, 1, 1]} : vector<1x16x16x16xbf16> to vector<1x14x14x16xbf16>
    %17 = vector.shape_cast %16 : vector<1x14x14x16xbf16> to vector<196x16xbf16>
    %18 = vector.extract_strided_slice %3 {offsets = [0, 2, 1, 0], sizes = [1, 14, 14, 16], strides = [1, 1, 1, 1]} : vector<1x16x16x16xbf16> to vector<1x14x14x16xbf16>
    %19 = vector.shape_cast %18 : vector<1x14x14x16xbf16> to vector<196x16xbf16>
    %20 = vector.extract_strided_slice %3 {offsets = [0, 2, 2, 0], sizes = [1, 14, 14, 16], strides = [1, 1, 1, 1]} : vector<1x16x16x16xbf16> to vector<1x14x14x16xbf16>
    %21 = vector.shape_cast %20 : vector<1x14x14x16xbf16> to vector<196x16xbf16>
    %22 = tpu.concatenate %5, %7, %9, %11, %13, %15, %17, %19, %21 in 1 : vector<196x16xbf16>, vector<196x16xbf16>, vector<196x16xbf16>, vector<196x16xbf16>, vector<196x16xbf16>, vector<196x16xbf16>, vector<196x16xbf16>, vector<196x16xbf16>, vector<196x16xbf16> -> vector<196x144xbf16>
    %c0_4 = arith.constant 0 : index
    %c0_5 = arith.constant 0 : index
    %c0_6 = arith.constant 0 : index
    %23 = vector.load %arg2[%c0_4, %c0_5, %c0_6] : memref<1x144x16xbf16, #tpu.memory_space<vmem>>, vector<1x144x16xbf16>
    %24 = vector.shape_cast %23 : vector<1x144x16xbf16> to vector<144x16xbf16>
    %cst_7 = arith.constant dense<0.000000e+00> : vector<196x16xf32>
    %25 = tpu.matmul %22, %24, %cst_7 {dimension_numbers = #tpu.dot_dimension_numbers<[1], [0], [0], [1], [0, 0, 1, 1], [], []>} : vector<196x144xbf16>, vector<144x16xbf16>, vector<196x16xf32> -> vector<196x16xf32>
    %c0_8 = arith.constant 0 : index
    %c0_9 = arith.constant 0 : index
    %c0_10 = arith.constant 0 : index
    %26 = vector.load %arg3[%c0_8, %c0_9, %c0_10] : memref<1x196x16xf32, #tpu.memory_space<vmem>>, vector<1x196x16xf32>
    %27 = vector.shape_cast %26 : vector<1x196x16xf32> to vector<196x16xf32>
    %28 = vector.shape_cast %25 : vector<196x16xf32> to vector<1x196x16xf32>
    tpu.vector_store %arg3[%c0_8, %c0_9, %c0_10], %28 {strides = array<i32>} : memref<1x196x16xf32, #tpu.memory_space<vmem>>, vector<1x196x16xf32>,
    return
  }
  func.func @transform_0(%arg0: i32) -> (i32, i32, i32, i32, i32) {
    %c0_i32 = arith.constant 0 : i32
    %c0_i32_0 = arith.constant 0 : i32
    %c0_i32_1 = arith.constant 0 : i32
    %c0_i32_2 = arith.constant 0 : i32
    %c0_i32_3 = arith.constant 0 : i32
    return %arg0, %c0_i32, %c0_i32_0, %c0_i32_1, %c0_i32_2 : i32, i32, i32, i32, i32
  }
  func.func @transform_1(%arg0: i32) -> (i32, i32, i32) {
    %c0_i32 = arith.constant 0 : i32
    %c0_i32_0 = arith.constant 0 : i32
    %c0_i32_1 = arith.constant 0 : i32
    return %arg0, %c0_i32, %c0_i32_0 : i32, i32, i32
  }
  func.func @transform_2(%arg0: i32) -> (i32, i32, i32) {
    %c0_i32 = arith.constant 0 : i32
    %c0_i32_0 = arith.constant 0 : i32
    %c0_i32_1 = arith.constant 0 : i32
    return %arg0, %c0_i32, %c0_i32_0 : i32, i32, i32
  }
}

</mosaic_0001>

<bundles_post_ra>
// kernel: relu_grouped_conv2d.1
= control target key start
LH: loop header
LB: loop body
LE: loop exit
PB: predicated region body
PF: predicated region fallthrough
CT: control target
= control target key end

     0   :  { %7 = vsyncpa [#allocation3], 0  ;;  %s10205_s0 = inlined_call_operand.hbm [shape: bf16[11,1,16,16,16], index: 0, kind: input, shape index: {}]   ;;  %s10206_s1 = inlined_call_operand.hbm [shape: bf16[11,144,16], index: 1, kind: input, shape index: {}]   ;;  %s10207_s2 = inlined_call_operand.hbm [shape: f32[11,196,16], index: 2, kind: output, shape index: {}]  }
   0x1   :  { %9 = vsyncpa [#allocation3 + $0x1], 0 }
   0x2   :  { %10 = vsyncpa [#allocation6], 0 }
   0x3   :  { %12 = vsyncpa [#allocation6 + $0x1], 0 }
   0x4   :  { %13 = vsyncpa [#allocation4], 0 }
   0x5   :  { %15 = vsyncpa [#allocation4 + $0x1], 0  ;;  %s6910_s9 = smov 0   ;;  %s6912_s10 = smov 0  }
   0x6   :  { %s6914_s11 = smov 0   ;;  %s6916_s12 = smov 0  }
   0x7 LB: > { %s6931_s13 = sadd.s32 4294967295, %s6877_s12   ;;  %s6473_s14 = sadd.s32 4294967294, %s6877_s12   ;;  %s6877_s12 = sphi %s6916_s12, %s10621_s12   ;;  %s6873_s11 = sphi %s6914_s11, %s10620_s11   ;;  %s6869_s10 = sphi %s6912_s10, %s10619_s10   ;;  %s6865_s9 = sphi %s6910_s9, %s10618_s9  }
   0x8   : > { %s6935_s15 = sadd.s32 1, %s6877_s12   ;;  %s28_s16 = sadd.s32 1, %s6873_s11 }
   0x9   : > { %s25_s17 = ssub.s32 %s6877_s12, %s6935_s15  ;;  %p35_p0 = scmp.ne.s32.totalorder %s6873_s11, %s6869_s10 }
   0xa   : > { %p26_p1 = scmp.eq.s32.totalorder %s25_s17, 0  ;;  %p36_p2 = scmp.eq.s32.totalorder %s6877_s12, 0 }
   0xb   : > { %p41_p3 = scmp.ne.s32.totalorder %s6869_s10, %s6865_s9  ;;  %p42_p4 = scmp.eq.s32.totalorder %s6931_s13, 0 }
   0xc   : > { %s6947_s18 = scalar_select %p26_p1, %s6873_s11, %s28_s16  }
   0xd   : > { %p6949_p5 = por %p36_p2, %p35_p0  ;;  %p6953_p6 = por %p42_p4, %p41_p3 }
   0xe   : > { %p91_p7 = scmp.eq.s32.totalorder %s6931_s13, 10  ;;  %p97_p8 = scmp.eq.s32.totalorder %s6473_s14, 10 }
   0xf   : > { %s10333_s20 = scalar_select %p6953_p6, 1, 0 }
  0x10   : > { %p6691_p9 = scmp.lt.s32.totalorder %s6877_s12, 11  ;;  %p6959_p10 = por %p91_p7, %p35_p0 }
  0x11   : > { %p6963_p11 = por %p97_p8, %p41_p3  ;;  %s6968_s23 = sand.u32 1, %s6873_s11  }
  0x12   : > { %s10334_s21 = scalar_select %p6959_p10, 1, 0 }
  0x13   : > { %s10335_s22 = scalar_select %p6963_p11, 1, 0 }
  0x14   : > { %s6650_s24 = sshll.u32 %s6877_s12, 11  ;;  %s6476_s25 = sshll.u32 %s6968_s23, 7 }
  0x15   : > { %s6975_s28 = scalar_lea.hbm %s10205_s0, %s6650_s24  ;;  %s121_s29 = scalar_lea.vmem [#allocation2], %s6476_s25 }
  0x16   : > { %s128_s30 = sshll.u32 %s121_s29, 4  ;;  %p6979_p12 = pnand %p6691_p9, %p6949_p5  ;;  %s6983_s30 = int_to_ptr.vmem [resolvable:$true] %s128_s30 }
  0x17   : > { %s118_s4 = scalar_lea.sflag [#allocation3], %s6968_s23  ;;  %s6747_s5 = scalar_lea.hbm %s6975_s28, 2048 }
  0x18   : > { %p6748_p13 = scmp.ne.s32.totalorder %s6975_s28, %s6747_s5  ;;  %p6749_p0 = pneg %p6979_p12 }
  0x19   : > { %s6752_s8 = scalar_lea.hbm %s10205_s0, 22528  ;;  %p6753_p3 = scmp.lt.u32.totalorder %s6975_s28, %s10205_s0 }
  0x1a   : > { %p6750_p1 = pnand %p6749_p0, %p6748_p13  ;;  %p6754_p4 = scmp.lt.u32.totalorder %s6752_s8, %s6747_s5 }
  0x1b   : > { %p6756_p7 = scmp.lt.u32.totalorder %s6747_s5, %s6975_s28 }
  0x1c   : > { %p6751_p2 = pneg %p6750_p1  ;;  %p6755_p5 = por %p6754_p4, %p6753_p3 }
  0x1e   : > { %p6757_p8 = por %p6756_p7, %p6755_p5 }
  0x20   : > { %p6758_p9 = pnand %p6757_p8, %p6751_p2 }
  0x22   : > { %6761 = shalt.err (!%p6758_p9)
}
  0x23   : > { %s6762_s17 = scalar_lea.vmem %s6983_s30, 2048  ;;  %s6879_s19 = smov [#allocation2]  }
  0x24   : > { %p6763_p13 = scmp.ne.s32.totalorder %s6983_s30, %s6762_s17  ;;  %s6767_s24 = sshll.u32 %s6879_s19, 4  ;;  %s6768_s24 = int_to_ptr.vmem [resolvable:$false] %s6767_s24 }
  0x25   : > { %s6769_s25 = scalar_lea.vmem %s6768_s24, 4096  ;;  %p6770_p10 = scmp.lt.s32.totalorder %s6983_s30, %s6768_s24 }
  0x26   : > { %p6765_p1 = pnand %p6763_p13, %p6749_p0  ;;  %p6771_p3 = scmp.lt.s32.totalorder %s6769_s25, %s6762_s17 }
  0x28   : > { %p6766_p11 = pneg %p6765_p1  ;;  %p6772_p4 = por %p6771_p3, %p6770_p10 }
  0x2a   : > { %p6773_p5 = pnand %p6772_p4, %p6766_p11 }
  0x2c   : > { %6776 = shalt.err (!%p6773_p5)
}
  0x2d   : > { %s6880_s26 = smov 64   ;;  %s6881_s27 = smov 4  }
  0x2e   : > { %6683 = dma.hbm_to_vmem [thread:$0]  (!%p6979_p12), %s6975_s28, 2048, %s6983_s30, %s118_s4, %s6880_s26, %s6880_s26, %s6881_s27  }
  0x2f   : > { %p6480_p10 = scmp.ge.s32.totalorder %s6877_s12, 1  ;;  %p157_p11 = scmp.lt.s32.totalorder %s6877_s12, 12 }
  0x30   : > { %s6669_s29 = smul.u32 72, %s6968_s23  ;;  %s139_s28 = scalar_lea.sflag [#allocation6], %s6968_s23 }
  0x31   : > { %p7019_p2 = pnand %p6480_p10, %p157_p11  ;;  %s6670_s6 = smul.u32 1152, %s6877_s12 }
  0x32   : > { %s142_s16 = scalar_lea.vmem [#allocation5], %s6669_s29  ;;  %s6782_s24 = scalar_lea.hbm %s10206_s1, 12672 }
  0x33   : > { %s7027_s14 = scalar_lea.hbm %s10206_s1, %s6670_s6  ;;  %s149_s17 = sshll.u32 %s142_s16, 4  ;;  %s7029_s17 = int_to_ptr.vmem [resolvable:$true] %s149_s17 }
  0x34   : > { %s6777_s30 = scalar_lea.hbm %s7027_s14, 1152  ;;  %p6783_p13 = scmp.lt.u32.totalorder %s7027_s14, %s10206_s1 }
  0x35   : > { %p6778_p7 = scmp.ne.s32.totalorder %s7027_s14, %s6777_s30  ;;  %p6784_p1 = scmp.lt.u32.totalorder %s6782_s24, %s6777_s30 }
  0x36   : > { %p6786_p4 = scmp.lt.u32.totalorder %s6777_s30, %s7027_s14 }
  0x37   : > { %p6780_p8 = pnand %p6778_p7, %p6749_p0  ;;  %p6785_p3 = por %p6784_p1, %p6783_p13 }
  0x39   : > { %p6781_p9 = pneg %p6780_p8  ;;  %p6787_p5 = por %p6786_p4, %p6785_p3 }
  0x3b   : > { %p6788_p10 = pnand %p6787_p5, %p6781_p9 }
  0x3d   : > { %6791 = shalt.err (!%p6788_p10)
}
  0x3e   : > { %s6792_s29 = scalar_lea.vmem %s7029_s17, 1152  ;;  %s6882_s7 = smov [#allocation5]  }
  0x3f   : > { %p6793_p11 = scmp.ne.s32.totalorder %s7029_s17, %s6792_s29  ;;  %s6797_s8 = sshll.u32 %s6882_s7, 4  ;;  %s6798_s8 = int_to_ptr.vmem [resolvable:$false] %s6797_s8 }
  0x40   : > { %s6799_s16 = scalar_lea.vmem %s6798_s8, 2304  ;;  %p6800_p6 = scmp.lt.s32.totalorder %s7029_s17, %s6798_s8 }
  0x41   : > { %p6795_p7 = pnand %p6793_p11, %p6749_p0  ;;  %p6801_p13 = scmp.lt.s32.totalorder %s6799_s16, %s6792_s29 }
  0x43   : > { %p6796_p8 = pneg %p6795_p7  ;;  %p6802_p1 = por %p6801_p13, %p6800_p6 }
  0x45   : > { %p6803_p3 = pnand %p6802_p1, %p6796_p8 }
  0x47   : > { %6806 = shalt.err (!%p6803_p3)
}
  0x48   : > { %6686 = dma.hbm_to_vmem [thread:$0]  (!%p6979_p12), %s7027_s14, 1152, %s7029_s17, %s139_s28, %s6880_s26, %s6880_s26, %s6881_s27  }
  0x49   : > { %161 = sbr.rel (%p7019_p2) target bundleno = 836 (0x344), region = 28 }
  0x50   : > { %s7063_s30 = sand.u32 1, %s6869_s10   ;;  %p10338_p6 = scmp.ne.s32.totalorder %s10333_s20, 0 }
  0x51   : > { %s6481_s4 = sshll.u32 %s7063_s30, 7  ;;  %s164_s19 = scalar_lea.sflag [#allocation3], %s7063_s30 }
  0x52   : > { %s7067_s3 = scalar_lea.vmem [#allocation2], %s6481_s4 }
  0x53   : > { %6852 = dma.done.wait (%p10338_p6), %s164_s19, 2048  }
  0x54   : > { %6854 = vsyncadd (%p10338_p6), %s164_s19, 4294965248  ;;  %s6671_s23 = smul.u32 72, %s7063_s30  ;;  %s173_s26 = scalar_lea.sflag [#allocation6], %s7063_s30 }
  0x56   : > { %s7075_s27 = scalar_lea.vmem [#allocation5], %s6671_s23 }
  0x57   : > { %6856 = dma.done.wait (%p10338_p6), %s173_s26, 1152  }
  0x58   : > { %6858 = vsyncadd (%p10338_p6), %s173_s26, 4294966144  ;;  %v298_v0 = vlaneseq  ;;  %v6883_v1 = vmov 1966171168   ;;  %v10210_v3 = vmov 0   ;;  %v221_v7 = vld [vmem:[%s7067_s3 + $0x48] sm:$0xf] }
  0x59   : > { %v296_v2 = vunpack.c.l.s4 %v6883_v1  ;;  %6201 = vmatprep.subr.bf16.mxu0 %v10210_v3  ;;  %6651 = vmatprep.subr.bf16.mxu1 %v10210_v3  ;;  %v222_v8 = vld [vmem:[%s7067_s3 + $0x4c] sm:$0xf]  ;;  %v223_v9 = vld [vmem:[%s7067_s3 + $0x50] sm:$0xf]  ;;  %v253_v10 = vmax.bf16 %v10210_v3, %v221_v7  ;;  %v205_v13 = vld [vmem:[%s7067_s3 + $0x8] sm:$0xf] }
  0x5a   : > { %v299_v4 = vshrl.u32 %v298_v0, 7  ;;  %v254_v11 = vmax.bf16 %v10210_v3, %v222_v8  ;;  %v255_v12 = vmax.bf16 %v10210_v3, %v223_v9  ;;  %v206_v14 = vld [vmem:[%s7067_s3 + $0xc] sm:$0xf]  ;;  %v207_v15 = vld [vmem:[%s7067_s3 + $0x10] sm:$0xf]  ;;  %v237_v16 = vmax.bf16 %v10210_v3, %v205_v13  ;;  %s6885_s20 = smov 48  }
  0x5b   : > { %v297_v5 = vunpack.c.0.s8 %v296_v2  ;;  %v238_v17 = vmax.bf16 %v10210_v3, %v206_v14  ;;  %v239_v18 = vmax.bf16 %v10210_v3, %v207_v15  ;;  %v208_v19 = vld [vmem:[%s7067_s3 + $0x14] sm:$0xf]  ;;  %v209_v20 = vld [vmem:[%s7067_s3 + $0x18] sm:$0xf]  ;;  %vm967_vm0 = vsmask.f32 256 }
  0x5c   : > { %v240_v24 = vmax.bf16 %v10210_v3, %v208_v19  ;;  %v241_v28 = vmax.bf16 %v10210_v3, %v209_v20  ;;  %vm968_vm1 = vsmask.f32 1284  ;;  %v203_v15 = vld [vmem:[%s7067_s3] sm:$0xf]  ;;  %v204_v20 = vld [vmem:[%s7067_s3 + $0x4] sm:$0xf] }
  0x5d   : > { %v7083_v6 = vsub.s32 %v297_v5, %v299_v4  ;;  %vm970_vm2 = vsmask.f32 2312  ;;  %vm972_vm3 = vsmask.f32 3340  ;;  %vm974_vm4 = vsmask.f32 4368  ;;  %vm969_vm5 = vmor %vm967_vm0, %vm968_vm1 }
  0x5e   : > { %vm976_vm6 = vsmask.f32 5396  ;;  %vm7299_vm7 = vmor %vm969_vm5, %vm970_vm2  ;;  %s6886_s5 = smov 96   ;;  %vm978_vm8 = vsmask.f32 6424  ;;  %s6887_s14 = smov 32  }
  0x5f   : > { %v724_v21 = vrot.slane %v253_v10, %v7083_v6  ;;  %v748_v22 = vrot.slane %v254_v11, %v7083_v6  ;;  %v771_v23 = vrot.slane %v255_v12, %v7083_v6  ;;  %v348_v25 = vrot.slane %v237_v16, %v7083_v6  ;;  %vm7323_vm9 = vmor %vm7299_vm7, %vm972_vm3  ;;  %s6888_s17 = smov 80   ;;  %s6889_s28 = smov 16  }
  0x60   : > { %v372_v26 = vrot.slane %v238_v17, %v7083_v6  ;;  %v395_v27 = vrot.slane %v239_v18, %v7083_v6  ;;  %v419_v63 = vrot.slane %v240_v24, %v7083_v6  ;;  %v442_v0 = vrot.slane %v241_v28, %v7083_v6  ;;  %vm975_vm11 = vmor %vm7323_vm9, %vm974_vm4  ;;  %s6890_s24 = smov 64   ;;  %s6891_s25 = smov 112  }
  0x61   : > { %v725_v29 = vcombine.high %v724_v21, %v724_v21  ;;  %v7108_v30 = vrot.slane %v724_v21, %v7083_v6  ;;  %v749_v31 = vcombine.high %v748_v22, %v748_v22  ;;  %v7111_v32 = vrot.slane %v748_v22, %v7083_v6  ;;  %vm977_vm12 = vmor %vm975_vm11, %vm976_vm6  ;;  %s6672_s6 = smul.u32 200, %s7063_s30  ;;  %p10616_p0 = scmp.ne.s32.totalorder %s10334_s21, 0 }
  0x62   : > { %v772_v33 = vcombine.high %v771_v23, %v771_v23  ;;  %v7114_v34 = vrot.slane %v771_v23, %v7083_v6  ;;  %v349_v35 = vcombine.high %v348_v25, %v348_v25  ;;  %v7117_v36 = vrot.slane %v348_v25, %v7083_v6  ;;  %vm979_vm13 = vmor %vm977_vm12, %vm978_vm8  ;;  %s6673_s7 = smul.u32 3200, %s6931_s13  ;;  %s6364_s13 = scalar_lea.sflag [#allocation4], %s7063_s30 }
  0x63   : > { %10339 = vst [vmem:[#allocation11_spill] sm:$0xff] %v7108_v30  ;;  %v7120_v37 = vrot.slane %v725_v29, %v7083_v6  ;;  %v7123_v38 = vrot.slane %v749_v31, %v7083_v6  ;;  %v7127_v39 = vcombine.high %v7111_v32, %v7111_v32  ;;  %v373_v40 = vcombine.high %v372_v26, %v372_v26  ;;  %s10104_s29 = scalar_lea.vmem [#allocation7], %s6672_s6  ;;  %s6892_s23 = smov [#allocation7]  }
  0x64   : > { %10340 = vst [vmem:[#allocation12_spill] sm:$0xff] %v7117_v36  ;;  %v7130_v41 = vrot.slane %v772_v33, %v7083_v6  ;;  %v7133_v42 = vrot.slane %v349_v35, %v7083_v6  ;;  %v7136_v43 = vrot.slane %v372_v26, %v7083_v6  ;;  %v396_v44 = vcombine.high %v395_v27, %v395_v27  ;;  %s6377_s8 = sshll.u32 %s10104_s29, 4  ;;  %s10159_s19 = scalar_lea.hbm %s10207_s2, %s6673_s7  ;;  %s10161_s8 = int_to_ptr.vmem [resolvable:$true] %s6377_s8 }
  0x65   : > { %v6609_v45 = vcombine.high %v7108_v30, %v7120_v37  ;;  %v3619_v46 = vcombine.low %v7111_v32, %v7123_v38  ;;  %v4038_v47 = vcombine.low %v7108_v30, %v7120_v37  ;;  %v4039_v48 = vcombine.low %v7127_v39, %v7114_v34  ;;  %s6811_s26 = sshll.u32 %s6892_s23, 4  ;;  %s6812_s26 = int_to_ptr.vmem [resolvable:$false] %s6811_s26 }
  0x66   : > { %v7147_v49 = vrot.slane %v373_v40, %v7083_v6  ;;  %v7151_v50 = vcombine.high %v7136_v43, %v7136_v43  ;;  %v7154_v51 = vrot.slane %v395_v27, %v7083_v6  ;;  %v7157_v52 = vrot.slane %v396_v44, %v7083_v6  ;;  %p6814_p4 = scmp.lt.s32.totalorder %s10161_s8, %s6812_s26 }
  0x67   : > { %v7160_v53 = vrot.slane %v6609_v45, %v7083_v6  ;;  %v7163_v54 = vrot.slane %v3619_v46, %v7083_v6  ;;  %v4046_v55 = vrot.slane %v4038_v47, %v7083_v6  ;;  %v4053_v56 = vrot.slane %v4039_v48, %v7083_v6 }
  0x68   : > { %v6601_v57 = vcombine.high %v7117_v36, %v7133_v42  ;;  %v3276_v58 = vcombine.low %v7136_v43, %v7147_v49  ;;  %v3855_v59 = vcombine.low %v7117_v36, %v7133_v42  ;;  %v3856_v60 = vcombine.low %v7151_v50, %v7154_v51 }
  0x69   : > { %10341 = vst [vmem:[#allocation13_spill] sm:$0xff] %v7160_v53  ;;  %10342 = vst [vmem:[#allocation14_spill] sm:$0xff] %v7163_v54  ;;  %v4054_v61 = vcombine.low %v4046_v55, %v7160_v53  ;;  %v4055_v62 = vcombine.low %v7163_v54, %v4053_v56  ;;  %v420_v9 = vcombine.high %v419_v63, %v419_v63  ;;  %vm980_vm10 = vsmask.f32 7452 }
  0x6a   : > { %v3285_v1 = vrot.slane %v6601_v57, %v7083_v6  ;;  %v3292_v2 = vrot.slane %v3276_v58, %v7083_v6  ;;  %v3863_v4 = vrot.slane %v3855_v59, %v7083_v6  ;;  %v3870_v5 = vrot.slane %v3856_v60, %v7083_v6  ;;  %vm7422_vm14 = vmor %vm979_vm13, %vm980_vm10 }
  0x6b   : > { %v4062_v7 = vrot.slane %v4054_v61, %v7083_v6  ;;  %v4069_v8 = vrot.slane %v4055_v62, %v7083_v6  ;;  %v7186_v10 = vrot.slane %v419_v63, %v7083_v6  ;;  %v443_v13 = vcombine.high %v442_v0, %v442_v0 }
  0x6c   : > { %v3871_v11 = vcombine.low %v3863_v4, %v3285_v1  ;;  %v3872_v12 = vcombine.low %v3292_v2, %v3870_v5  ;;  %v7189_v14 = vrot.slane %v442_v0, %v7083_v6  ;;  %v7193_v17 = vrot.slane %v420_v9, %v7083_v6 }
  0x6d   : > { %v4070_v16 = vcombine.low %v4062_v7, %v4069_v8  ;;  %v7197_v18 = vcombine.high %v7186_v10, %v7186_v10  ;;  %v2046_v19 = vcombine.low %v7154_v51, %v7157_v52  ;;  %v7205_v23 = vrot.slane %v443_v13, %v7083_v6 }
  0x6e   : > { %v3879_v21 = vrot.slane %v3871_v11, %v7083_v6  ;;  %v3886_v22 = vrot.slane %v3872_v12, %v7083_v6  ;;  %v6595_v24 = vcombine.high %v7154_v51, %v7157_v52  ;;  %v2093_v26 = vcombine.low %v7186_v10, %v7193_v17 }
  0x6f   : > { %4216 = vrot.lane.b32.xlu0 %v4070_v16, %s6885_s20  ;;  %v7211_v25 = vrot.slane %v2046_v19, %v7083_v6  ;;  %v2094_v27 = vcombine.low %v7197_v18, %v7189_v14  ;;  %v235_v28 = vmax.bf16 %v10210_v3, %v203_v15  ;;  %v236_v33 = vmax.bf16 %v10210_v3, %v204_v20 }
  0x70   : > { %v3887_v29 = vcombine.low %v3879_v21, %v3886_v22  ;;  %v7219_v31 = vrot.slane %v6595_v24, %v7083_v6  ;;  %v7224_v35 = vcombine.high %v7154_v51, %v7154_v51  ;;  %v7227_v40 = vrot.slane %v2093_v26, %v7083_v6 }
  0x71   : > { %10343 = vst [vmem:[#allocation15_spill] sm:$0xff] %v7211_v25  ;;  %v7230_v44 = vrot.slane %v2094_v27, %v7083_v6  ;;  %v301_v45 = vrot.slane %v235_v28, %v7083_v6  ;;  %v6602_v46 = vcombine.high %v7136_v43, %v7147_v49  ;;  %v325_v48 = vrot.slane %v236_v33, %v7083_v6 }
  0x72   : > { %4202 = vrot.lane.b32.xlu1 %v3887_v29, %s6885_s20  ;;  %v5142_v47 = vcombine.low %v7211_v25, %v7219_v31  ;;  %v3278_v55 = vcombine.low %v7157_v52, %v7224_v35  ;;  %v3307_v56 = vcombine.low %v3285_v1, %v3292_v2  ;;  %v7275_v11 = vcombine.high %v7117_v36, %v7117_v36 }
  0x73   : > { %10344 = vst [vmem:[#allocation16_spill] sm:$0xff] %v7230_v44  ;;  %v5143_v57 = vcombine.low %v7227_v40, %v7230_v44  ;;  %v302_v58 = vcombine.high %v301_v45, %v301_v45  ;;  %v7244_v59 = vrot.slane %v301_v45, %v7083_v6  ;;  %v3299_v60 = vrot.slane %v6602_v46, %v7083_v6 }
  0x74   : > { %v5150_v61 = vrot.slane %v5142_v47, %v7083_v6  ;;  %v326_v62 = vcombine.high %v325_v48, %v325_v48  ;;  %v7249_v63 = vrot.slane %v325_v48, %v7083_v6  ;;  %v7252_v0 = vrot.slane %v3278_v55, %v7083_v6 }
  0x75   : > { %10345 = vst [vmem:[#allocation17_spill] sm:$0xff] %v7244_v59  ;;  %v5157_v1 = vrot.slane %v5143_v57, %v7083_v6  ;;  %v7256_v2 = vrot.slane %v302_v58, %v7083_v6  ;;  %v7260_v4 = vcombine.high %v7244_v59, %v7244_v59  ;;  %v3315_v5 = vrot.slane %v3307_v56, %v7083_v6 }
  0x76   : > { %10346 = vst [vmem:[#allocation18_spill] sm:$0xff] %v7249_v63  ;;  %v7266_v7 = vrot.slane %v326_v62, %v7083_v6  ;;  %v7270_v8 = vcombine.high %v7249_v63, %v7249_v63  ;;  %v3308_v9 = vcombine.low %v3299_v60, %v7252_v0  ;;  %v7285_v16 = vcombine.high %v7133_v42, %v7133_v42 }
  0x77   : > { %10347 = vst [vmem:[#allocation19_spill] sm:$0xff] %v7256_v2  ;;  %v5158_v12 = vcombine.low %v5150_v61, %v5157_v1  ;;  %v7279_v13 = vcombine.high %v7256_v2, %v7256_v2  ;;  %v3226_v15 = vcombine.low %v7256_v2, %v7260_v4  ;;  %v7296_v22 = vcombine.high %v7147_v49, %v7147_v49 }
  0x78   : > { %10348 = vst [vmem:[#allocation20_spill] sm:$0xff] %v7266_v7  ;;  %10349 = vst [vmem:[#allocation21_spill] sm:$0xff] %v7270_v8  ;;  %v7289_v19 = vcombine.high %v7266_v7, %v7266_v7  ;;  %v3228_v20 = vcombine.low %v7266_v7, %v7270_v8  ;;  %v3322_v21 = vrot.slane %v3308_v9, %v7083_v6  ;;  %v999_v44 = vshrl.u32 %v7260_v4, 16 }
  0x79   : > { %5393 = vrot.lane.b32.xlu1 %v5158_v12, %s6886_s5  ;;  %v3227_v26 = vcombine.low %v7279_v13, %v7249_v63  ;;  %v3236_v27 = vrot.slane %v3226_v15, %v7083_v6  ;;  %v2043_v28 = vcombine.low %v7133_v42, %v7275_v11  ;;  %v2044_v29 = vcombine.low %v7285_v16, %v7136_v43 }
  0x7a   : > { %v3229_v45 = vcombine.low %v7289_v19, %v7133_v42  ;;  %v3250_v46 = vrot.slane %v3228_v20, %v7083_v6  ;;  %v3323_v47 = vcombine.low %v3315_v5, %v3322_v21  ;;  %v2045_v56 = vcombine.low %v7147_v49, %v7151_v50  ;;  %v219_v5 = vld [vmem:[%s7067_s3 + $0x40] sm:$0xf] }
  0x7b   : > { %v3243_v48 = vrot.slane %v3227_v26, %v7083_v6  ;;  %v2053_v57 = vrot.slane %v2043_v28, %v7083_v6  ;;  %v2060_v61 = vrot.slane %v2044_v29, %v7083_v6  ;;  %v4857_v62 = vcombine.low %v7296_v22, %v7157_v52 }
  0x7c   : > { %v3257_v60 = vrot.slane %v3229_v45, %v7083_v6  ;;  %v7333_v1 = vcombine.high %v7189_v14, %v7189_v14  ;;  %v7338_v12 = vrot.slane %v2045_v56, %v7083_v6  ;;  %v2124_v15 = vcombine.low %v7219_v31, %v7227_v40 }
  0x7d   : > { %v3258_v9 = vcombine.low %v3236_v27, %v3243_v48  ;;  %3831 = vrot.lane.b32.xlu1 %v3323_v47, %s6887_s14  ;;  %v6615_v20 = vcombine.high %v7186_v10, %v7193_v17  ;;  %v2075_v24 = vcombine.low %v2053_v57, %v2060_v61  ;;  %v4864_v26 = vrot.slane %v4857_v62, %v7083_v6  ;;  %v220_v27 = vld [vmem:[%s7067_s3 + $0x44] sm:$0xf] }
  0x7e   : > { %10354 = vst [vmem:[#allocation22_spill] sm:$0xff] %v7338_v12  ;;  %v3259_v21 = vcombine.low %v3250_v46, %v3257_v60  ;;  %v2095_v28 = vcombine.low %v7205_v23, %v7333_v1  ;;  %v7353_v45 = vrot.slane %v2124_v15, %v7083_v6  ;;  %v251_v40 = vmax.bf16 %v10210_v3, %v219_v5 }
  0x7f   : > { %v3266_v29 = vrot.slane %v3258_v9, %v7083_v6  ;;  %v4881_v31 = vrot.slane %v6615_v20, %v7083_v6  ;;  %v7359_v47 = vrot.slane %v2075_v24, %v7083_v6  ;;  %v4865_v48 = vcombine.low %v7338_v12, %v4864_v26 }
  0x80   : > { %10355 = vst [vmem:[#allocation23_spill] sm:$0xff] %v7353_v45  ;;  %v3273_v46 = vrot.slane %v3259_v21, %v7083_v6  ;;  %v7363_v56 = vrot.slane %v2095_v28, %v7083_v6  ;;  %v252_v57 = vmax.bf16 %v10210_v3, %v220_v27  ;;  %v677_v58 = vrot.slane %v251_v40, %v7083_v6 }
  0x81   : > { %10356 = vst [vmem:[#allocation24_spill] sm:$0xff] %v7359_v47  ;;  %v7369_v60 = vcombine.high %v7157_v52, %v7157_v52  ;;  %v3325_v61 = vcombine.low %v7193_v17, %v7197_v18  ;;  %v4872_v5 = vrot.slane %v4865_v48, %v7083_v6  ;;  %v3888_v15 = vcombine.low %v7189_v14, %v7205_v23 }
  0x82   : > { %10357 = vst [vmem:[#allocation25_spill] sm:$0xff] %v7363_v56  ;;  %v3274_v62 = vcombine.low %v3266_v29, %v3273_v46  ;;  %v4882_v9 = vcombine.low %v4881_v31, %v7363_v56  ;;  %v678_v20 = vcombine.high %v677_v58, %v677_v58  ;;  %v7379_v21 = vrot.slane %v677_v58, %v7083_v6 }
  0x83   : > { %v701_v24 = vrot.slane %v252_v57, %v7083_v6  ;;  %v3324_v26 = vcombine.low %v7369_v60, %v7186_v10  ;;  %v4873_v28 = vcombine.low %v7359_v47, %v4872_v5  ;;  %v7388_v29 = vrot.slane %v3325_v61, %v7083_v6 }
  0x84   : > { %10358 = vst [vmem:[#allocation26_spill] sm:$0xff] %v7379_v21  ;;  %3829 = vrot.lane.b32.xlu0 %v3274_v62, %s6887_s14  ;;  %v4889_v27 = vrot.slane %v4882_v9, %v7083_v6  ;;  %v3895_v31 = vrot.slane %v3888_v15, %v7083_v6  ;;  %v7393_v40 = vrot.slane %v678_v20, %v7083_v6  ;;  %v983_v5 = vshrl.u32 %v7244_v59, 16 }
  0x85   : > { %10359 = vst [vmem:[#allocation27_spill] sm:$0xff] %v7388_v29  ;;  %v7397_v46 = vcombine.high %v7379_v21, %v7379_v21  ;;  %v702_v48 = vcombine.high %v701_v24, %v701_v24  ;;  %v7400_v57 = vrot.slane %v701_v24, %v7083_v6  ;;  %v7404_v61 = vrot.slane %v3324_v26, %v7083_v6 }
  0x86   : > { %10360 = vst [vmem:[#allocation28_spill] sm:$0xff] %v7393_v40  ;;  %v4890_v58 = vcombine.low %v7353_v45, %v4889_v27  ;;  %v3897_v62 = vcombine.low %v7388_v29, %v3895_v31  ;;  %v7410_v9 = vcombine.high %v7393_v40, %v7393_v40  ;;  %v991_v3 = vshrl.u32 %v7256_v2, 16 }
  0x87   : > { %10361 = vst [vmem:[#allocation29_spill] sm:$0xff] %v7400_v57  ;;  %v7413_v15 = vrot.slane %v702_v48, %v7083_v6  ;;  %v7417_v20 = vcombine.high %v7400_v57, %v7400_v57  ;;  %v3569_v24 = vcombine.low %v7393_v40, %v7397_v46  ;;  %v3896_v27 = vcombine.low %v7252_v0, %v7404_v61 }
  0x88   : > { %5116 = vrot.lane.b32.xlu0 %v4873_v28, %s6888_s17  ;;  %5118 = vrot.lane.b32.xlu1 %v4890_v58, %s6888_s17  ;;  %v3911_v31 = vrot.slane %v3897_v62, %v7083_v6  ;;  %v988_v48 = vshll.u32 %v7256_v2, 16  ;;  %v3570_v33 = vcombine.low %v7410_v9, %v7400_v57  ;;  %v996_v45 = vshll.u32 %v7260_v4, 16 }
  0x89   : > { %10362 = vst [vmem:[#allocation30_spill] sm:$0xff] %v7413_v15  ;;  %10363 = vst [vmem:[#allocation31_spill] sm:$0xff] %v7417_v20  ;;  %v7435_v55 = vcombine.high %v7413_v15, %v7413_v15  ;;  %v3571_v28 = vcombine.low %v7413_v15, %v7417_v20  ;;  %v7442_v58 = vrot.slane %v3569_v24, %v7083_v6  ;;  %v1007_v4 = vshrl.u32 %v7279_v13, 16 }
  0x8a   : > { %v7445_v0 = vrot.slane %v3896_v27, %v7083_v6  ;;  %v990_v62 = vsel %vm7422_vm14, %v983_v5, %v988_v48  ;;  %v7455_v25 = vrot.slane %v3570_v33, %v7083_v6  ;;  %v998_v5 = vsel %vm7422_vm14, %v991_v3, %v996_v45 }
  0x8b   : > { %10366 = vst [vmem:[#allocation32_spill] sm:$0xff] %v7442_v58  ;;  %v3572_v12 = vcombine.low %v7435_v55, %v7120_v37  ;;  %v7458_v24 = vrot.slane %v3571_v28, %v7083_v6  ;;  %v1004_v48 = vshll.u32 %v7279_v13, 16  ;;  %v1012_v33 = vshll.u32 %v7249_v63, 16 }
  0x8c   : > { %10367 = vst [vmem:[#allocation33_spill] sm:$0xff] %v7445_v0  ;;  %10368 = vst [vmem:[#allocation34_spill] sm:$0xff] %v7455_v25  ;;  %v3912_v27 = vcombine.low %v7445_v0, %v3911_v31  ;;  %v3601_v59 = vcombine.low %v7442_v58, %v7455_v25  ;;  %v1015_v28 = vshrl.u32 %v7249_v63, 16  ;;  %v1020_v3 = vshll.u32 %v7266_v7, 16 }
  0x8d   : > { %10369 = vst [vmem:[#allocation35_spill] sm:$0xff] %v7458_v24  ;;  %v7466_v47 = vrot.slane %v3572_v12, %v7083_v6  ;;  %v1006_v31 = vsel %vm7422_vm14, %v999_v44, %v1004_v48  ;;  %v1023_v45 = vshrl.u32 %v7266_v7, 16  ;;  %v1028_v13 = vshll.u32 %v7270_v8, 16 }
  0x8e   : > { %4204 = vrot.lane.b32.xlu1 %v3912_v27, %s6885_s20  ;;  %v3609_v58 = vrot.slane %v3601_v59, %v7083_v6  ;;  %v1014_v25 = vsel %vm7422_vm14, %v1007_v4, %v1012_v33  ;;  %v1031_v0 = vshrl.u32 %v7270_v8, 16  ;;  %v1022_v27 = vsel %vm7422_vm14, %v1015_v28, %v1020_v3 }
  0x8f   : > { %10370 = vst [vmem:[#allocation36_spill] sm:$0xff] %v7466_v47  ;;  %v3602_v12 = vcombine.low %v7458_v24, %v7466_v47  ;;  %v1030_v44 = vsel %vm7422_vm14, %v1023_v45, %v1028_v13  ;;  %v1040_v48 = vshrl.u32 %v7117_v36, 16  ;;  %v1045_v63 = vshll.u32 %v7133_v42, 16 }
  0x90   : > { %v10371_v47 = vshll.u32 %v7289_v19, 16  ;;  %v2597_v4 = vcombine.low %v990_v62, %v998_v5  ;;  %v2598_v33 = vcombine.low %v1006_v31, %v1014_v25  ;;  %v2599_v28 = vcombine.low %v1022_v27, %v1030_v44 }
  0x91   : > { %v3616_v7 = vrot.slane %v3602_v12, %v7083_v6  ;;  %v1047_v24 = vsel %vm7422_vm14, %v1040_v48, %v1045_v63  ;;  %v1048_v3 = vshrl.u32 %v7133_v42, 16  ;;  %v1053_v45 = vshll.u32 %v7275_v11, 16 }
  0x92   : > { %v1038_v59 = vsel %vm7422_vm14, %v1031_v0, %v10371_v47  ;;  %v2607_v36 = vrot.slane %v2597_v4, %v7083_v6  ;;  %v2614_v12 = vrot.slane %v2598_v33, %v7083_v6  ;;  %v2621_v19 = vrot.slane %v2599_v28, %v7083_v6 }
  0x93   : > { %v3617_v13 = vcombine.low %v3609_v58, %v3616_v7  ;;  %v2600_v8 = vcombine.low %v1038_v59, %v1047_v24  ;;  %v7504_v47 = vsel %vm7422_vm14, %v1048_v3, %v1053_v45  ;;  %v1056_v25 = vshrl.u32 %v7275_v11, 16 }
  0x94   : > { %v1061_v63 = vshll.u32 %v7285_v16, 16  ;;  %v2629_v7 = vcombine.low %v2607_v36, %v2614_v12  ;;  %v1064_v58 = vshrl.u32 %v7285_v16, 16  ;;  %v1069_v0 = vshll.u32 %v7136_v43, 16 }
  0x95   : > { %3843 = vrot.lane.b32.xlu0 %v3617_v13, %s6887_s14  ;;  %v2628_v42 = vrot.slane %v2600_v8, %v7083_v6  ;;  %v1072_v5 = vshrl.u32 %v7136_v43, 16  ;;  %v1077_v31 = vshll.u32 %v7147_v49, 16  ;;  %v1080_v11 = vshrl.u32 %v7147_v49, 16 }
  0x96   : > { %v7514_v62 = vsel %vm7422_vm14, %v1056_v25, %v1061_v63  ;;  %v2637_v44 = vrot.slane %v2629_v7, %v7083_v6  ;;  %v7522_v36 = vsel %vm7422_vm14, %v1064_v58, %v1069_v0  ;;  %v1085_v8 = vshll.u32 %v7151_v50, 16 }
  0x97   : > { %v2630_v27 = vcombine.low %v2621_v19, %v2628_v42  ;;  %v7527_v16 = vsel %vm7422_vm14, %v1072_v5, %v1077_v31  ;;  %v1088_v48 = vshrl.u32 %v7151_v50, 16  ;;  %v1097_v43 = vshrl.u32 %v7154_v51, 16 }
  0x98   : > { %v1102_v59 = vshll.u32 %v7157_v52, 16  ;;  %v1087_v4 = vsel %vm7422_vm14, %v1080_v11, %v1085_v8  ;;  %v4228_v33 = vcombine.low %v1047_v24, %v7504_v47  ;;  %v4229_v28 = vcombine.low %v7514_v62, %v7522_v36 }
  0x99   : > { %v2644_v49 = vrot.slane %v2630_v27, %v7083_v6  ;;  %v10372_v3 = vshll.u32 %v7296_v22, 16  ;;  %v4230_v51 = vcombine.low %v7527_v16, %v1087_v4  ;;  %v7547_v13 = vcombine.high %v7193_v17, %v7193_v17 }
  0x9a   : > { %v1104_v50 = vsel %vm7422_vm14, %v1097_v43, %v1102_v59  ;;  %v4238_v24 = vrot.slane %v4228_v33, %v7083_v6  ;;  %v4245_v25 = vrot.slane %v4229_v28, %v7083_v6  ;;  %v1105_v63 = vshrl.u32 %v7157_v52, 16 }
  0x9b   : > { %v1095_v45 = vsel %vm7422_vm14, %v1088_v48, %v10372_v3  ;;  %v2645_v12 = vcombine.low %v2637_v44, %v2644_v49  ;;  %v4252_v22 = vrot.slane %v4230_v51, %v7083_v6  ;;  %v1110_v42 = vshll.u32 %v7224_v35, 16 }
  0x9c   : > { %v4231_v19 = vcombine.low %v1095_v45, %v1104_v50  ;;  %v1113_v7 = vshrl.u32 %v7224_v35, 16  ;;  %v4260_v0 = vcombine.low %v4238_v24, %v4245_v25  ;;  %v1118_v5 = vshll.u32 %v7369_v60, 16 }
  0x9d   : > { %3200 = vrot.lane.b32.xlu0 %v2645_v12, %s6889_s28  ;;  %v1121_v31 = vshrl.u32 %v7369_v60, 16  ;;  %v7561_v11 = vsel %vm7422_vm14, %v1105_v63, %v1110_v42  ;;  %v1126_v52 = vshll.u32 %v7186_v10, 16  ;;  %v1129_v27 = vshrl.u32 %v7186_v10, 16 }
  0x9e   : > { %v4259_v58 = vrot.slane %v4231_v19, %v7083_v6  ;;  %v1134_v35 = vshll.u32 %v7193_v17, 16  ;;  %v4268_v8 = vrot.slane %v4260_v0, %v7083_v6  ;;  %v7569_v48 = vsel %vm7422_vm14, %v1113_v7, %v1118_v5 }
  0x9f   : > { %v1137_v43 = vshrl.u32 %v7193_v17, 16  ;;  %v7574_v60 = vsel %vm7422_vm14, %v1121_v31, %v1126_v52  ;;  %v1142_v10 = vshll.u32 %v7197_v18, 16  ;;  %v1145_v49 = vshrl.u32 %v7197_v18, 16 }
  0xa0   : > { %v4261_v44 = vcombine.low %v4252_v22, %v4259_v58  ;;  %v7578_v59 = vsel %vm7422_vm14, %v1129_v27, %v1134_v35  ;;  %v1150_v28 = vshll.u32 %v7547_v13, 16  ;;  %v1154_v3 = vshrl.u32 %v7189_v14, 16 }
  0xa1   : > { %v1159_v17 = vshll.u32 %v7205_v23, 16  ;;  %v7588_v51 = vsel %vm7422_vm14, %v1137_v43, %v1142_v10  ;;  %v2649_v12 = vcombine.low %v1104_v50, %v7561_v11  ;;  %v2695_v19 = vcombine.low %v7569_v48, %v7574_v60 }
  0xa2   : > { %v4275_v33 = vrot.slane %v4261_v44, %v7083_v6  ;;  %v2646_v18 = vcombine.low %v7504_v47, %v7514_v62  ;;  %v7597_v25 = vsel %vm7422_vm14, %v1145_v49, %v1150_v28  ;;  %v2696_v63 = vcombine.low %v7578_v59, %v7588_v51 }
  0xa3   : > { %v7601_v22 = vsel %vm7422_vm14, %v1154_v3, %v1159_v17  ;;  %v2677_v50 = vrot.slane %v2649_v12, %v7083_v6  ;;  %v7609_v7 = vrot.slane %v2695_v19, %v7083_v6  ;;  %v2647_v47 = vcombine.low %v7522_v36, %v7527_v16 }
  0xa4   : > { %v4276_v24 = vcombine.low %v4268_v8, %v4275_v33  ;;  %v2697_v42 = vcombine.low %v7597_v25, %v7601_v22  ;;  %v7615_v62 = vrot.slane %v2696_v63, %v7083_v6  ;;  %v2648_v58 = vcombine.low %v1087_v4, %v1095_v45 }
  0xa5   : > { %v2656_v0 = vrot.slane %v2646_v18, %v7083_v6  ;;  %v1439_v5 = vshrl.u32 %v7379_v21, 16  ;;  %v5419_v52 = vcombine.low %v2677_v50, %v7609_v7  ;;  %v2663_v27 = vrot.slane %v2647_v47, %v7083_v6 }
  0xa6   : > { %4831 = vrot.lane.b32.xlu1 %v4276_v24, %s6890_s24  ;;  %v7620_v31 = vrot.slane %v2697_v42, %v7083_v6  ;;  %v1444_v36 = vshll.u32 %v7393_v40, 16  ;;  %v2670_v16 = vrot.slane %v2648_v58, %v7083_v6  ;;  %v1447_v35 = vshrl.u32 %v7393_v40, 16 }
  0xa7   : > { %v1452_v44 = vshll.u32 %v7397_v46, 16  ;;  %v1455_v4 = vshrl.u32 %v7397_v46, 16  ;;  %v5427_v8 = vrot.slane %v5419_v52, %v7083_v6  ;;  %v2678_v43 = vcombine.low %v2656_v0, %v2663_v27 }
  0xa8   : > { %v5420_v45 = vcombine.low %v7615_v62, %v7620_v31  ;;  %v7634_v10 = vsel %vm7422_vm14, %v1439_v5, %v1444_v36  ;;  %v2679_v49 = vcombine.low %v2670_v16, %v2677_v50  ;;  %v1460_v28 = vshll.u32 %v7410_v9, 16 }
  0xa9   : > { %10373 = vst [vmem:[#allocation37_spill] sm:$0xff] %v7634_v10  ;;  %v7638_v33 = vsel %vm7422_vm14, %v1447_v35, %v1452_v44  ;;  %v1463_v3 = vshrl.u32 %v7410_v9, 16  ;;  %v2686_v17 = vrot.slane %v2678_v43, %v7083_v6  ;;  %v1468_v12 = vshll.u32 %v7400_v57, 16 }
  0xaa   : > { %10374 = vst [vmem:[#allocation38_spill] sm:$0xff] %v7638_v33  ;;  %v5434_v46 = vrot.slane %v5420_v45, %v7083_v6  ;;  %v1471_v19 = vshrl.u32 %v7400_v57, 16  ;;  %v2693_v18 = vrot.slane %v2679_v49, %v7083_v6  ;;  %v7649_v24 = vsel %vm7422_vm14, %v1455_v4, %v1460_v28 }
  0xab   : > { %10375 = vst [vmem:[#allocation39_spill] sm:$0xff] %v7649_v24  ;;  %v1476_v63 = vshll.u32 %v7413_v15, 16  ;;  %v1479_v50 = vshrl.u32 %v7413_v15, 16  ;;  %v7655_v9 = vsel %vm7422_vm14, %v1463_v3, %v1468_v12  ;;  %v1484_v47 = vshll.u32 %v7417_v20, 16 }
  0xac   : > { %v5435_v42 = vcombine.low %v5427_v8, %v5434_v46  ;;  %10376 = vst [vmem:[#allocation40_spill] sm:$0xff] %v7655_v9  ;;  %v1487_v58 = vshrl.u32 %v7417_v20, 16  ;;  %v2694_v0 = vcombine.low %v2686_v17, %v2693_v18  ;;  %v1496_v52 = vshrl.u32 %v7108_v30, 16 }
  0xad   : > { %v7661_v5 = vsel %vm7422_vm14, %v1471_v19, %v1476_v63  ;;  %v1501_v27 = vshll.u32 %v7120_v37, 16  ;;  %v7668_v36 = vsel %vm7422_vm14, %v1479_v50, %v1484_v47  ;;  %v10379_v16 = vshll.u32 %v7435_v55, 16 }
  0xae   : > { %10377 = vst [vmem:[#allocation41_spill] sm:$0xff] %v7661_v5  ;;  %5686 = vrot.lane.b32.xlu0 %v5435_v42, %s6891_s25  ;;  %10378 = vst [vmem:[#allocation42_spill] sm:$0xff] %v7668_v36  ;;  %v2940_v44 = vcombine.low %v7634_v10, %v7638_v33  ;;  %v2941_v4 = vcombine.low %v7649_v24, %v7655_v9  ;;  %3202 = vrot.lane.b32.xlu1 %v2694_v0, %s6889_s28  ;;  %v1162_v55 = vshrl.u32 %v7205_v23, 16  ;;  %v224_v10 = vld [vmem:[%s7067_s3 + $0x54] sm:$0xf]  ;;  %vm5875_vm15 = vcmask 130048  }
  0xaf   : > { %v7674_v35 = vsel %vm7422_vm14, %v1487_v58, %v10379_v16  ;;  %v1503_v45 = vsel %vm7422_vm14, %v1496_v52, %v1501_v27  ;;  %v2942_v8 = vcombine.low %v7661_v5, %v7668_v36  ;;  %v1167_v43 = vshll.u32 %v7333_v1, 16 }
  0xb0   : > { %10380 = vst [vmem:[#allocation43_spill] sm:$0xff] %v7674_v35  ;;  %v2943_v49 = vcombine.low %v7674_v35, %v1503_v45  ;;  %v7689_v28 = vrot.slane %v2940_v44, %v7083_v6  ;;  %v7692_v3 = vrot.slane %v2941_v4, %v7083_v6  ;;  %v4277_v46 = vcombine.low %v7561_v11, %v7569_v48 }
  0xb1   : > { %v7697_v17 = vrot.slane %v2942_v8, %v7083_v6  ;;  %v7701_v12 = vsel %vm7422_vm14, %v1162_v55, %v1167_v43  ;;  %v4278_v19 = vcombine.low %v7574_v60, %v7578_v59  ;;  %v4279_v18 = vcombine.low %v7588_v51, %v7597_v25 }
  0xb2   : > { %10381 = vst [vmem:[#allocation44_spill] sm:$0xff] %v7689_v28  ;;  %10382 = vst [vmem:[#allocation45_spill] sm:$0xff] %v7692_v3  ;;  %v7708_v63 = vrot.slane %v2943_v49, %v7083_v6  ;;  %v2972_v50 = vcombine.low %v7689_v28, %v7692_v3  ;;  %v4280_v11 = vcombine.low %v7601_v22, %v7701_v12  ;;  %v1504_v52 = vshrl.u32 %v7120_v37, 16 }
  0xb3   : > { %10383 = vst [vmem:[#allocation46_spill] sm:$0xff] %v7697_v17  ;;  %v4287_v48 = vrot.slane %v4277_v46, %v7083_v6  ;;  %v4294_v42 = vrot.slane %v4278_v19, %v7083_v6  ;;  %v4301_v47 = vrot.slane %v4279_v18, %v7083_v6  ;;  %v740_v60 = vcombine.high %v7108_v30, %v7108_v30 }
  0xb4   : > { %10384 = vst [vmem:[#allocation47_spill] sm:$0xff] %v7708_v63  ;;  %v741_v59 = vcombine.high %v7120_v37, %v7120_v37  ;;  %v2973_v51 = vcombine.low %v7697_v17, %v7708_v63  ;;  %v2980_v25 = vrot.slane %v2972_v50, %v7083_v6  ;;  %v4308_v58 = vrot.slane %v4280_v11, %v7083_v6 }
  0xb5   : > { %v7727_v22 = vcombine.high %v7123_v38, %v7123_v38  ;;  %v4309_v0 = vcombine.low %v4287_v48, %v4294_v42  ;;  %v1509_v27 = vshll.u32 %v740_v60, 16  ;;  %v1512_v16 = vshrl.u32 %v740_v60, 16  ;;  %v210_v42 = vld [vmem:[%s7067_s3 + $0x1c] sm:$0xf] }
  0xb6   : > { %v2987_v44 = vrot.slane %v2973_v51, %v7083_v6  ;;  %v4310_v4 = vcombine.low %v4301_v47, %v4308_v58  ;;  %v1517_v8 = vshll.u32 %v741_v59, 16  ;;  %v1520_v55 = vshrl.u32 %v741_v59, 16 }
  0xb7   : > { %v4317_v43 = vrot.slane %v4309_v0, %v7083_v6  ;;  %v7734_v49 = vsel %vm7422_vm14, %v1504_v52, %v1509_v27  ;;  %v1525_v46 = vshll.u32 %v7111_v32, 16  ;;  %v1528_v19 = vshrl.u32 %v7111_v32, 16 }
  0xb8   : > { %v2988_v18 = vcombine.low %v2980_v25, %v2987_v44  ;;  %v4324_v50 = vrot.slane %v4310_v4, %v7083_v6  ;;  %v7741_v11 = vsel %vm7422_vm14, %v1512_v16, %v1517_v8  ;;  %v1533_v48 = vshll.u32 %v7123_v38, 16  ;;  %v211_v25 = vld [vmem:[%s7067_s3 + $0x20] sm:$0xf] }
  0xb9   : > { %v7747_v47 = vsel %vm7422_vm14, %v1520_v55, %v1525_v46  ;;  %v1536_v51 = vshrl.u32 %v7123_v38, 16  ;;  %v1541_v58 = vshll.u32 %v7127_v39, 16  ;;  %v1544_v0 = vshrl.u32 %v7127_v39, 16 }
  0xba   : > { %3214 = vrot.lane.b32.xlu0 %v2988_v18, %s6889_s28  ;;  %v4325_v52 = vcombine.low %v4317_v43, %v4324_v50  ;;  %v7756_v27 = vsel %vm7422_vm14, %v1528_v19, %v1533_v48  ;;  %v1549_v16 = vshll.u32 %v7727_v22, 16  ;;  %v1553_v44 = vshrl.u32 %v7114_v34, 16 }
  0xbb   : > { %v7762_v4 = vsel %vm7422_vm14, %v1536_v51, %v1541_v58  ;;  %v1558_v8 = vshll.u32 %v7130_v41, 16  ;;  %v4571_v55 = vcombine.low %v1503_v45, %v7734_v49  ;;  %v4572_v46 = vcombine.low %v7741_v11, %v7747_v47 }
  0xbc   : > { %4833 = vrot.lane.b32.xlu1 %v4325_v52, %s6890_s24  ;;  %v7771_v43 = vsel %vm7422_vm14, %v1544_v0, %v1549_v16  ;;  %v4573_v19 = vcombine.low %v7756_v27, %v7762_v4  ;;  %v10385_v18 = vmov 0   ;;  %v459_v52 = vcombine.high %v7205_v23, %v7205_v23 }
  0xbd   : > { %v242_v50 = vmax.bf16 %v10385_v18, %v210_v42  ;;  %v243_v48 = vmax.bf16 %v10385_v18, %v211_v25  ;;  %v7779_v51 = vsel %vm7422_vm14, %v1553_v44, %v1558_v8  ;;  %v4581_v45 = vrot.slane %v4571_v55, %v7083_v6 }
  0xbe   : > { %v4588_v58 = vrot.slane %v4572_v46, %v7083_v6  ;;  %v4574_v0 = vcombine.low %v7771_v43, %v7779_v51  ;;  %v4595_v16 = vrot.slane %v4573_v19, %v7083_v6  ;;  %v2386_v44 = vcombine.low %v7120_v37, %v740_v60 }
  0xbf   : > { %v466_v42 = vrot.slane %v242_v50, %v7083_v6  ;;  %v489_v25 = vrot.slane %v243_v48, %v7083_v6  ;;  %v2387_v8 = vcombine.low %v741_v59, %v7111_v32  ;;  %v2388_v55 = vcombine.low %v7123_v38, %v7127_v39 }
  0xc0   : > { %v4603_v63 = vcombine.low %v4581_v45, %v4588_v58  ;;  %v4602_v46 = vrot.slane %v4574_v0, %v7083_v6  ;;  %v7803_v48 = vrot.slane %v2386_v44, %v7083_v6  ;;  %v1178_v5 = vshrl.u32 %v459_v52, 16 }
  0xc1   : > { %v467_v36 = vcombine.high %v466_v42, %v466_v42  ;;  %v7796_v35 = vrot.slane %v466_v42, %v7083_v6  ;;  %v490_v9 = vcombine.high %v489_v25, %v489_v25  ;;  %v7800_v50 = vrot.slane %v489_v25, %v7083_v6 }
  0xc2   : > { %v4611_v19 = vrot.slane %v4603_v63, %v7083_v6  ;;  %10386 = vst [vmem:[#allocation48_spill] sm:$0xff] %v7803_v48  ;;  %v7806_v37 = vrot.slane %v2387_v8, %v7083_v6  ;;  %v4604_v60 = vcombine.low %v4595_v16, %v4602_v46  ;;  %v7820_v58 = vrot.slane %v2388_v55, %v7083_v6 }
  0xc3   : > { %v7809_v39 = vrot.slane %v467_v36, %v7083_v6  ;;  %v7813_v59 = vcombine.high %v7796_v35, %v7796_v35  ;;  %v7816_v45 = vrot.slane %v490_v9, %v7083_v6  ;;  %v2141_v63 = vcombine.low %v459_v52, %v7796_v35 }
  0xc4   : > { %10387 = vst [vmem:[#allocation49_spill] sm:$0xff] %v7806_v37  ;;  %10388 = vst [vmem:[#allocation50_spill] sm:$0xff] %v7820_v58  ;;  %v2418_v0 = vcombine.low %v7803_v48, %v7806_v37  ;;  %v4992_v16 = vcombine.low %v7727_v22, %v7130_v41  ;;  %v4618_v36 = vrot.slane %v4604_v60, %v7083_v6  ;;  %v1170_v48 = vshrl.u32 %v7333_v1, 16 }
  0xc5   : > { %v2142_v42 = vcombine.low %v7809_v39, %v7813_v59  ;;  %v2143_v9 = vcombine.low %v7800_v50, %v7816_v45  ;;  %v7833_v25 = vcombine.high %v7800_v50, %v7800_v50  ;;  %v7836_v44 = vrot.slane %v2141_v63, %v7083_v6 }
  0xc6   : > { %v7839_v8 = vrot.slane %v2418_v0, %v7083_v6  ;;  %v4999_v22 = vrot.slane %v4992_v16, %v7083_v6  ;;  %v7844_v55 = vcombine.high %v7809_v39, %v7809_v39  ;;  %v4619_v46 = vcombine.low %v4611_v19, %v4618_v36 }
  0xc7   : > { %v7847_v60 = vrot.slane %v2142_v42, %v7083_v6  ;;  %v7850_v37 = vrot.slane %v2143_v9, %v7083_v6  ;;  %v5159_v63 = vcombine.low %v7363_v56, %v7836_v44  ;;  %v1175_v16 = vshll.u32 %v459_v52, 16 }
  0xc8   : > { %10389 = vst [vmem:[#allocation51_spill] sm:$0xff] %v7839_v8  ;;  %v5000_v0 = vcombine.low %v7820_v58, %v4999_v22  ;;  %4845 = vrot.lane.b32.xlu0 %v4619_v46, %s6890_s24  ;;  %v1183_v36 = vshll.u32 %v7796_v35, 16  ;;  %v1186_v42 = vshrl.u32 %v7796_v35, 16  ;;  %v1191_v1 = vshll.u32 %v7809_v39, 16 }
  0xc9   : > { %10390 = vst [vmem:[#allocation52_spill] sm:$0xff] %v7850_v37  ;;  %v5160_v19 = vcombine.low %v7847_v60, %v7850_v37  ;;  %v5167_v9 = vrot.slane %v5159_v63, %v7083_v6  ;;  %v7866_v22 = vsel %vm7422_vm14, %v1170_v48, %v1175_v16  ;;  %v1194_v52 = vshrl.u32 %v7809_v39, 16 }
  0xca   : > { %v5007_v33 = vrot.slane %v5000_v0, %v7083_v6  ;;  %v7872_v37 = vsel %vm7422_vm14, %v1178_v5, %v1183_v36  ;;  %v7876_v24 = vsel %vm7422_vm14, %v1186_v42, %v1191_v1  ;;  %v1199_v63 = vshll.u32 %v7813_v59, 16 }
  0xcb   : > { %v5174_v46 = vrot.slane %v5160_v19, %v7083_v6  ;;  %v1202_v48 = vshrl.u32 %v7813_v59, 16  ;;  %v1207_v16 = vshll.u32 %v7844_v55, 16  ;;  %v1211_v58 = vshrl.u32 %v7800_v50, 16  ;;  %v225_v19 = vld [vmem:[%s7067_s3 + $0x58] sm:$0xf] }
  0xcc   : > { %v5008_v0 = vcombine.low %v7839_v8, %v5007_v33  ;;  %v7887_v5 = vsel %vm7422_vm14, %v1194_v52, %v1199_v63  ;;  %v1216_v36 = vshll.u32 %v7816_v45, 16  ;;  %v1219_v42 = vshrl.u32 %v7816_v45, 16 }
  0xcd   : > { %v5175_v56 = vcombine.low %v5167_v9, %v5174_v46  ;;  %v7894_v33 = vsel %vm7422_vm14, %v1202_v48, %v1207_v16  ;;  %v1224_v1 = vshll.u32 %v7833_v25, 16  ;;  %v2698_v8 = vcombine.low %v7701_v12, %v7866_v22 }
  0xce   : > { %5130 = vrot.lane.b32.xlu0 %v5008_v0, %s6888_s17  ;;  %v2744_v9 = vcombine.low %v7872_v37, %v7876_v24  ;;  %v7904_v52 = vsel %vm7422_vm14, %v1211_v58, %v1216_v36  ;;  %v2745_v46 = vcombine.low %v7887_v5, %v7894_v33  ;;  %v256_v63 = vmax.bf16 %v10385_v18, %v224_v10 }
  0xcf   : > { %5395 = vrot.lane.b32.xlu1 %v5175_v56, %s6886_s5  ;;  %v257_v0 = vmax.bf16 %v10385_v18, %v225_v19  ;;  %v7912_v48 = vsel %vm7422_vm14, %v1219_v42, %v1224_v1  ;;  %v2726_v12 = vrot.slane %v2698_v8, %v7083_v6  ;;  %v2389_v56 = vcombine.low %v7114_v34, %v7130_v41 }
  0xd0   : > { %v7916_v16 = vrot.slane %v2744_v9, %v7083_v6  ;;  %v2746_v58 = vcombine.low %v7904_v52, %v7912_v48  ;;  %v7923_v36 = vrot.slane %v2745_v46, %v7083_v6  ;;  %v795_v10 = vrot.slane %v256_v63, %v7083_v6 }
  0xd1   : > { %v818_v19 = vrot.slane %v257_v0, %v7083_v6  ;;  %v7929_v8 = vrot.slane %v2389_v56, %v7083_v6  ;;  %v6599_v1 = vcombine.high %v7114_v34, %v7130_v41  ;;  %v2727_v9 = vcombine.low %v7609_v7, %v7615_v62 }
  0xd2   : > { %10391 = vst [vmem:[#allocation53_spill] sm:$0xff] %v7916_v16  ;;  %10392 = vst [vmem:[#allocation54_spill] sm:$0xff] %v7923_v36  ;;  %v5436_v42 = vcombine.low %v2726_v12, %v7916_v16  ;;  %v7936_v28 = vrot.slane %v2746_v58, %v7083_v6  ;;  %v796_v46 = vcombine.high %v795_v10, %v795_v10  ;;  %vm5915_vm0 = vcmask 261120  }
  0xd3   : > { %10393 = vst [vmem:[#allocation55_spill] sm:$0xff] %v7929_v8  ;;  %v7939_v3 = vrot.slane %v795_v10, %v7083_v6  ;;  %v819_v63 = vcombine.high %v818_v19, %v818_v19  ;;  %v7943_v17 = vrot.slane %v818_v19, %v7083_v6  ;;  %v7946_v56 = vrot.slane %v6599_v1, %v7083_v6 }
  0xd4   : > { %10394 = vst [vmem:[#allocation56_spill] sm:$0xff] %v7936_v28  ;;  %v5444_v0 = vrot.slane %v5436_v42, %v7083_v6  ;;  %v2728_v20 = vcombine.low %v7620_v31, %v2726_v12  ;;  %v5437_v7 = vcombine.low %v7923_v36, %v7936_v28  ;;  %v7952_v62 = vrot.slane %v796_v46, %v7083_v6 }
  0xd5   : > { %v7956_v58 = vcombine.high %v7939_v3, %v7939_v3  ;;  %v7959_v10 = vrot.slane %v819_v63, %v7083_v6  ;;  %v5261_v19 = vcombine.low %v7929_v8, %v7946_v56  ;;  %v2735_v42 = vrot.slane %v2727_v9, %v7083_v6 }
  0xd6   : > { %v2742_v31 = vrot.slane %v2728_v20, %v7083_v6  ;;  %v7967_v12 = vcombine.high %v7114_v34, %v7114_v34  ;;  %v5451_v1 = vrot.slane %v5437_v7, %v7083_v6  ;;  %v2436_v46 = vcombine.low %v7939_v3, %v7952_v62 }
  0xd7   : > { %v2437_v63 = vcombine.low %v7956_v58, %v7943_v17  ;;  %v7976_v30 = vcombine.high %v7130_v41, %v7130_v41  ;;  %v5269_v9 = vrot.slane %v5261_v19, %v7083_v6  ;;  %v7981_v20 = vcombine.high %v7952_v62, %v7952_v62 }
  0xd8   : > { %v2743_v8 = vcombine.low %v2735_v42, %v2742_v31  ;;  %v1561_v34 = vshrl.u32 %v7130_v41, 16  ;;  %v5452_v7 = vcombine.low %v5444_v0, %v5451_v1  ;;  %v7985_v57 = vrot.slane %v2436_v46, %v7083_v6 }
  0xd9   : > { %10395 = vst [vmem:[#allocation57_spill] sm:$0xff] %v7981_v20  ;;  %v7988_v15 = vrot.slane %v2437_v63, %v7083_v6  ;;  %v1566_v21 = vshll.u32 %v7967_v12, 16  ;;  %v1569_v40 = vshrl.u32 %v7967_v12, 16  ;;  %v1574_v19 = vshll.u32 %v7976_v30, 16 }
  0xda   : > { %v1577_v42 = vshrl.u32 %v7976_v30, 16  ;;  %v1582_v31 = vshll.u32 %v7939_v3, 16  ;;  %5688 = vrot.lane.b32.xlu1 %v5452_v7, %s6891_s25  ;;  %v1585_v46 = vshrl.u32 %v7939_v3, 16  ;;  %v1590_v63 = vshll.u32 %v7952_v62, 16 }
  0xdb   : > { %10396 = vst [vmem:[#allocation58_spill] sm:$0xff] %v7988_v15  ;;  %v5262_v0 = vcombine.low %v7985_v57, %v7988_v15  ;;  %v8000_v1 = vsel %vm7422_vm14, %v1561_v34, %v1566_v21  ;;  %v8006_v2 = vsel %vm7422_vm14, %v1569_v40, %v1574_v19  ;;  %v1593_v7 = vshrl.u32 %v7952_v62, 16 }
  0xdc   : > { %v8010_v28 = vsel %vm7422_vm14, %v1577_v42, %v1582_v31  ;;  %v1598_v15 = vshll.u32 %v7956_v58, 16  ;;  %v8017_v21 = vsel %vm7422_vm14, %v1585_v46, %v1590_v63  ;;  %v1601_v34 = vshrl.u32 %v7956_v58, 16 }
  0xdd   : > { %v5276_v16 = vrot.slane %v5262_v0, %v7083_v6  ;;  %v1606_v40 = vshll.u32 %v7981_v20, 16  ;;  %v1610_v42 = vshrl.u32 %v7943_v17, 16  ;;  %v1615_v31 = vshll.u32 %v7959_v10, 16 }
  0xde   : > { %v8023_v19 = vsel %vm7422_vm14, %v1593_v7, %v1598_v15  ;;  %v2992_v0 = vcombine.low %v7779_v51, %v8000_v1  ;;  %3204 = vrot.lane.b32.xlu1 %v2743_v8, %s6889_s28  ;;  %v3038_v63 = vcombine.low %v8006_v2, %v8010_v28  ;;  %v3326_v51 = vcombine.low %v7547_v13, %v7205_v23  ;;  %v6738_v8 = vld [vmem:[%s7075_s27] sm:$0xff]  }
  0xdf   : > { %v5277_v36 = vcombine.low %v5269_v9, %v5276_v16  ;;  %v8032_v46 = vsel %vm7422_vm14, %v1601_v34, %v1606_v40  ;;  %v3039_v15 = vcombine.low %v8017_v21, %v8023_v19  ;;  %v8040_v7 = vsel %vm7422_vm14, %v1610_v42, %v1615_v31  ;;  %6202 = vmatpush1.bf16.msra.mxu0 %v6738_v8 }
  0xe0   : > { %v3020_v20 = vrot.slane %v2992_v0, %v7083_v6  ;;  %v6603_v16 = vcombine.high %v7189_v14, %v7205_v23  ;;  %v3040_v9 = vcombine.low %v8032_v46, %v8040_v7  ;;  %v8052_v34 = vrot.slane %v3038_v63, %v7083_v6  ;;  %6203 = vmatprep.subr.bf16.mxu0 %v10385_v18 }
  0xe1   : > { %5407 = vrot.lane.b32.xlu0 %v5277_v36, %s6886_s5  ;;  %v8055_v40 = vrot.slane %v3039_v15, %v7083_v6  ;;  %v3356_v42 = vcombine.low %v7404_v61, %v7388_v29  ;;  %v8060_v13 = vrot.slane %v3326_v51, %v7083_v6  ;;  %v2989_v23 = vcombine.low %v7734_v49, %v7741_v11 }
  0xe2   : > { %v3355_v14 = vrot.slane %v6603_v16, %v7083_v6  ;;  %v2990_v36 = vcombine.low %v7747_v47, %v7756_v27  ;;  %v8068_v31 = vrot.slane %v3040_v9, %v7083_v6  ;;  %v5538_v0 = vcombine.low %v3020_v20, %v8052_v34  ;;  %v6739_v27 = vld [vmem:[%s7075_s27 + $0x8] sm:$0xff]   ;;  %6660 = vmatpush1.bf16.msra.mxu1 %v6738_v8 }
  0xe3   : > { %10397 = vst [vmem:[#allocation59_spill] sm:$0xff] %v8060_v13  ;;  %v3364_v63 = vrot.slane %v3356_v42, %v7083_v6  ;;  %v2991_v61 = vcombine.low %v7762_v4, %v7771_v43  ;;  %v8077_v49 = vrot.slane %v2989_v23, %v7083_v6  ;;  %v3373_v47 = vcombine.low %v7796_v35, %v7809_v39 }
  0xe4   : > { %v3357_v15 = vcombine.low %v8060_v13, %v3355_v14  ;;  %v8080_v11 = vrot.slane %v2990_v36, %v7083_v6  ;;  %v5539_v51 = vcombine.low %v8055_v40, %v8068_v31  ;;  %v5546_v4 = vrot.slane %v5538_v0, %v7083_v6  ;;  %6652 = vmatprep.subr.bf16.mxu1 %v10385_v18 }
  0xe5   : > { %10398 = vst [vmem:[#allocation60_spill] sm:$0xff] %v8077_v49  ;;  %v8089_v43 = vrot.slane %v2991_v61, %v7083_v6  ;;  %v3375_v16 = vcombine.low %v7816_v45, %v7833_v25  ;;  %v8098_v8 = vrot.slane %v3373_v47, %v7083_v6  ;;  %v3913_v23 = vcombine.low %v7813_v59, %v7800_v50 }
  0xe6   : > { %10399 = vst [vmem:[#allocation61_spill] sm:$0xff] %v8080_v11  ;;  %v3371_v9 = vrot.slane %v3357_v15, %v7083_v6  ;;  %v3021_v42 = vcombine.low %v8077_v49, %v8080_v11  ;;  %6204 = vmatpush1.bf16.msra.mxu0 %v6739_v27  ;;  %v5553_v36 = vrot.slane %v5539_v51, %v7083_v6  ;;  %vm5942_vm1 = vcmask 392192  }
  0xe7   : > { %10400 = vst [vmem:[#allocation62_spill] sm:$0xff] %v8089_v43  ;;  %v3022_v0 = vcombine.low %v8089_v43, %v3020_v20  ;;  %v8105_v61 = vrot.slane %v3375_v16, %v7083_v6  ;;  %v6610_v15 = vcombine.high %v7111_v32, %v7123_v38  ;;  %6205 = vmatprep.subr.bf16.mxu0 %v10385_v18  ;;  %v6740_v32 = vld [vmem:[%s7075_s27 + $0x10] sm:$0xff]   ;;  %vm5969_vm2 = vcmask 523264  }
  0xe8   : > { %v3372_v11 = vcombine.low %v3364_v63, %v3371_v9  ;;  %v3029_v47 = vrot.slane %v3021_v42, %v7083_v6  ;;  %v3920_v49 = vrot.slane %v3913_v23, %v7083_v6  ;;  %v3921_v59 = vcombine.low %v3355_v14, %v8098_v8  ;;  %6661 = vmatpush1.bf16.msra.mxu1 %v6739_v27 }
  0xe9   : > { %10401 = vst [vmem:[#allocation63_spill] sm:$0xff] %v8105_v61  ;;  %v5554_v29 = vcombine.low %v5546_v4, %v5553_v36  ;;  %v3036_v51 = vrot.slane %v3022_v0, %v7083_v6  ;;  %v3621_v20 = vcombine.low %v7130_v41, %v7967_v12  ;;  %v8117_v16 = vrot.slane %v6610_v15, %v7083_v6 }
  0xea   : > { %6653 = vmatprep.subr.bf16.mxu1 %v10385_v18  ;;  %3833 = vrot.lane.b32.xlu1 %v3372_v11, %s6887_s14  ;;  %v3922_v38 = vcombine.low %v3920_v49, %v8105_v61  ;;  %v8124_v63 = vrot.slane %v3921_v59, %v7083_v6  ;;  %v3650_v14 = vcombine.low %v7160_v53, %v7163_v54  ;;  %v1227_v4 = vshrl.u32 %v7833_v25, 16 }
  0xeb   : > { %10402 = vst [vmem:[#allocation64_spill] sm:$0xff] %v8117_v16  ;;  %v8130_v27 = vcombine.high %v7816_v45, %v7816_v45  ;;  %5700 = vrot.lane.b32.xlu0 %v5554_v29, %s6891_s25  ;;  %v3037_v41 = vcombine.low %v3029_v47, %v3036_v51  ;;  %v3649_v12 = vrot.slane %v3621_v20, %v7083_v6  ;;  %vm5996_vm3 = vcmask 654336  }
  0xec   : > { %10403 = vst [vmem:[#allocation65_spill] sm:$0xff] %v8124_v63  ;;  %v4326_v49 = vcombine.low %v7866_v22, %v7872_v37  ;;  %6206 = vmatpush1.bf16.msra.mxu0 %v6740_v32  ;;  %v3936_v11 = vrot.slane %v3922_v38, %v7083_v6  ;;  %v3658_v9 = vrot.slane %v3650_v14, %v7083_v6  ;;  %vm6023_vm4 = vcmask 785408  }
  0xed   : > { %v1232_v42 = vshll.u32 %v8130_v27, 16  ;;  %v4327_v23 = vcombine.low %v7876_v24, %v7887_v5  ;;  %6207 = vmatprep.subr.bf16.mxu0 %v10385_v18  ;;  %6662 = vmatpush1.bf16.msra.mxu1 %v6740_v32  ;;  %v3651_v29 = vcombine.low %v8117_v16, %v3649_v12  ;;  %v4328_v25 = vcombine.low %v7894_v33, %v7904_v52 }
  0xee   : > { %v4336_v37 = vrot.slane %v4326_v49, %v7083_v6  ;;  %v3667_v22 = vcombine.low %v7976_v30, %v7939_v3  ;;  %6654 = vmatprep.subr.bf16.mxu1 %v10385_v18  ;;  %v3937_v36 = vcombine.low %v8124_v63, %v3936_v11  ;;  %v3668_v0 = vcombine.low %v7952_v62, %v7956_v58 }
  0xef   : > { %v8153_v24 = vsel %vm7422_vm14, %v1227_v4, %v1232_v42  ;;  %v4343_v5 = vrot.slane %v4327_v23, %v7083_v6  ;;  %3216 = vrot.lane.b32.xlu0 %v3037_v41, %s6889_s28  ;;  %v3665_v33 = vrot.slane %v3651_v29, %v7083_v6  ;;  %v4350_v52 = vrot.slane %v4328_v25, %v7083_v6  ;;  %v6741_v23 = vld [vmem:[%s7075_s27 + $0x18] sm:$0xff]  }
  0xf0   : > { %v4329_v30 = vcombine.low %v7912_v48, %v8153_v24  ;;  %v8164_v15 = vrot.slane %v3667_v22, %v7083_v6  ;;  %4206 = vrot.lane.b32.xlu1 %v3937_v36, %s6885_s20  ;;  %v8168_v59 = vrot.slane %v3668_v0, %v7083_v6  ;;  %v4071_v58 = vcombine.low %v7943_v17, %v7959_v10  ;;  %v213_v36 = vld [vmem:[%s7067_s3 + $0x28] sm:$0xf] }
  0xf1   : > { %v4358_v47 = vcombine.low %v4336_v37, %v4343_v5  ;;  %v6596_v51 = vcombine.high %v7800_v50, %v7816_v45  ;;  %v3666_v20 = vcombine.low %v3658_v9, %v3665_v33  ;;  %v2173_v38 = vcombine.low %v7836_v44, %v7847_v60  ;;  %v212_v60 = vld [vmem:[%s7067_s3 + $0x24] sm:$0xf]  ;;  %6208 = vmatpush1.bf16.msra.mxu0 %v6741_v23 }
  0xf2   : > { %10404 = vst [vmem:[#allocation66_spill] sm:$0xff] %v8168_v59  ;;  %v4357_v48 = vrot.slane %v4329_v30, %v7083_v6  ;;  %v4079_v32 = vcombine.low %v3649_v12, %v8164_v15  ;;  %v4078_v41 = vrot.slane %v4071_v58, %v7083_v6  ;;  %v4891_v49 = vcombine.low %v7844_v55, %v7816_v45 }
  0xf3   : > { %v4366_v14 = vrot.slane %v4358_v47, %v7083_v6  ;;  %v8181_v4 = vrot.slane %v6596_v51, %v7083_v6  ;;  %3845 = vrot.lane.b32.xlu0 %v3666_v20, %s6887_s14  ;;  %v8190_v11 = vrot.slane %v2173_v38, %v7083_v6  ;;  %v8194_v44 = vcombine.high %v7943_v17, %v7943_v17 }
  0xf4   : > { %v4359_v50 = vcombine.low %v4350_v52, %v4357_v48  ;;  %v8187_v12 = vrot.slane %v4079_v32, %v7083_v6  ;;  %v4080_v9 = vcombine.low %v8168_v59, %v4078_v41  ;;  %v4898_v42 = vrot.slane %v4891_v49, %v7083_v6  ;;  %6209 = vmatprep.subr.bf16.mxu0 %v10385_v18  ;;  %v6742_v41 = vld [vmem:[%s7075_s27 + $0x20] sm:$0xff]  }
  0xf5   : > { %10405 = vst [vmem:[#allocation67_spill] sm:$0xff] %v8181_v4  ;;  %10407 = vst [vmem:[#allocation69_spill] sm:$0xff] %v8190_v11  ;;  %v1618_v45 = vshrl.u32 %v7959_v10, 16  ;;  %v4620_v55 = vcombine.low %v8000_v1, %v8006_v2  ;;  %v1623_v25 = vshll.u32 %v8194_v44, 16  ;;  %v4621_v37 = vcombine.low %v8010_v28, %v8017_v21  ;;  %6663 = vmatpush1.bf16.msra.mxu1 %v6741_v23 }
  0xf6   : > { %10406 = vst [vmem:[#allocation68_spill] sm:$0xff] %v8187_v12  ;;  %v4373_v29 = vrot.slane %v4359_v50, %v7083_v6  ;;  %v4622_v22 = vcombine.low %v8023_v19, %v8032_v46  ;;  %v4094_v5 = vrot.slane %v4080_v9, %v7083_v6  ;;  %v4899_v0 = vcombine.low %v4898_v42, %v8181_v4 }
  0xf7   : > { %v4630_v33 = vrot.slane %v4620_v55, %v7083_v6  ;;  %v244_v2 = vmax.bf16 %v10385_v18, %v212_v60  ;;  %v8216_v30 = vsel %vm7422_vm14, %v1618_v45, %v1623_v25  ;;  %v4637_v28 = vrot.slane %v4621_v37, %v7083_v6  ;;  %6655 = vmatprep.subr.bf16.mxu1 %v10385_v18 }
  0xf8   : > { %v4374_v1 = vcombine.low %v4366_v14, %v4373_v29  ;;  %v4644_v21 = vrot.slane %v4622_v22, %v7083_v6  ;;  %v4095_v19 = vcombine.low %v8187_v12, %v4094_v5  ;;  %v4906_v46 = vrot.slane %v4899_v0, %v7083_v6  ;;  %6210 = vmatpush1.bf16.msra.mxu0 %v6742_v41 }
  0xf9   : > { %v4623_v52 = vcombine.low %v8040_v7, %v8216_v30  ;;  %v245_v47 = vmax.bf16 %v10385_v18, %v213_v36  ;;  %v4652_v58 = vcombine.low %v4630_v33, %v4637_v28  ;;  %v513_v51 = vrot.slane %v244_v2, %v7083_v6  ;;  %6211 = vmatprep.subr.bf16.mxu0 %v10385_v18 }
  0xfa   : > { %4835 = vrot.lane.b32.xlu1 %v4374_v1, %s6890_s24  ;;  %v2438_v20 = vcombine.low %v7959_v10, %v8194_v44  ;;  %v2467_v48 = vcombine.low %v7946_v56, %v7985_v57  ;;  %4218 = vrot.lane.b32.xlu0 %v4095_v19, %s6885_s20  ;;  %v4907_v32 = vcombine.low %v8190_v11, %v4906_v46  ;;  %v1235_v23 = vshrl.u32 %v8130_v27, 16 }
  0xfb   : > { %v4651_v7 = vrot.slane %v4623_v52, %v7083_v6  ;;  %v536_v38 = vrot.slane %v245_v47, %v7083_v6  ;;  %v6619_v14 = vcombine.high %v7939_v3, %v7952_v62  ;;  %v4660_v49 = vrot.slane %v4652_v58, %v7083_v6  ;;  %6664 = vmatpush1.bf16.msra.mxu1 %v6742_v41 }
  0xfc   : > { %v514_v50 = vcombine.high %v513_v51, %v513_v51  ;;  %v8241_v60 = vrot.slane %v513_v51, %v7083_v6  ;;  %v8244_v57 = vrot.slane %v2438_v20, %v7083_v6  ;;  %v8251_v45 = vrot.slane %v2467_v48, %v7083_v6  ;;  %6656 = vmatprep.subr.bf16.mxu1 %v10385_v18 }
  0xfd   : > { %v4653_v56 = vcombine.low %v4644_v21, %v4651_v7  ;;  %v537_v9 = vcombine.high %v536_v38, %v536_v38  ;;  %v8248_v42 = vrot.slane %v536_v38, %v7083_v6  ;;  %v5016_v55 = vrot.slane %v6619_v14, %v7083_v6 }
  0xfe   : > { %10408 = vst [vmem:[#allocation70_spill] sm:$0xff] %v8244_v57  ;;  %10409 = vst [vmem:[#allocation71_spill] sm:$0xff] %v8251_v45  ;;  %5120 = vrot.lane.b32.xlu1 %v4907_v32, %s6888_s17  ;;  %v8255_v3 = vrot.slane %v514_v50, %v7083_v6  ;;  %v8259_v62 = vcombine.high %v8241_v60, %v8241_v60  ;;  %v1240_v22 = vshll.u32 %v8241_v60, 16  ;;  %v1243_v47 = vshrl.u32 %v8241_v60, 16 }
  0xff   : > { %v4667_v29 = vrot.slane %v4653_v56, %v7083_v6  ;;  %v8266_v25 = vrot.slane %v537_v9, %v7083_v6  ;;  %v552_v37 = vcombine.high %v8248_v42, %v8248_v42  ;;  %v5017_v0 = vcombine.low %v5016_v55, %v8244_v57  ;;  %v226_v9 = vld [vmem:[%s7067_s3 + $0x5c] sm:$0xf] }
 0x100   : > { %v2190_v36 = vcombine.low %v8241_v60, %v8255_v3  ;;  %v2191_v5 = vcombine.low %v8259_v62, %v8248_v42  ;;  %v8278_v33 = vcombine.high %v8255_v3, %v8255_v3  ;;  %v8288_v21 = vsel %vm7422_vm14, %v1235_v23, %v1240_v22 }
 0x101   : > { %v4668_v2 = vcombine.low %v4660_v49, %v4667_v29  ;;  %v2192_v1 = vcombine.low %v8266_v25, %v552_v37  ;;  %v8284_v28 = vcombine.high %v8266_v25, %v8266_v25  ;;  %v5024_v52 = vrot.slane %v5017_v0, %v7083_v6 }
 0x102   : > { %10410 = vst [vmem:[#allocation72_spill] sm:$0xff] %v8278_v33  ;;  %v8291_v19 = vrot.slane %v2190_v36, %v7083_v6  ;;  %v8294_v46 = vrot.slane %v2191_v5, %v7083_v6  ;;  %v1248_v51 = vshll.u32 %v8255_v3, 16  ;;  %v1251_v20 = vshrl.u32 %v8255_v3, 16 }
 0x103   : > { %4847 = vrot.lane.b32.xlu0 %v4668_v2, %s6890_s24  ;;  %v8300_v58 = vrot.slane %v2192_v1, %v7083_v6  ;;  %v1256_v48 = vshll.u32 %v8259_v62, 16  ;;  %v5025_v7 = vcombine.low %v8251_v45, %v5024_v52  ;;  %v1259_v38 = vshrl.u32 %v8259_v62, 16  ;;  %v227_v1 = vld [vmem:[%s7067_s3 + $0x60] sm:$0xf] }
 0x104   : > { %10411 = vst [vmem:[#allocation73_spill] sm:$0xff] %v8291_v19  ;;  %10412 = vst [vmem:[#allocation74_spill] sm:$0xff] %v8294_v46  ;;  %v5176_v32 = vcombine.low %v8181_v4, %v8291_v19  ;;  %v1264_v14 = vshll.u32 %v8278_v33, 16  ;;  %v8314_v49 = vsel %vm7422_vm14, %v1243_v47, %v1248_v51  ;;  %v1268_v56 = vshrl.u32 %v8248_v42, 16 }
 0x105   : > { %v5177_v41 = vcombine.low %v8294_v46, %v8300_v58  ;;  %v8318_v50 = vsel %vm7422_vm14, %v1251_v20, %v1256_v48  ;;  %v1273_v29 = vshll.u32 %v8266_v25, 16  ;;  %v1276_v22 = vshrl.u32 %v8266_v25, 16 }
 0x106   : > { %v5184_v55 = vrot.slane %v5176_v32, %v7083_v6  ;;  %v8325_v23 = vsel %vm7422_vm14, %v1259_v38, %v1264_v14  ;;  %v1281_v5 = vshll.u32 %v552_v37, 16  ;;  %v1284_v0 = vshrl.u32 %v552_v37, 16 }
 0x107   : > { %v5191_v36 = vrot.slane %v5177_v41, %v7083_v6  ;;  %5132 = vrot.lane.b32.xlu0 %v5025_v7, %s6888_s17  ;;  %v1289_v2 = vshll.u32 %v8284_v28, 16  ;;  %v8335_v52 = vsel %vm7422_vm14, %v1268_v56, %v1273_v29  ;;  %v2747_v47 = vcombine.low %v8153_v24, %v8288_v21  ;;  %v6743_v56 = vld [vmem:[%s7075_s27 + $0x28] sm:$0xff]  }
 0x108   : > { %v2793_v51 = vcombine.low %v8314_v49, %v8318_v50  ;;  %v258_v20 = vmax.bf16 %v10385_v18, %v226_v9  ;;  %v8344_v32 = vsel %vm7422_vm14, %v1276_v22, %v1281_v5  ;;  %v2794_v7 = vcombine.low %v8325_v23, %v8335_v52  ;;  %v10413_v22 = vld [vmem:[#allocation54_spill] sm:$0xff]  ;;  %6212 = vmatpush1.bf16.msra.mxu0 %v6743_v56 }
 0x109   : > { %v5192_v48 = vcombine.low %v5184_v55, %v5191_v36  ;;  %v8348_v37 = vsel %vm7422_vm14, %v1284_v0, %v1289_v2  ;;  %v2775_v38 = vrot.slane %v2747_v47, %v7083_v6  ;;  %v259_v41 = vmax.bf16 %v10385_v18, %v227_v1  ;;  %v10414_v36 = vld [vmem:[#allocation53_spill] sm:$0xff]  ;;  %v10415_v47 = vld [vmem:[#allocation56_spill] sm:$0xff]  ;;  %6213 = vmatprep.subr.bf16.mxu0 %v10385_v18 }
 0x10a   : > { %v2795_v24 = vcombine.low %v8344_v32, %v8348_v37  ;;  %v8356_v14 = vrot.slane %v2793_v51, %v7083_v6  ;;  %v8362_v9 = vrot.slane %v2794_v7, %v7083_v6  ;;  %v835_v55 = vcombine.high %v7959_v10, %v7959_v10  ;;  %6665 = vmatpush1.bf16.msra.mxu1 %v6743_v56 }
 0x10b   : > { %5397 = vrot.lane.b32.xlu1 %v5192_v48, %s6886_s5  ;;  %v842_v29 = vrot.slane %v258_v20, %v7083_v6  ;;  %v2776_v5 = vcombine.low %v10414_v36, %v10413_v22  ;;  %v865_v1 = vrot.slane %v259_v41, %v7083_v6  ;;  %v2777_v51 = vcombine.low %v10415_v47, %v2775_v38 }
 0x10c   : > { %v8370_v0 = vrot.slane %v2795_v24, %v7083_v6  ;;  %v5453_v2 = vcombine.low %v2775_v38, %v8356_v14  ;;  %v1626_v20 = vshrl.u32 %v8194_v44, 16  ;;  %6657 = vmatprep.subr.bf16.mxu1 %v10385_v18  ;;  %v1631_v47 = vshll.u32 %v835_v55, 16 }
 0x10d   : > { %v843_v48 = vcombine.high %v842_v29, %v842_v29  ;;  %v8376_v7 = vrot.slane %v842_v29, %v7083_v6  ;;  %v2784_v54 = vrot.slane %v2776_v5, %v7083_v6  ;;  %v866_v41 = vcombine.high %v865_v1, %v865_v1 }
 0x10e   : > { %v5454_v24 = vcombine.low %v8362_v9, %v8370_v0  ;;  %v5461_v22 = vrot.slane %v5453_v2, %v7083_v6  ;;  %v8385_v38 = vrot.slane %v865_v1, %v7083_v6  ;;  %v2791_v36 = vrot.slane %v2777_v51, %v7083_v6 }
 0x10f   : > { %v8389_v29 = vrot.slane %v843_v48, %v7083_v6  ;;  %v8393_v44 = vcombine.high %v8376_v7, %v8376_v7  ;;  %v2484_v56 = vcombine.low %v835_v55, %v8376_v7  ;;  %v8399_v2 = vrot.slane %v866_v41, %v7083_v6 }
 0x110   : > { %v5468_v5 = vrot.slane %v5454_v24, %v7083_v6  ;;  %v8403_v1 = vcombine.high %v8385_v38, %v8385_v38  ;;  %v2792_v53 = vcombine.low %v2784_v54, %v2791_v36  ;;  %v8418_v45 = vsel %vm7422_vm14, %v1626_v20, %v1631_v47  ;;  %v6744_v47 = vld [vmem:[%s7075_s27 + $0x30] sm:$0xff]  }
 0x111   : > { %v2485_v48 = vcombine.low %v8389_v29, %v8393_v44  ;;  %v8408_v16 = vrot.slane %v2484_v56, %v7083_v6  ;;  %v8412_v51 = vcombine.high %v8389_v29, %v8389_v29  ;;  %v2486_v41 = vcombine.low %v8385_v38, %v8399_v2  ;;  %6214 = vmatpush1.bf16.msra.mxu0 %v6744_v47 }
 0x112   : > { %v5469_v24 = vcombine.low %v5461_v22, %v5468_v5  ;;  %v1634_v11 = vshrl.u32 %v835_v55, 16  ;;  %v1639_v54 = vshll.u32 %v8376_v7, 16  ;;  %v1642_v36 = vshrl.u32 %v8376_v7, 16  ;;  %6666 = vmatpush1.bf16.msra.mxu1 %v6744_v47  ;;  %6215 = vmatprep.subr.bf16.mxu0 %v10385_v18 }
 0x113   : > { %v8421_v46 = vrot.slane %v2485_v48, %v7083_v6  ;;  %v5278_v56 = vcombine.low %v8244_v57, %v8408_v16  ;;  %v8429_v22 = vrot.slane %v2486_v41, %v7083_v6  ;;  %v1647_v5 = vshll.u32 %v8389_v29, 16  ;;  %6658 = vmatprep.subr.bf16.mxu1 %v10385_v18 }
 0x114   : > { %5690 = vrot.lane.b32.xlu1 %v5469_v24, %s6891_s25  ;;  %v1650_v20 = vshrl.u32 %v8389_v29, 16  ;;  %v1655_v55 = vshll.u32 %v8393_v44, 16  ;;  %v8438_v57 = vsel %vm7422_vm14, %v1634_v11, %v1639_v54  ;;  %v1658_v4 = vshrl.u32 %v8393_v44, 16 }
 0x115   : > { %10416 = vst [vmem:[#allocation54_spill] sm:$0xff] %v8429_v22  ;;  %v5286_v48 = vrot.slane %v5278_v56, %v7083_v6  ;;  %v1663_v24 = vshll.u32 %v8412_v51, 16  ;;  %v5279_v41 = vcombine.low %v8421_v46, %v8429_v22  ;;  %v8446_v43 = vsel %vm7422_vm14, %v1642_v36, %v1647_v5 }
 0x116   : > { %v8450_v12 = vsel %vm7422_vm14, %v1650_v20, %v1655_v55  ;;  %v1667_v56 = vshrl.u32 %v8385_v38, 16  ;;  %v1672_v54 = vshll.u32 %v8399_v2, 16  ;;  %v1675_v22 = vshrl.u32 %v8399_v2, 16 }
 0x117   : > { %v8455_v11 = vsel %vm7422_vm14, %v1658_v4, %v1663_v24  ;;  %v1680_v36 = vshll.u32 %v8403_v1, 16  ;;  %v5293_v5 = vrot.slane %v5279_v41, %v7083_v6  ;;  %v3041_v20 = vcombine.low %v8216_v30, %v8418_v45  ;;  %v6745_v41 = vld [vmem:[%s7075_s27 + $0x38] sm:$0xff]  }
 0x118   : > { %3206 = vrot.lane.b32.xlu1 %v2792_v53, %s6889_s28  ;;  %v3087_v4 = vcombine.low %v8438_v57, %v8446_v43  ;;  %v3088_v55 = vcombine.low %v8450_v12, %v8455_v11  ;;  %v8472_v47 = vsel %vm7422_vm14, %v1667_v56, %v1672_v54  ;;  %v6604_v53 = vcombine.high %v7796_v35, %v7809_v39 }
 0x119   : > { %v8476_v24 = vsel %vm7422_vm14, %v1675_v22, %v1680_v36  ;;  %v3376_v30 = vcombine.low %v8130_v27, %v8241_v60  ;;  %v5294_v63 = vcombine.low %v5286_v48, %v5293_v5  ;;  %v3069_v13 = vrot.slane %v3041_v20, %v7083_v6  ;;  %6216 = vmatpush1.bf16.msra.mxu0 %v6745_v41 }
 0x11a   : > { %v3089_v33 = vcombine.low %v8472_v47, %v8476_v24  ;;  %v8487_v56 = vrot.slane %v3087_v4, %v7083_v6  ;;  %v8490_v22 = vrot.slane %v3088_v55, %v7083_v6  ;;  %v8493_v54 = vrot.slane %v6604_v53, %v7083_v6  ;;  %6217 = vmatprep.subr.bf16.mxu0 %v10385_v18 }
 0x11b   : > { %v3404_v35 = vrot.slane %v3376_v30, %v7083_v6  ;;  %v3070_v39 = vcombine.low %v8052_v34, %v8055_v40  ;;  %5409 = vrot.lane.b32.xlu0 %v5294_v63, %s6886_s5  ;;  %v3071_v36 = vcombine.low %v8068_v31, %v3069_v13  ;;  %v3422_v5 = vcombine.low %v8255_v3, %v8259_v62  ;;  %v6746_v63 = vld [vmem:[%s7075_s27 + $0x40] sm:$0xff]   ;;  %s6813_s27 = scalar_lea.vmem %s6812_s26, 6400 }
 0x11c   : > { %10417 = vst [vmem:[#allocation53_spill] sm:$0xff] %v8493_v54  ;;  %v8500_v27 = vrot.slane %v3089_v33, %v7083_v6  ;;  %v5555_v48 = vcombine.low %v3069_v13, %v8487_v56  ;;  %v3405_v20 = vcombine.low %v8098_v8, %v8493_v54  ;;  %v6605_v40 = vcombine.high %v8248_v42, %v8266_v25 }
 0x11d   : > { %v3406_v4 = vcombine.low %v8105_v61, %v3404_v35  ;;  %v3078_v34 = vrot.slane %v3070_v39, %v7083_v6  ;;  %v3085_v62 = vrot.slane %v3071_v36, %v7083_v6  ;;  %v8519_v33 = vrot.slane %v3422_v5, %v7083_v6  ;;  %6667 = vmatpush1.bf16.msra.mxu1 %v6745_v41  ;;  %v214_v39 = vld [vmem:[%s7067_s3 + $0x2c] sm:$0xf]  ;;  %v10419_v5 = vld [vmem:[#allocation57_spill] sm:$0xff] }
 0x11e   : > { %v5556_v13 = vcombine.low %v8490_v22, %v8500_v27  ;;  %v5563_v31 = vrot.slane %v5555_v48, %v7083_v6  ;;  %v3413_v8 = vrot.slane %v3405_v20, %v7083_v6  ;;  %v8524_v53 = vrot.slane %v6605_v40, %v7083_v6  ;;  %6218 = vmatpush1.bf16.msra.mxu0 %v6746_v63 }
 0x11f   : > { %v3420_v55 = vrot.slane %v3406_v4, %v7083_v6  ;;  %v3938_v30 = vcombine.low %v8248_v42, %v8266_v25  ;;  %v3086_v54 = vcombine.low %v3078_v34, %v3085_v62  ;;  %v3946_v36 = vcombine.low %v3404_v35, %v8519_v33  ;;  %6659 = vmatprep.subr.bf16.mxu1 %v10385_v18 }
 0x120   : > { %10418 = vst [vmem:[#allocation56_spill] sm:$0xff] %v8524_v53  ;;  %v5570_v48 = vrot.slane %v5556_v13, %v7083_v6  ;;  %v3669_v41 = vcombine.low %v10419_v5, %v7959_v10  ;;  %v6611_v40 = vcombine.high %v7943_v17, %v7959_v10  ;;  %v3699_v42 = vcombine.low %v8164_v15, %v8168_v59 }
 0x121   : > { %v3421_v20 = vcombine.low %v3413_v8, %v3420_v55  ;;  %v3945_v4 = vrot.slane %v3938_v30, %v7083_v6  ;;  %v8540_v13 = vrot.slane %v3946_v36, %v7083_v6  ;;  %v246_v34 = vmax.bf16 %v10385_v18, %v214_v39  ;;  %6668 = vmatpush1.bf16.msra.mxu1 %v6746_v63 }
 0x122   : > { %v5571_v61 = vcombine.low %v5563_v31, %v5570_v48  ;;  %v8543_v35 = vrot.slane %v3669_v41, %v7083_v6  ;;  %v3698_v8 = vrot.slane %v6611_v40, %v7083_v6  ;;  %v3707_v17 = vrot.slane %v3699_v42, %v7083_v6 }
 0x123   : > { %10420 = vst [vmem:[#allocation57_spill] sm:$0xff] %v8540_v13  ;;  %3835 = vrot.lane.b32.xlu1 %v3421_v20, %s6887_s14  ;;  %v3947_v62 = vcombine.low %v3945_v4, %v8524_v53  ;;  %v1292_v10 = vshrl.u32 %v8284_v28, 16  ;;  %v560_v15 = vrot.slane %v246_v34, %v7083_v6  ;;  %v4375_v31 = vcombine.low %v8288_v21, %v8314_v49 }
 0x124   : > { %10421 = vst [vmem:[#allocation75_spill] sm:$0xff] %v8543_v35  ;;  %5702 = vrot.lane.b32.xlu0 %v5571_v61, %s6891_s25  ;;  %v4376_v63 = vcombine.low %v8318_v50, %v8325_v23  ;;  %v4377_v55 = vcombine.low %v8335_v52, %v8344_v32  ;;  %v3700_v39 = vcombine.low %v8543_v35, %v3698_v8  ;;  %vm6050_vm5 = vcmask 916480  }
 0x125   : > { %v3961_v30 = vrot.slane %v3947_v62, %v7083_v6  ;;  %v3716_v48 = vcombine.low %v8376_v7, %v8389_v29  ;;  %v3718_v61 = vcombine.low %v8399_v2, %v8403_v1  ;;  %v8566_v36 = vrot.slane %v560_v15, %v7083_v6 }
 0x126   : > { %v4385_v21 = vrot.slane %v4375_v31, %v7083_v6  ;;  %v4392_v49 = vrot.slane %v4376_v63, %v7083_v6  ;;  %v4399_v50 = vrot.slane %v4377_v55, %v7083_v6  ;;  %v3714_v52 = vrot.slane %v3700_v39, %v7083_v6 }
 0x127   : > { %10422 = vst [vmem:[#allocation76_spill] sm:$0xff] %v8566_v36  ;;  %v3962_v23 = vcombine.low %v8540_v13, %v3961_v30  ;;  %v8574_v32 = vrot.slane %v3716_v48, %v7083_v6  ;;  %v8577_v5 = vrot.slane %v3718_v61, %v7083_v6  ;;  %v1297_v41 = vshll.u32 %v8566_v36, 16 }
 0x128   : > { %3218 = vrot.lane.b32.xlu0 %v3086_v54, %s6889_s28  ;;  %v4407_v20 = vcombine.low %v4385_v21, %v4392_v49  ;;  %v4096_v4 = vcombine.low %v8393_v44, %v8385_v38  ;;  %v2193_v40 = vcombine.low %v8284_v28, %v8566_v36  ;;  %v3715_v42 = vcombine.low %v3707_v17, %v3714_v52  ;;  %v215_v21 = vld [vmem:[%s7067_s3 + $0x30] sm:$0xf] }
 0x129   : > { %10423 = vst [vmem:[#allocation77_spill] sm:$0xff] %v8577_v5  ;;  %4208 = vrot.lane.b32.xlu1 %v3962_v23, %s6885_s20  ;;  %v4104_v34 = vcombine.low %v3698_v8, %v8574_v32  ;;  %v6616_v62 = vcombine.high %v8241_v60, %v8255_v3  ;;  %v8591_v54 = vcombine.high %v8399_v2, %v8399_v2  ;;  %v1683_v63 = vshrl.u32 %v8403_v1, 16 }
 0x12a   : > { %v8595_v31 = vsel %vm7422_vm14, %v1292_v10, %v1297_v41  ;;  %v4415_v44 = vrot.slane %v4407_v20, %v7083_v6  ;;  %v4103_v28 = vrot.slane %v4096_v4, %v7083_v6  ;;  %v8600_v17 = vrot.slane %v2193_v40, %v7083_v6 }
 0x12b   : > { %v4378_v8 = vcombine.low %v8348_v37, %v8595_v31  ;;  %v8605_v60 = vrot.slane %v4104_v34, %v7083_v6  ;;  %v4915_v3 = vrot.slane %v6616_v62, %v7083_v6  ;;  %v1688_v30 = vshll.u32 %v8591_v54, 16 }
 0x12c   : > { %3847 = vrot.lane.b32.xlu0 %v3715_v42, %s6887_s14  ;;  %v4105_v10 = vcombine.low %v4103_v28, %v8577_v5  ;;  %v2223_v55 = vcombine.low %v8300_v58, %v8600_v17  ;;  %v4669_v39 = vcombine.low %v8418_v45, %v8438_v57  ;;  %v4670_v61 = vcombine.low %v8446_v43, %v8450_v12  ;;  %v216_v28 = vld [vmem:[%s7067_s3 + $0x34] sm:$0xf] }
 0x12d   : > { %10424 = vst [vmem:[#allocation78_spill] sm:$0xff] %v8605_v60  ;;  %v4406_v37 = vrot.slane %v4378_v8, %v7083_v6  ;;  %v4916_v48 = vcombine.low %v8291_v19, %v4915_v3  ;;  %v4671_v1 = vcombine.low %v8455_v11, %v8472_v47  ;;  %v8629_v23 = vsel %vm7422_vm14, %v1683_v63, %v1688_v30 }
 0x12e   : > { %v4119_v49 = vrot.slane %v4105_v10, %v7083_v6  ;;  %v8625_v58 = vrot.slane %v2223_v55, %v7083_v6  ;;  %v4679_v57 = vrot.slane %v4669_v39, %v7083_v6  ;;  %v4672_v43 = vcombine.low %v8476_v24, %v8629_v23 }
 0x12f   : > { %v4408_v45 = vcombine.low %v4399_v50, %v4406_v37  ;;  %v4923_v52 = vrot.slane %v4916_v48, %v7083_v6  ;;  %v4686_v12 = vrot.slane %v4670_v61, %v7083_v6  ;;  %v4693_v47 = vrot.slane %v4671_v1, %v7083_v6 }
 0x130   : > { %10425 = vst [vmem:[#allocation79_spill] sm:$0xff] %v8625_v58  ;;  %v4120_v11 = vcombine.low %v8605_v60, %v4119_v49  ;;  %v247_v41 = vmax.bf16 %v10385_v18, %v215_v21  ;;  %v561_v20 = vcombine.high %v560_v15, %v560_v15  ;;  %v4700_v50 = vrot.slane %v4672_v43, %v7083_v6 }
 0x131   : > { %v4422_v4 = vrot.slane %v4408_v45, %v7083_v6  ;;  %v4924_v40 = vcombine.low %v4923_v52, %v8625_v58  ;;  %v4701_v42 = vcombine.low %v4679_v57, %v4686_v12  ;;  %v8648_v34 = vcombine.high %v8566_v36, %v8566_v36 }
 0x132   : > { %4220 = vrot.lane.b32.xlu0 %v4120_v11, %s6885_s20  ;;  %v8644_v24 = vrot.slane %v561_v20, %v7083_v6  ;;  %v583_v62 = vrot.slane %v247_v41, %v7083_v6  ;;  %v6600_v15 = vcombine.high %v8385_v38, %v8399_v2  ;;  %v4702_v3 = vcombine.low %v4693_v47, %v4700_v50 }
 0x133   : > { %v4423_v8 = vcombine.low %v4415_v44, %v4422_v4  ;;  %v4709_v63 = vrot.slane %v4701_v42, %v7083_v6  ;;  %v2516_v10 = vcombine.low %v8408_v16, %v8421_v46  ;;  %v5026_v16 = vcombine.low %v8412_v51, %v8399_v2 }
 0x134   : > { %10426 = vst [vmem:[#allocation80_spill] sm:$0xff] %v8644_v24  ;;  %v584_v55 = vcombine.high %v583_v62, %v583_v62  ;;  %v8658_v30 = vrot.slane %v583_v62, %v7083_v6  ;;  %v2239_v39 = vcombine.low %v8644_v24, %v8648_v34  ;;  %v8663_v37 = vrot.slane %v6600_v15, %v7083_v6 }
 0x135   : > { %4837 = vrot.lane.b32.xlu1 %v4423_v8, %s6890_s24  ;;  %v4716_v38 = vrot.slane %v4702_v3, %v7083_v6  ;;  %v8668_v44 = vrot.slane %v2516_v10, %v7083_v6  ;;  %v248_v46 = vmax.bf16 %v10385_v18, %v216_v28  ;;  %v8685_v21 = vcombine.high %v8644_v24, %v8644_v24 }
 0x136   : > { %10427 = vst [vmem:[#allocation81_spill] sm:$0xff] %v8663_v37  ;;  %v8674_v48 = vrot.slane %v584_v55, %v7083_v6  ;;  %v8677_v61 = vrot.slane %v2239_v39, %v7083_v6  ;;  %v8681_v1 = vcombine.high %v8658_v30, %v8658_v30  ;;  %v5033_v57 = vrot.slane %v5026_v16, %v7083_v6 }
 0x137   : > { %10428 = vst [vmem:[#allocation82_spill] sm:$0xff] %v8668_v44  ;;  %v4717_v49 = vcombine.low %v4709_v63, %v4716_v38  ;;  %v8689_v2 = vrot.slane %v248_v46, %v7083_v6  ;;  %v1300_v51 = vshrl.u32 %v8566_v36, 16  ;;  %v1305_v41 = vshll.u32 %v8644_v24, 16 }
 0x138   : > { %10429 = vst [vmem:[#allocation83_spill] sm:$0xff] %v8677_v61  ;;  %v2240_v45 = vcombine.low %v8658_v30, %v8674_v48  ;;  %v6597_v52 = vcombine.high %v8658_v30, %v8674_v48  ;;  %v5193_v43 = vcombine.low %v8600_v17, %v8677_v61  ;;  %v8700_v12 = vcombine.high %v8674_v48, %v8674_v48 }
 0x139   : > { %5122 = vrot.lane.b32.xlu1 %v4924_v40, %s6888_s17  ;;  %4849 = vrot.lane.b32.xlu0 %v4717_v49, %s6890_s24  ;;  %v5034_v11 = vcombine.low %v5033_v57, %v8663_v37  ;;  %v8707_v47 = vrot.slane %v8689_v2, %v7083_v6  ;;  %v1308_v20 = vshrl.u32 %v8644_v24, 16  ;;  %v1313_v50 = vshll.u32 %v8648_v34, 16 }
 0x13a   : > { %v8712_v17 = vrot.slane %v2240_v45, %v7083_v6  ;;  %v8715_v4 = vrot.slane %v6597_v52, %v7083_v6  ;;  %v5201_v40 = vrot.slane %v5193_v43, %v7083_v6  ;;  %v8722_v62 = vsel %vm7422_vm14, %v1300_v51, %v1305_v41  ;;  %v228_v45 = vld [vmem:[%s7067_s3 + $0x64] sm:$0xf]  ;;  %v229_v52 = vld [vmem:[%s7067_s3 + $0x68] sm:$0xf] }
 0x13b   : > { %v5041_v42 = vrot.slane %v5034_v11, %v7083_v6  ;;  %v1316_v15 = vshrl.u32 %v8648_v34, 16  ;;  %v1321_v28 = vshll.u32 %v8685_v21, 16  ;;  %v8730_v3 = vsel %vm7422_vm14, %v1308_v20, %v1313_v50 }
 0x13c   : > { %10430 = vst [vmem:[#allocation84_spill] sm:$0xff] %v8712_v17  ;;  %v5194_v8 = vcombine.low %v8712_v17, %v8715_v4  ;;  %v1325_v63 = vshrl.u32 %v8658_v30, 16  ;;  %v1330_v10 = vshll.u32 %v8674_v48, 16  ;;  %v1333_v38 = vshrl.u32 %v8674_v48, 16 }
 0x13d   : > { %v5042_v55 = vcombine.low %v8668_v44, %v5041_v42  ;;  %v8737_v39 = vsel %vm7422_vm14, %v1316_v15, %v1321_v28  ;;  %v1338_v16 = vshll.u32 %v8681_v1, 16  ;;  %v1341_v57 = vshrl.u32 %v8681_v1, 16 }
 0x13e   : > { %v5208_v46 = vrot.slane %v5194_v8, %v7083_v6  ;;  %v8744_v49 = vsel %vm7422_vm14, %v1325_v63, %v1330_v10  ;;  %v1346_v51 = vshll.u32 %v8700_v12, 16  ;;  %v1349_v11 = vshrl.u32 %v8700_v12, 16 }
 0x13f   : > { %5134 = vrot.lane.b32.xlu0 %v5042_v55, %s6888_s17  ;;  %v8753_v43 = vsel %vm7422_vm14, %v1333_v38, %v1338_v16  ;;  %v1354_v41 = vshll.u32 %v8707_v47, 16  ;;  %v2796_v20 = vcombine.low %v8595_v31, %v8722_v62  ;;  %v2842_v15 = vcombine.low %v8730_v3, %v8737_v39 }
 0x140   : > { %v5209_v50 = vcombine.low %v5201_v40, %v5208_v46  ;;  %v8761_v42 = vsel %vm7422_vm14, %v1341_v57, %v1346_v51  ;;  %v2843_v28 = vcombine.low %v8744_v49, %v8753_v43  ;;  %v260_v10 = vmax.bf16 %v10385_v18, %v228_v45  ;;  %v8774_v40 = vpop.permute.xlu1 %4202 }
 0x141   : > { %v8769_v8 = vsel %vm7422_vm14, %v1349_v11, %v1354_v41  ;;  %v2824_v63 = vrot.slane %v2796_v20, %v7083_v6  ;;  %v261_v31 = vmax.bf16 %v10385_v18, %v229_v52  ;;  %10431 = vst [vmem:[#allocation85_spill] sm:$0xff] %v8774_v40  ;;  %v8780_v38 = vrot.slane %v2842_v15, %v7083_v6 }
 0x142   : > { %5399 = vrot.lane.b32.xlu1 %v5209_v50, %s6886_s5  ;;  %v2844_v55 = vcombine.low %v8761_v42, %v8769_v8  ;;  %v8783_v16 = vrot.slane %v2843_v28, %v7083_v6  ;;  %v2825_v46 = vcombine.low %v8356_v14, %v8362_v9  ;;  %v889_v57 = vrot.slane %v260_v10, %v7083_v6  ;;  %v10432_v50 = vld [vmem:[#allocation72_spill] sm:$0xff] }
 0x143   : > { %v912_v51 = vrot.slane %v261_v31, %v7083_v6  ;;  %v2826_v45 = vcombine.low %v8370_v0, %v2824_v63  ;;  %v1691_v52 = vshrl.u32 %v8591_v54, 16  ;;  %v5470_v41 = vcombine.low %v2824_v63, %v8780_v38 }
 0x144   : > { %v8792_v11 = vrot.slane %v2844_v55, %v7083_v6  ;;  %v2833_v20 = vrot.slane %v2825_v46, %v7083_v6  ;;  %v3423_v15 = vcombine.low %v10432_v50, %v8266_v25  ;;  %v890_v28 = vcombine.high %v889_v57, %v889_v57  ;;  %v8822_v50 = vpop.permute.xlu1 %5393 }
 0x145   : > { %v8799_v14 = vrot.slane %v889_v57, %v7083_v6  ;;  %v913_v9 = vcombine.high %v912_v51, %v912_v51  ;;  %v8802_v10 = vrot.slane %v912_v51, %v7083_v6  ;;  %v5478_v31 = vrot.slane %v5470_v41, %v7083_v6  ;;  %10433 = vst [vmem:[#allocation72_spill] sm:$0xff] %v8822_v50  ;;  %v8863_v50 = vpop.permute.xlu0 %4216 }
 0x146   : > { %v5471_v0 = vcombine.low %v8783_v16, %v8792_v11  ;;  %v2840_v63 = vrot.slane %v2826_v45, %v7083_v6  ;;  %v3425_v55 = vcombine.low %v8566_v36, %v8644_v24  ;;  %v8811_v25 = vrot.slane %v890_v28, %v7083_v6  ;;  %10437 = vst [vmem:[#allocation89_spill] sm:$0xff] %v8863_v50 }
 0x147   : > { %v8815_v46 = vcombine.high %v8799_v14, %v8799_v14  ;;  %v8818_v57 = vrot.slane %v913_v9, %v7083_v6  ;;  %v928_v51 = vcombine.high %v8802_v10, %v8802_v10  ;;  %v1696_v17 = vshll.u32 %v8799_v14, 16 }
 0x148   : > { %v5485_v45 = vrot.slane %v5471_v0, %v7083_v6  ;;  %v2841_v41 = vcombine.low %v2833_v20, %v2840_v63  ;;  %v1699_v28 = vshrl.u32 %v8799_v14, 16  ;;  %v2533_v44 = vcombine.low %v8799_v14, %v8811_v25 }
 0x149   : > { %v2534_v58 = vcombine.low %v8815_v46, %v8802_v10  ;;  %v2535_v9 = vcombine.low %v8818_v57, %v928_v51  ;;  %v8834_v60 = vcombine.high %v8818_v57, %v8818_v57  ;;  %v8838_v20 = vcombine.high %v8811_v25, %v8811_v25 }
 0x14a   : > { %v5486_v19 = vcombine.low %v5478_v31, %v5485_v45  ;;  %v8842_v0 = vsel %vm7422_vm14, %v1691_v52, %v1696_v17  ;;  %v1704_v63 = vshll.u32 %v8811_v25, 16  ;;  %v8846_v13 = vrot.slane %v2533_v44, %v7083_v6 }
 0x14b   : > { %10434 = vst [vmem:[#allocation86_spill] sm:$0xff] %v8838_v20  ;;  %v8849_v59 = vrot.slane %v2534_v58, %v7083_v6  ;;  %v8852_v35 = vrot.slane %v2535_v9, %v7083_v6  ;;  %v1707_v31 = vshrl.u32 %v8811_v25, 16  ;;  %v1712_v17 = vshll.u32 %v8815_v46, 16 }
 0x14c   : > { %10435 = vst [vmem:[#allocation87_spill] sm:$0xff] %v8846_v13  ;;  %5692 = vrot.lane.b32.xlu1 %v5486_v19, %s6891_s25  ;;  %v8858_v45 = vsel %vm7422_vm14, %v1699_v28, %v1704_v63  ;;  %v1715_v52 = vshrl.u32 %v8815_v46, 16  ;;  %v1720_v44 = vshll.u32 %v8838_v20, 16  ;;  %v5295_v58 = vcombine.low %v8663_v37, %v8846_v13  ;;  %v8871_v28 = vpop.permute.xlu1 %3831 }
 0x14d   : > { %10436 = vst [vmem:[#allocation88_spill] sm:$0xff] %v8849_v59  ;;  %v5296_v9 = vcombine.low %v8849_v59, %v8852_v35  ;;  %v1724_v19 = vshrl.u32 %v8802_v10, 16  ;;  %v1729_v40 = vshll.u32 %v8818_v57, 16  ;;  %10438 = vst [vmem:[#allocation90_spill] sm:$0xff] %v8871_v28  ;;  %v8875_v63 = vsel %vm7422_vm14, %v1707_v31, %v1712_v17 }
 0x14e   : > { %v8879_v20 = vsel %vm7422_vm14, %v1715_v52, %v1720_v44  ;;  %v1732_v50 = vshrl.u32 %v8818_v57, 16  ;;  %v1737_v37 = vshll.u32 %v928_v51, 16  ;;  %v5303_v36 = vrot.slane %v5295_v58, %v7083_v6 }
 0x14f   : > { %v5310_v59 = vrot.slane %v5296_v9, %v7083_v6  ;;  %v8886_v24 = vsel %vm7422_vm14, %v1724_v19, %v1729_v40  ;;  %v1740_v28 = vshrl.u32 %v928_v51, 16  ;;  %v1745_v17 = vshll.u32 %v8834_v60, 16 }
 0x150   : > { %3208 = vrot.lane.b32.xlu1 %v2841_v41, %s6889_s28  ;;  %v8891_v31 = vsel %vm7422_vm14, %v1732_v50, %v1737_v37  ;;  %v3090_v52 = vcombine.low %v8629_v23, %v8842_v0  ;;  %v3136_v44 = vcombine.low %v8858_v45, %v8875_v63  ;;  %v3137_v40 = vcombine.low %v8879_v20, %v8886_v24 }
 0x151   : > { %v5311_v58 = vcombine.low %v5303_v36, %v5310_v59  ;;  %v8901_v51 = vrot.slane %v3423_v15, %v7083_v6  ;;  %v8904_v41 = vrot.slane %v3425_v55, %v7083_v6  ;;  %v8908_v37 = vsel %vm7422_vm14, %v1740_v28, %v1745_v17  ;;  %v8916_v36 = vpop.permute.xlu0 %3829  ;;  %v8928_v28 = vpop.permute.xlu1 %5118 }
 0x152   : > { %v3118_v50 = vrot.slane %v3090_v52, %v7083_v6  ;;  %v8912_v23 = vrot.slane %v3136_v44, %v7083_v6  ;;  %v3119_v59 = vcombine.low %v8487_v56, %v8490_v22  ;;  %v3138_v15 = vcombine.low %v8891_v31, %v8908_v37  ;;  %10441 = vst [vmem:[#allocation93_spill] sm:$0xff] %v8928_v28 }
 0x153   : > { %10439 = vst [vmem:[#allocation91_spill] sm:$0xff] %v8901_v51  ;;  %10440 = vst [vmem:[#allocation92_spill] sm:$0xff] %v8904_v41  ;;  %5411 = vrot.lane.b32.xlu0 %v5311_v58, %s6886_s5  ;;  %v8922_v55 = vrot.slane %v3137_v40, %v7083_v6  ;;  %v3454_v9 = vcombine.low %v8519_v33, %v8901_v51  ;;  %v3455_v19 = vcombine.low %v8524_v53, %v8904_v41  ;;  %vm6361_vm6 = vcmask 125952  }
 0x154   : > { %v5572_v56 = vcombine.low %v3118_v50, %v8912_v23  ;;  %v3120_v22 = vcombine.low %v8500_v27, %v3118_v50  ;;  %v3127_v17 = vrot.slane %v3119_v59, %v7083_v6  ;;  %v3472_v52 = vcombine.low %v8674_v48, %v8681_v1 }
 0x155   : > { %v8936_v44 = vrot.slane %v3138_v15, %v7083_v6  ;;  %v3462_v58 = vrot.slane %v3454_v9, %v7083_v6  ;;  %v3469_v33 = vrot.slane %v3455_v19, %v7083_v6  ;;  %v3473_v40 = vcombine.low %v8700_v12, %v8707_v47 }
 0x156   : > { %v5580_v51 = vrot.slane %v5572_v56, %v7083_v6  ;;  %v3134_v53 = vrot.slane %v3120_v22, %v7083_v6  ;;  %v8945_v27 = vrot.slane %v3472_v52, %v7083_v6  ;;  %v3963_v1 = vcombine.low %v8648_v34, %v8658_v30  ;;  %v8961_v34 = vpop.permute.xlu0 %5116 }
 0x157   : > { %v5573_v50 = vcombine.low %v8922_v55, %v8936_v44  ;;  %v3470_v59 = vcombine.low %v3462_v58, %v3469_v33  ;;  %v8952_v15 = vrot.slane %v3473_v40, %v7083_v6  ;;  %v6612_v12 = vcombine.high %v8376_v7, %v8389_v29 }
 0x158   : > { %v3135_v9 = vcombine.low %v3127_v17, %v3134_v53  ;;  %v3970_v19 = vrot.slane %v3963_v1, %v7083_v6  ;;  %v3719_v56 = vcombine.low %v8591_v54, %v8799_v14  ;;  %v608_v22 = vcombine.high %v8689_v2, %v8689_v2  ;;  %v8971_v53 = vpop.permute.xlu1 %4204 }
 0x159   : > { %v5587_v30 = vrot.slane %v5573_v50, %v7083_v6  ;;  %3837 = vrot.lane.b32.xlu1 %v3470_v59, %s6887_s14  ;;  %v3972_v52 = vcombine.low %v8945_v27, %v8952_v15  ;;  %v8968_v7 = vrot.slane %v6612_v12, %v7083_v6  ;;  %v1357_v29 = vshrl.u32 %v8707_v47, 16 }
 0x15a   : > { %v3971_v54 = vcombine.low %v8904_v41, %v3970_v19  ;;  %v3747_v2 = vrot.slane %v3719_v56, %v7083_v6  ;;  %v8976_v17 = vrot.slane %v608_v22, %v7083_v6  ;;  %v4424_v58 = vcombine.low %v8722_v62, %v8730_v3 }
 0x15b   : > { %10442 = vst [vmem:[#allocation94_spill] sm:$0xff] %v8968_v7  ;;  %v5588_v33 = vcombine.low %v5580_v51, %v5587_v30  ;;  %v8981_v40 = vrot.slane %v3972_v52, %v7083_v6  ;;  %v3748_v1 = vcombine.low %v8574_v32, %v8968_v7  ;;  %v4425_v50 = vcombine.low %v8737_v39, %v8744_v49 }
 0x15c   : > { %v3979_v59 = vrot.slane %v3971_v54, %v7083_v6  ;;  %v3749_v12 = vcombine.low %v8577_v5, %v3747_v2  ;;  %v1362_v19 = vshll.u32 %v8976_v17, 16  ;;  %v4426_v62 = vcombine.low %v8753_v43, %v8761_v42  ;;  %v9005_v42 = vpop.permute.xlu0 %3843 }
 0x15d   : > { %10443 = vst [vmem:[#allocation95_spill] sm:$0xff] %v8981_v40  ;;  %5704 = vrot.lane.b32.xlu0 %v5588_v33, %s6891_s25  ;;  %v3756_v3 = vrot.slane %v3748_v1, %v7083_v6  ;;  %v4434_v51 = vrot.slane %v4424_v58, %v7083_v6  ;;  %v4441_v32 = vrot.slane %v4425_v50, %v7083_v6  ;;  %10444 = vst [vmem:[#allocation96_spill] sm:$0xff] %v9005_v42  ;;  %v230_v58 = vld [vmem:[%s7067_s3 + $0x6c] sm:$0xf]  ;;  %v9015_v33 = vpop.permute.xlu1 %4831 }
 0x15e   : > { %v3765_v39 = vcombine.low %v8811_v25, %v8815_v46  ;;  %v3987_v49 = vcombine.low %v3979_v59, %v8981_v40  ;;  %v3763_v56 = vrot.slane %v3749_v12, %v7083_v6  ;;  %v9002_v22 = vsel %vm7422_vm14, %v1357_v29, %v1362_v19  ;;  %v10469_v42 = vld [vmem:[#allocation80_spill] sm:$0xff] }
 0x15f   : > { %v4448_v43 = vrot.slane %v4426_v62, %v7083_v6  ;;  %v4427_v30 = vcombine.low %v8769_v8, %v9002_v22  ;;  %v4456_v52 = vcombine.low %v4434_v51, %v4441_v32  ;;  %v6613_v54 = vcombine.high %v8802_v10, %v8818_v57 }
 0x160   : > { %v9012_v46 = vrot.slane %v3765_v39, %v7083_v6  ;;  %4210 = vrot.lane.b32.xlu1 %v3987_v49, %s6885_s20  ;;  %v3764_v29 = vcombine.low %v3756_v3, %v3763_v56  ;;  %v4121_v1 = vcombine.low %v8802_v10, %v8818_v57  ;;  %v2242_v50 = vcombine.low %v8707_v47, %v8976_v17 }
 0x161   : > { %v4925_v8 = vcombine.low %v8685_v21, %v8674_v48  ;;  %3220 = vrot.lane.b32.xlu0 %v3135_v9, %s6889_s28  ;;  %v4455_v59 = vrot.slane %v4427_v30, %v7083_v6  ;;  %v4464_v12 = vrot.slane %v4456_v52, %v7083_v6  ;;  %v9028_v19 = vrot.slane %v6613_v54, %v7083_v6  ;;  %v217_v52 = vld [vmem:[%s7067_s3 + $0x38] sm:$0xf] }
 0x162   : > { %v4129_v62 = vcombine.low %v3747_v2, %v9012_v46  ;;  %v4128_v10 = vrot.slane %v4121_v1, %v7083_v6  ;;  %v9033_v3 = vrot.slane %v2242_v50, %v7083_v6  ;;  %v262_v48 = vmax.bf16 %v10385_v18, %v230_v58  ;;  %v218_v58 = vld [vmem:[%s7067_s3 + $0x3c] sm:$0xf]  ;;  %v9061_v1 = vpop.permute.xlu1 %3202 }
 0x163   : > { %10445 = vst [vmem:[#allocation97_spill] sm:$0xff] %v9028_v19  ;;  %v4932_v51 = vrot.slane %v4925_v8, %v7083_v6  ;;  %v4457_v21 = vcombine.low %v4448_v43, %v4455_v59  ;;  %v1748_v32 = vshrl.u32 %v8834_v60, 16  ;;  %v4718_v39 = vcombine.low %v8842_v0, %v8858_v45  ;;  %v9051_v43 = vpop.permute.xlu0 %3200 }
 0x164   : > { %v9038_v9 = vrot.slane %v4129_v62, %v7083_v6  ;;  %v4130_v2 = vcombine.low %v4128_v10, %v9028_v19  ;;  %v2272_v49 = vcombine.low %v8715_v4, %v9033_v3  ;;  %v9048_v30 = vrot.slane %v262_v48, %v7083_v6 }
 0x165   : > { %v4933_v56 = vcombine.low %v8677_v61, %v4932_v51  ;;  %3849 = vrot.lane.b32.xlu0 %v3764_v29, %s6887_s14  ;;  %v4471_v54 = vrot.slane %v4457_v21, %v7083_v6  ;;  %v4719_v0 = vcombine.low %v8875_v63, %v8879_v20  ;;  %v4720_v45 = vcombine.low %v8886_v24, %v8891_v31 }
 0x166   : > { %10446 = vst [vmem:[#allocation98_spill] sm:$0xff] %v9038_v9  ;;  %v4728_v4 = vrot.slane %v4718_v39, %v7083_v6  ;;  %v4144_v50 = vrot.slane %v4130_v2, %v7083_v6  ;;  %v9065_v8 = vrot.slane %v2272_v49, %v7083_v6  ;;  %v9070_v59 = vrot.slane %v9048_v30, %v7083_v6 }
 0x167   : > { %v4940_v29 = vrot.slane %v4933_v56, %v7083_v6  ;;  %v4472_v20 = vcombine.low %v4464_v12, %v4471_v54  ;;  %v4735_v63 = vrot.slane %v4719_v0, %v7083_v6  ;;  %v4742_v24 = vrot.slane %v4720_v45, %v7083_v6  ;;  %v9099_v0 = vpop.permute.xlu0 %5686 }
 0x168   : > { %10447 = vst [vmem:[#allocation99_spill] sm:$0xff] %v9065_v8  ;;  %v249_v31 = vmax.bf16 %v10385_v18, %v217_v52  ;;  %v4145_v62 = vcombine.low %v9038_v9, %v4144_v50  ;;  %v1753_v51 = vshll.u32 %v9070_v59, 16  ;;  %v250_v48 = vmax.bf16 %v10385_v18, %v218_v58  ;;  %v9107_v58 = vpop.permute.xlu1 %4833 }
 0x169   : > { %v4941_v10 = vcombine.low %v4940_v29, %v9065_v8  ;;  %4839 = vrot.lane.b32.xlu1 %v4472_v20, %s6890_s24  ;;  %v4750_v21 = vcombine.low %v4728_v4, %v4735_v63  ;;  %v9082_v12 = vcombine.high %v8707_v47, %v8707_v47  ;;  %v2536_v2 = vcombine.low %v8834_v60, %v9070_v59 }
 0x16a   : > { %v630_v39 = vrot.slane %v249_v31, %v7083_v6  ;;  %4222 = vrot.lane.b32.xlu0 %v4145_v62, %s6885_s20  ;;  %v9090_v49 = vsel %vm7422_vm14, %v1748_v32, %v1753_v51  ;;  %v654_v56 = vrot.slane %v250_v48, %v7083_v6  ;;  %v6620_v52 = vcombine.high %v8799_v14, %v8811_v25 }
 0x16b   : > { %v9097_v54 = vcombine.high %v8976_v17, %v8976_v17  ;;  %v4721_v60 = vcombine.low %v8908_v37, %v9090_v49  ;;  %v4758_v45 = vrot.slane %v4750_v21, %v7083_v6  ;;  %10449 = vst [vmem:[#allocation101_spill] sm:$0xff] %v9107_v58  ;;  %v9113_v25 = vrot.slane %v2536_v2, %v7083_v6  ;;  %v10470_v58 = vld [vmem:[#allocation76_spill] sm:$0xff] }
 0x16c   : > { %v631_v4 = vcombine.high %v630_v39, %v630_v39  ;;  %v9105_v32 = vrot.slane %v630_v39, %v7083_v6  ;;  %v655_v50 = vcombine.high %v654_v56, %v654_v56  ;;  %v9110_v14 = vrot.slane %v654_v56, %v7083_v6 }
 0x16d   : > { %10448 = vst [vmem:[#allocation100_spill] sm:$0xff] %v9097_v54  ;;  %v5050_v29 = vrot.slane %v6620_v52, %v7083_v6  ;;  %5124 = vrot.lane.b32.xlu1 %v4941_v10, %s6888_s17  ;;  %v4749_v37 = vrot.slane %v4721_v60, %v7083_v6  ;;  %v2566_v62 = vcombine.low %v8852_v35, %v9113_v25  ;;  %v1365_v10 = vshrl.u32 %v8976_v17, 16 }
 0x16e   : > { %v9119_v20 = vrot.slane %v631_v4, %v7083_v6  ;;  %v646_v63 = vcombine.high %v9105_v32, %v9105_v32  ;;  %v2288_v31 = vcombine.low %v9082_v12, %v9105_v32  ;;  %v9129_v48 = vrot.slane %v655_v50, %v7083_v6  ;;  %v9144_v50 = vpop.permute.xlu0 %3214 }
 0x16f   : > { %v5051_v51 = vcombine.low %v8846_v13, %v5050_v29  ;;  %v4751_v21 = vcombine.low %v4742_v24, %v4749_v37  ;;  %v9139_v52 = vrot.slane %v2566_v62, %v7083_v6  ;;  %v1370_v60 = vshll.u32 %v9082_v12, 16  ;;  %10452 = vst [vmem:[#allocation104_spill] sm:$0xff] %v9144_v50  ;;  %v9153_v62 = vpop.permute.xlu1 %5395 }
 0x170   : > { %v647_v39 = vcombine.high %v9119_v20, %v9119_v20  ;;  %v2289_v2 = vcombine.low %v9119_v20, %v646_v63  ;;  %v9136_v56 = vrot.slane %v2288_v31, %v7083_v6  ;;  %v1373_v4 = vshrl.u32 %v9082_v12, 16  ;;  %10454 = vst [vmem:[#allocation106_spill] sm:$0xff] %v9153_v62 }
 0x171   : > { %10451 = vst [vmem:[#allocation103_spill] sm:$0xff] %v9139_v52  ;;  %v5058_v35 = vrot.slane %v5051_v51, %v7083_v6  ;;  %v4765_v24 = vrot.slane %v4751_v21, %v7083_v6  ;;  %v9158_v13 = vsel %vm7422_vm14, %v1365_v10, %v1370_v60  ;;  %v1378_v8 = vshll.u32 %v9097_v54, 16 }
 0x172   : > { %10450 = vst [vmem:[#allocation102_spill] sm:$0xff] %v9136_v56  ;;  %v2290_v29 = vcombine.low %v647_v39, %v9110_v14  ;;  %v9149_v37 = vrot.slane %v2289_v2, %v7083_v6  ;;  %v5210_v31 = vcombine.low %v9033_v3, %v9136_v56  ;;  %v1382_v21 = vshrl.u32 %v9105_v32, 16  ;;  %v9187_v40 = vpop.permute.xlu0 %4845 }
 0x173   : > { %v5059_v51 = vcombine.low %v5058_v35, %v9139_v52  ;;  %v4766_v61 = vcombine.low %v4758_v45, %v4765_v24  ;;  %v1387_v3 = vshll.u32 %v9119_v20, 16  ;;  %v9169_v35 = vsel %vm7422_vm14, %v1373_v4, %v1378_v8  ;;  %v231_v52 = vld [vmem:[%s7067_s3 + $0x70] sm:$0xf]  ;;  %10455 = vst [vmem:[#allocation107_spill] sm:$0xff] %v9187_v40 }
 0x174   : > { %10453 = vst [vmem:[#allocation105_spill] sm:$0xff] %v9149_v37  ;;  %v9163_v2 = vrot.slane %v2290_v29, %v7083_v6  ;;  %v5218_v9 = vrot.slane %v5210_v31, %v7083_v6  ;;  %v1390_v10 = vshrl.u32 %v9119_v20, 16  ;;  %v1395_v60 = vshll.u32 %v646_v63, 16 }
 0x175   : > { %v1398_v56 = vshrl.u32 %v646_v63, 16  ;;  %4851 = vrot.lane.b32.xlu0 %v4766_v61, %s6890_s24  ;;  %v9177_v24 = vsel %vm7422_vm14, %v1382_v21, %v1387_v3  ;;  %v1403_v29 = vshll.u32 %v647_v39, 16  ;;  %v1406_v31 = vshrl.u32 %v647_v39, 16 }
 0x176   : > { %v5211_v45 = vcombine.low %v9149_v37, %v9163_v2  ;;  %v9182_v8 = vsel %vm7422_vm14, %v1390_v10, %v1395_v60  ;;  %v1411_v4 = vshll.u32 %v9110_v14, 16  ;;  %v1414_v63 = vshrl.u32 %v9110_v14, 16  ;;  %v9198_v10 = vpop.permute.xlu1 %5688 }
 0x177   : > { %v1419_v61 = vshll.u32 %v9129_v48, 16  ;;  %v9192_v21 = vsel %vm7422_vm14, %v1398_v56, %v1403_v29  ;;  %v2845_v39 = vcombine.low %v9002_v22, %v9158_v13  ;;  %v2891_v3 = vcombine.low %v9169_v35, %v9177_v24  ;;  %10456 = vst [vmem:[#allocation108_spill] sm:$0xff] %v9198_v10 }
 0x178   : > { %v5225_v41 = vrot.slane %v5211_v45, %v7083_v6  ;;  %v9202_v60 = vsel %vm7422_vm14, %v1406_v31, %v1411_v4  ;;  %v2892_v56 = vcombine.low %v9182_v8, %v9192_v21  ;;  %v263_v45 = vmax.bf16 %v10385_v18, %v231_v52  ;;  %v232_v4 = vld [vmem:[%s7067_s3 + $0x74] sm:$0xf] }
 0x179   : > { %v9206_v7 = vsel %vm7422_vm14, %v1414_v63, %v1419_v61  ;;  %5136 = vrot.lane.b32.xlu0 %v5059_v51, %s6888_s17  ;;  %v2873_v22 = vrot.slane %v2845_v39, %v7083_v6  ;;  %v9216_v31 = vrot.slane %v2891_v3, %v7083_v6  ;;  %v937_v61 = vcombine.high %v9048_v30, %v9048_v30 }
 0x17a   : > { %v5226_v29 = vcombine.low %v5218_v9, %v5225_v41  ;;  %v2893_v5 = vcombine.low %v9202_v60, %v9206_v7  ;;  %v9220_v63 = vrot.slane %v2892_v56, %v7083_v6  ;;  %v9226_v41 = vcombine.high %v9070_v59, %v9070_v59 }
 0x17b   : > { %10457 = vst [vmem:[#allocation109_spill] sm:$0xff] %v9216_v31  ;;  %v1788_v9 = vrot.slane %v263_v45, %v7083_v6  ;;  %v5487_v51 = vcombine.low %v2873_v22, %v9216_v31  ;;  %v2874_v39 = vcombine.low %v8780_v38, %v8783_v16  ;;  %v2875_v3 = vcombine.low %v8792_v11, %v2873_v22  ;;  %v9251_v11 = vpop.permute.xlu1 %3204 }
 0x17c   : > { %10458 = vst [vmem:[#allocation110_spill] sm:$0xff] %v9220_v63  ;;  %5401 = vrot.lane.b32.xlu1 %v5226_v29, %s6886_s5  ;;  %v9231_v52 = vrot.slane %v2893_v5, %v7083_v6  ;;  %v9238_v30 = vrot.slane %v937_v61, %v7083_v6  ;;  %v264_v45 = vmax.bf16 %v10385_v18, %v232_v4  ;;  %v9244_v29 = vpop.permute.xlu0 %5130  ;;  %10461 = vst [vmem:[#allocation113_spill] sm:$0xff] %v9251_v11 }
 0x17d   : > { %v1789_v56 = vcombine.high %v1788_v9, %v1788_v9  ;;  %v9241_v54 = vrot.slane %v1788_v9, %v7083_v6  ;;  %10460 = vst [vmem:[#allocation112_spill] sm:$0xff] %v9244_v29  ;;  %v5495_v10 = vrot.slane %v5487_v51, %v7083_v6  ;;  %v2882_v38 = vrot.slane %v2874_v39, %v7083_v6 }
 0x17e   : > { %10459 = vst [vmem:[#allocation111_spill] sm:$0xff] %v9231_v52  ;;  %v5488_v5 = vcombine.low %v9220_v63, %v9231_v52  ;;  %v2889_v16 = vrot.slane %v2875_v3, %v7083_v6  ;;  %v2582_v61 = vcombine.low %v9238_v30, %v9226_v41  ;;  %v9260_v4 = vcombine.high %v9238_v30, %v9238_v30 }
 0x17f   : > { %v9254_v22 = vrot.slane %v1789_v56, %v7083_v6  ;;  %v1756_v9 = vshrl.u32 %v9070_v59, 16  ;;  %v1761_v39 = vshll.u32 %v9238_v30, 16  ;;  %v1764_v3 = vshrl.u32 %v9238_v30, 16 }
 0x180   : > { %10462 = vst [vmem:[#allocation114_spill] sm:$0xff] %v9260_v4  ;;  %v5502_v51 = vrot.slane %v5488_v5, %v7083_v6  ;;  %v2890_v52 = vcombine.low %v2882_v38, %v2889_v16  ;;  %v9267_v11 = vrot.slane %v2582_v61, %v7083_v6  ;;  %v1769_v63 = vshll.u32 %v9226_v41, 16 }
 0x181   : > { %v6621_v56 = vcombine.high %v9241_v54, %v9254_v22  ;;  %v5312_v31 = vcombine.low %v9241_v54, %v9254_v22  ;;  %v9276_v5 = vsel %vm7422_vm14, %v1756_v9, %v1761_v39  ;;  %v1772_v38 = vshrl.u32 %v9226_v41, 16 }
 0x182   : > { %10463 = vst [vmem:[#allocation115_spill] sm:$0xff] %v9267_v11  ;;  %v5503_v29 = vcombine.low %v5495_v10, %v5502_v51  ;;  %v1777_v16 = vshll.u32 %v9260_v4, 16  ;;  %v5320_v62 = vcombine.low %v9113_v25, %v9267_v11  ;;  %v9288_v40 = vsel %vm7422_vm14, %v1764_v3, %v1769_v63  ;;  %v9290_v10 = vpop.permute.xlu0 %5407  ;;  %v9308_v63 = vpop.permute.xlu1 %3833 }
 0x183   : > { %v9281_v61 = vrot.slane %v6621_v56, %v7083_v6  ;;  %v5319_v18 = vrot.slane %v5312_v31, %v7083_v6  ;;  %10465 = vst [vmem:[#allocation117_spill] sm:$0xff] %v9290_v10  ;;  %v9299_v51 = vcombine.high %v9241_v54, %v9241_v54  ;;  %v9303_v31 = vcombine.high %v9254_v22, %v9254_v22 }
 0x184   : > { %5694 = vrot.lane.b32.xlu1 %v5503_v29, %s6891_s25  ;;  %v9295_v9 = vsel %vm7422_vm14, %v1772_v38, %v1777_v16  ;;  %v9306_v25 = vrot.slane %v264_v45, %v7083_v6  ;;  %10466 = vst [vmem:[#allocation118_spill] sm:$0xff] %v9308_v63  ;;  %v5328_v29 = vrot.slane %v5320_v62, %v7083_v6  ;;  %v1831_v3 = vshrl.u32 %v9241_v54, 16 }
 0x185   : > { %10464 = vst [vmem:[#allocation116_spill] sm:$0xff] %v9281_v61  ;;  %v5321_v39 = vcombine.low %v5319_v18, %v9281_v61  ;;  %v1836_v56 = vshll.u32 %v9254_v22, 16  ;;  %v1839_v16 = vshrl.u32 %v9254_v22, 16  ;;  %v1844_v10 = vshll.u32 %v9299_v51, 16 }
 0x186   : > { %v9316_v38 = vrot.slane %v9306_v25, %v7083_v6  ;;  %v1847_v45 = vshrl.u32 %v9299_v51, 16  ;;  %v1852_v62 = vshll.u32 %v9303_v31, 16  ;;  %v1855_v61 = vshrl.u32 %v9303_v31, 16 }
 0x187   : > { %v5335_v63 = vrot.slane %v5321_v39, %v7083_v6  ;;  %v9324_v18 = vsel %vm7422_vm14, %v1831_v3, %v1836_v56  ;;  %v9331_v11 = vsel %vm7422_vm14, %v1839_v16, %v1844_v10  ;;  %v3139_v4 = vcombine.low %v9090_v49, %v9276_v5  ;;  %v9346_v16 = vpop.permute.xlu0 %5700 }
 0x188   : > { %3210 = vrot.lane.b32.xlu1 %v2890_v52, %s6889_s28  ;;  %10467 = vst [vmem:[#allocation119_spill] sm:$0xff] %v9331_v11  ;;  %v1860_v28 = vshll.u32 %v9316_v38, 16  ;;  %v3185_v39 = vcombine.low %v9288_v40, %v9295_v9  ;;  %v9340_v56 = vsel %vm7422_vm14, %v1847_v45, %v1852_v62  ;;  %v5589_v52 = vcombine.low %v9324_v18, %v9331_v11  ;;  %v9358_v45 = vpop.permute.xlu1 %4206 }
 0x189   : > { %v5336_v3 = vcombine.low %v5328_v29, %v5335_v63  ;;  %10468 = vst [vmem:[#allocation120_spill] sm:$0xff] %v9340_v56  ;;  %v6606_v10 = vcombine.high %v10470_v58, %v10469_v42  ;;  %10471 = vst [vmem:[#allocation80_spill] sm:$0xff] %v9346_v16  ;;  %v3167_v49 = vrot.slane %v3139_v4, %v7083_v6 }
 0x18a   : > { %v9350_v50 = vsel %vm7422_vm14, %v1855_v61, %v1860_v28  ;;  %v9354_v63 = vrot.slane %v3185_v39, %v7083_v6  ;;  %v3474_v29 = vcombine.low %v8976_v17, %v9082_v12  ;;  %10474 = vst [vmem:[#allocation122_spill] sm:$0xff] %v9358_v45  ;;  %v5597_v58 = vrot.slane %v5589_v52, %v7083_v6  ;;  %v10477_v39 = vld [vmem:[#allocation19_spill] sm:$0xff] }
 0x18b   : > { %10472 = vst [vmem:[#allocation76_spill] sm:$0xff] %v9350_v50  ;;  %5413 = vrot.lane.b32.xlu0 %v5336_v3, %s6886_s5  ;;  %v5590_v42 = vcombine.low %v9340_v56, %v9350_v50  ;;  %v9365_v28 = vrot.slane %v6606_v10, %v7083_v6  ;;  %v3168_v4 = vcombine.low %v8912_v23, %v8922_v55  ;;  %v10478_v3 = vld [vmem:[#allocation17_spill] sm:$0xff]  ;;  %v10481_v56 = vld [vmem:[#allocation12_spill] sm:$0xff]  ;;  %v9392_v37 = vpop.permute.xlu0 %3216 }
 0x18c   : > { %10473 = vst [vmem:[#allocation121_spill] sm:$0xff] %v9354_v63  ;;  %v5605_v61 = vcombine.low %v3167_v49, %v9354_v63  ;;  %v9371_v62 = vrot.slane %v3474_v29, %v7083_v6  ;;  %v3169_v12 = vcombine.low %v8936_v44, %v3167_v49  ;;  %v1994_v45 = vcombine.low %v10478_v3, %v10477_v39  ;;  %v10479_v49 = vld [vmem:[#allocation20_spill] sm:$0xff]  ;;  %v10480_v63 = vld [vmem:[#allocation18_spill] sm:$0xff] }
 0x18d   : > { %10475 = vst [vmem:[#allocation123_spill] sm:$0xff] %v9365_v28  ;;  %v5604_v16 = vrot.slane %v5590_v42, %v7083_v6  ;;  %v3503_v52 = vcombine.low %v9365_v28, %v8945_v27  ;;  %v3176_v10 = vrot.slane %v3168_v4, %v7083_v6  ;;  %v6594_v23 = vcombine.high %v10478_v3, %v10477_v39  ;;  %v10482_v27 = vld [vmem:[#allocation21_spill] sm:$0xff]  ;;  %v9397_v3 = vpop.permute.xlu1 %4835 }
 0x18e   : > { %10476 = vst [vmem:[#allocation124_spill] sm:$0xff] %v9371_v62  ;;  %v5613_v55 = vrot.slane %v5605_v61, %v7083_v6  ;;  %v3504_v29 = vcombine.low %v8952_v15, %v9371_v62  ;;  %v3183_v44 = vrot.slane %v3169_v12, %v7083_v6  ;;  %v1996_v50 = vcombine.low %v10480_v63, %v10479_v49 }
 0x18f   : > { %v5606_v11 = vcombine.low %v5597_v58, %v5604_v16  ;;  %v3511_v42 = vrot.slane %v3503_v52, %v7083_v6  ;;  %v1997_v28 = vcombine.low %v10482_v27, %v10481_v56  ;;  %v2004_v4 = vrot.slane %v1994_v45, %v7083_v6  ;;  %v9425_v27 = vpop.permute.xlu0 %3845 }
 0x190   : > { %v3518_v61 = vrot.slane %v3504_v29, %v7083_v6  ;;  %v3184_v39 = vcombine.low %v3176_v10, %v3183_v44  ;;  %v2011_v15 = vrot.slane %v6594_v23, %v7083_v6  ;;  %v2018_v12 = vrot.slane %v1996_v50, %v7083_v6  ;;  %v10483_v29 = vld [vmem:[#allocation86_spill] sm:$0xff] }
 0x191   : > { %v5620_v16 = vrot.slane %v5606_v11, %v7083_v6  ;;  %v2025_v63 = vrot.slane %v1997_v28, %v7083_v6  ;;  %v6607_v45 = vcombine.high %v9105_v32, %v9119_v20  ;;  %v3522_v52 = vcombine.low %v9110_v14, %v9129_v48 }
 0x192   : > { %v3519_v56 = vcombine.low %v3511_v42, %v3518_v61  ;;  %v2026_v58 = vcombine.low %v2004_v4, %v2011_v15  ;;  %v3988_v50 = vcombine.low %v9105_v32, %v9119_v20  ;;  %v3766_v11 = vcombine.low %v10483_v29, %v8818_v57  ;;  %v9432_v15 = vpop.permute.xlu1 %5120 }
 0x193   : > { %v5621_v10 = vcombine.low %v5613_v55, %v5620_v16  ;;  %v2027_v23 = vcombine.low %v2018_v12, %v2025_v63  ;;  %v9412_v44 = vrot.slane %v6607_v45, %v7083_v6  ;;  %v9415_v49 = vrot.slane %v3522_v52, %v7083_v6 }
 0x194   : > { %3839 = vrot.lane.b32.xlu1 %v3519_v56, %s6887_s14  ;;  %v2034_v28 = vrot.slane %v2026_v58, %v7083_v6  ;;  %v3768_v55 = vcombine.low %v9070_v59, %v9238_v30  ;;  %v3995_v42 = vrot.slane %v3988_v50, %v7083_v6  ;;  %v9423_v57 = vrot.slane %v3766_v11, %v7083_v6 }
 0x195   : > { %5706 = vrot.lane.b32.xlu0 %v5621_v10, %s6891_s25  ;;  %v2041_v32 = vrot.slane %v2027_v23, %v7083_v6  ;;  %v3997_v4 = vcombine.low %v9412_v44, %v9415_v49  ;;  %v9439_v56 = vcombine.high %v9110_v14, %v9110_v14  ;;  %v1422_v52 = vshrl.u32 %v9129_v48, 16 }
 0x196   : > { %10484 = vst [vmem:[#allocation19_spill] sm:$0xff] %v9423_v57  ;;  %v9430_v61 = vrot.slane %v3768_v55, %v7083_v6  ;;  %v3996_v16 = vcombine.low %v9371_v62, %v3995_v42  ;;  %v3797_v63 = vcombine.low %v9012_v46, %v9423_v57  ;;  %v4473_v10 = vcombine.low %v9158_v13, %v9169_v35 }
 0x197   : > { %v2042_v12 = vcombine.low %v2034_v28, %v2041_v32  ;;  %v9442_v58 = vrot.slane %v3997_v4, %v7083_v6  ;;  %v1427_v29 = vshll.u32 %v9439_v56, 16  ;;  %v4474_v55 = vcombine.low %v9177_v24, %v9182_v8 }
 0x198   : > { %10485 = vst [vmem:[#allocation17_spill] sm:$0xff] %v9430_v61  ;;  %v3798_v45 = vcombine.low %v9028_v19, %v9430_v61  ;;  %v4004_v23 = vrot.slane %v3996_v16, %v7083_v6  ;;  %v3805_v50 = vrot.slane %v3797_v63, %v7083_v6  ;;  %v4475_v13 = vcombine.low %v9192_v21, %v9202_v60  ;;  %v9477_v60 = vpop.permute.xlu1 %5397 }
 0x199   : > { %10486 = vst [vmem:[#allocation20_spill] sm:$0xff] %v9442_v58  ;;  %3222 = vrot.lane.b32.xlu0 %v3184_v39, %s6889_s28  ;;  %v5878_v46 = vsel %vm5875_vm15, %v2042_v12, %v9051_v43  ;;  %v10487_v43 = vld [vmem:[#allocation85_spill] sm:$0xff]  ;;  %v9467_v32 = vsel %vm7422_vm14, %v1422_v52, %v1427_v29  ;;  %v4483_v42 = vrot.slane %v4473_v10, %v7083_v6  ;;  %v10488_v10 = vld [vmem:[#allocation59_spill] sm:$0xff] }
 0x19a   : > { %v5917_v11 = vsel %vm5915_vm0, %v5878_v46, %v8916_v36  ;;  %v3812_v28 = vrot.slane %v3798_v45, %v7083_v6  ;;  %v4012_v35 = vcombine.low %v4004_v23, %v9442_v58  ;;  %v9470_v36 = vpop.permute.xlu0 %4218  ;;  %v4476_v8 = vcombine.low %v9206_v7, %v9467_v32  ;;  %v10489_v46 = vld [vmem:[#allocation27_spill] sm:$0xff] }
 0x19b   : > { %v5944_v39 = vsel %vm5942_vm1, %v5917_v11, %v10487_v43  ;;  %v4490_v21 = vrot.slane %v4474_v55, %v7083_v6  ;;  %v4497_v16 = vrot.slane %v4475_v13, %v7083_v6  ;;  %v4146_v63 = vcombine.low %v9226_v41, %v9241_v54  ;;  %v10490_v29 = vld [vmem:[#allocation15_spill] sm:$0xff]  ;;  %v10491_v54 = vld [vmem:[#allocation22_spill] sm:$0xff]  ;;  %v10492_v11 = vld [vmem:[#allocation28_spill] sm:$0xff] }
 0x19c   : > { %v3813_v4 = vcombine.low %v3805_v50, %v3812_v28  ;;  %v5971_v24 = vsel %vm5969_vm2, %v5944_v39, %v9015_v33  ;;  %4212 = vrot.lane.b32.xlu1 %v4012_v35, %s6885_s20  ;;  %v4147_v33 = vcombine.low %v9254_v22, %v9299_v51  ;;  %v4504_v7 = vrot.slane %v4476_v8, %v7083_v6  ;;  %v10493_v51 = vld [vmem:[#allocation26_spill] sm:$0xff] }
 0x19d   : > { %v5998_v12 = vsel %vm5996_vm3, %v5971_v24, %v8961_v34  ;;  %v4505_v45 = vcombine.low %v4483_v42, %v4490_v21  ;;  %v4148_v52 = vcombine.low %v9303_v31, %v9316_v38  ;;  %v5712_v23 = vcombine.low %v10489_v46, %v10488_v10  ;;  %v10495_v24 = vld [vmem:[#allocation29_spill] sm:$0xff]  ;;  %v9514_v46 = vpop.permute.xlu1 %5690 }
 0x19e   : > { %3851 = vrot.lane.b32.xlu0 %v3813_v4, %s6887_s14  ;;  %v4155_v34 = vrot.slane %v4146_v63, %v7083_v6  ;;  %v4162_v50 = vrot.slane %v4147_v33, %v7083_v6  ;;  %v2076_v41 = vcombine.low %v10491_v54, %v10490_v29  ;;  %v2337_v28 = vcombine.low %v10493_v51, %v10492_v11  ;;  %v10494_v4 = vld [vmem:[#allocation30_spill] sm:$0xff]  ;;  %v9508_v21 = vpop.permute.xlu0 %4847  ;;  %v10496_v33 = vld [vmem:[#allocation33_spill] sm:$0xff] }
 0x19f   : > { %v4506_v55 = vcombine.low %v4497_v16, %v4504_v7  ;;  %v4513_v13 = vrot.slane %v4505_v45, %v7083_v6  ;;  %v4169_v35 = vrot.slane %v4148_v52, %v7083_v6  ;;  %v5719_v31 = vrot.slane %v5712_v23, %v7083_v6  ;;  %v10497_v45 = vld [vmem:[#allocation11_spill] sm:$0xff] }
 0x1a0   : > { %v4170_v43 = vcombine.low %v9430_v61, %v4155_v34  ;;  %v2090_v39 = vrot.slane %v2076_v41, %v7083_v6  ;;  %v6598_v42 = vcombine.high %v10493_v51, %v10492_v11  ;;  %v2339_v8 = vcombine.low %v10495_v24, %v10494_v4  ;;  %v10498_v52 = vld [vmem:[#allocation31_spill] sm:$0xff]  ;;  %v10499_v34 = vld [vmem:[#allocation24_spill] sm:$0xff] }
 0x1a1   : > { %v4520_v16 = vrot.slane %v4506_v55, %v7083_v6  ;;  %v4171_v63 = vcombine.low %v4162_v50, %v4169_v35  ;;  %v5720_v7 = vcombine.low %v10496_v33, %v5719_v31  ;;  %v2340_v10 = vcombine.low %v10498_v52, %v10497_v45 }
 0x1a2   : > { %v4178_v23 = vrot.slane %v4170_v43, %v7083_v6  ;;  %v2091_v29 = vcombine.low %v10499_v34, %v2090_v39  ;;  %v2347_v54 = vrot.slane %v2337_v28, %v7083_v6  ;;  %v9520_v41 = vrot.slane %v6598_v42, %v7083_v6  ;;  %v10501_v43 = vld [vmem:[#allocation90_spill] sm:$0xff] }
 0x1a3   : > { %v4521_v58 = vcombine.low %v4513_v13, %v4520_v16  ;;  %v9523_v55 = vrot.slane %v4171_v63, %v7083_v6  ;;  %6634 = vmatprep.mubr.msk.bf16.mxu0 %vm5875_vm15, %v5720_v7  ;;  %v9527_v50 = vrot.slane %v2339_v8, %v7083_v6  ;;  %v9530_v35 = vrot.slane %v2340_v10, %v7083_v6  ;;  %v10502_v8 = vld [vmem:[#allocation72_spill] sm:$0xff]  ;;  %v9550_v7 = vpop.permute.xlu0 %5132 }
 0x1a4   : > { %v5881_v31 = vsel %vm5875_vm15, %v2091_v29, %v9061_v1  ;;  %v2369_v28 = vcombine.low %v2347_v54, %v9520_v41  ;;  %v6025_v16 = vsel %vm6023_vm4, %v5998_v12, %v10502_v8  ;;  %v2291_v33 = vcombine.low %v9129_v48, %v9439_v56 }
 0x1a5   : > { %10500 = vst [vmem:[#allocation18_spill] sm:$0xff] %v9523_v55  ;;  %4841 = vrot.lane.b32.xlu1 %v4521_v58, %s6890_s24  ;;  %v4186_v13 = vcombine.low %v4178_v23, %v9523_v55  ;;  %v5919_v39 = vsel %vm5915_vm0, %v5881_v31, %v10501_v43  ;;  %v2370_v42 = vcombine.low %v9527_v50, %v9530_v35  ;;  %v10504_v31 = vld [vmem:[#allocation105_spill] sm:$0xff]  ;;  %v10506_v43 = vld [vmem:[#allocation119_spill] sm:$0xff]  ;;  %v10523_v55 = vld [vmem:[#allocation116_spill] sm:$0xff] }
 0x1a6   : > { %v2377_v63 = vrot.slane %v2369_v28, %v7083_v6  ;;  %v6052_v1 = vsel %vm6050_vm5, %v6025_v16, %v9099_v0  ;;  %v6617_v58 = vcombine.high %v8707_v47, %v8976_v17  ;;  %v1813_v12 = vcombine.high %v9306_v25, %v9306_v25  ;;  %v9558_v0 = vpop.permute.xlu1 %3206  ;;  %v10507_v16 = vld [vmem:[#allocation104_spill] sm:$0xff] }
 0x1a7   : > { %4224 = vrot.lane.b32.xlu0 %v4186_v13, %s6885_s20  ;;  %v2384_v45 = vrot.slane %v2370_v42, %v7083_v6  ;;  %6234 = vmatmul.mubr.bf16.vlgmr.msra.gmra.mrb[0].mxu0 %v6052_v1  ;;  %v4767_v52 = vcombine.low %v9276_v5, %v9288_v40  ;;  %10503 = vst [vmem:[#allocation12_spill] sm:$0xff] %v9558_v0  ;;  %v1863_v47 = vshrl.u32 %v9316_v38, 16  ;;  %v10505_v13 = vld [vmem:[#allocation120_spill] sm:$0xff]  ;;  %v10534_v0 = vld [vmem:[#allocation65_spill] sm:$0xff] }
 0x1a8   : > { %v2319_v10 = vrot.slane %v2291_v33, %v7083_v6  ;;  %v4949_v23 = vrot.slane %v6617_v58, %v7083_v6  ;;  %v4768_v17 = vcombine.low %v9295_v9, %v9324_v18  ;;  %v9566_v29 = vrot.slane %v1813_v12, %v7083_v6  ;;  %v10509_v58 = vld [vmem:[#allocation96_spill] sm:$0xff]  ;;  %v9587_v12 = vpop.permute.xlu0 %5409 }
 0x1a9   : > { %v2385_v34 = vcombine.low %v2377_v63, %v2384_v45  ;;  %v4777_v25 = vrot.slane %v4767_v52, %v7083_v6  ;;  %v5946_v40 = vsel %vm5942_vm1, %v5919_v39, %v8971_v53  ;;  %v4769_v42 = vcombine.low %v10506_v43, %v10505_v13  ;;  %v10508_v63 = vld [vmem:[#allocation101_spill] sm:$0xff]  ;;  %v10514_v43 = vld [vmem:[#allocation114_spill] sm:$0xff] }
 0x1aa   : > { %v2321_v5 = vcombine.low %v9163_v2, %v2319_v10  ;;  %v4950_v28 = vcombine.low %v4949_v23, %v10504_v31  ;;  %v4784_v8 = vrot.slane %v4768_v17, %v7083_v6  ;;  %v1868_v18 = vshll.u32 %v9566_v29, 16  ;;  %v10511_v23 = vld [vmem:[#allocation89_spill] sm:$0xff] }
 0x1ab   : > { %v5899_v9 = vsel %vm5875_vm15, %v2385_v34, %v10507_v16  ;;  %v5973_v1 = vsel %vm5969_vm2, %v5946_v40, %v10508_v63  ;;  %v5227_v33 = vcombine.low %v2319_v10, %v2347_v54  ;;  %v5228_v54 = vcombine.low %v9520_v41, %v9527_v50  ;;  %v9598_v34 = vpop.permute.xlu1 %3835  ;;  %v233_v63 = vld [vmem:[%s7067_s3 + $0x78] sm:$0xf] }
 0x1ac   : > { %v5931_v53 = vsel %vm5915_vm0, %v5899_v9, %v10509_v58  ;;  %v9584_v2 = vrot.slane %v2321_v5, %v7083_v6  ;;  %v4957_v39 = vrot.slane %v4950_v28, %v7083_v6  ;;  %v4799_v45 = vcombine.low %v4777_v25, %v4784_v8  ;;  %10512 = vst [vmem:[#allocation86_spill] sm:$0xff] %v9598_v34  ;;  %v10513_v25 = vld [vmem:[#allocation76_spill] sm:$0xff]  ;;  %v10515_v9 = vld [vmem:[#allocation93_spill] sm:$0xff]  ;;  %v10516_v58 = vld [vmem:[#allocation107_spill] sm:$0xff] }
 0x1ad   : > { %v9591_v52 = vsel %vm7422_vm14, %v1863_v47, %v1868_v18  ;;  %v5958_v17 = vsel %vm5942_vm1, %v5931_v53, %v10511_v23  ;;  %v5235_v10 = vrot.slane %v5227_v33, %v7083_v6  ;;  %v4791_v28 = vrot.slane %v4769_v42, %v7083_v6  ;;  %v10517_v53 = vld [vmem:[#allocation106_spill] sm:$0xff] }
 0x1ae   : > { %10510 = vst [vmem:[#allocation21_spill] sm:$0xff] %v9584_v2  ;;  %v4958_v40 = vcombine.low %v4957_v39, %v9584_v2  ;;  %v4770_v5 = vcombine.low %v10513_v25, %v9591_v52  ;;  %v4807_v47 = vrot.slane %v4799_v45, %v7083_v6  ;;  %v5242_v13 = vrot.slane %v5228_v54, %v7083_v6  ;;  %v234_v45 = vld [vmem:[%s7067_s3 + $0x7c] sm:$0xf]  ;;  %v10522_v2 = vld [vmem:[#allocation115_spill] sm:$0xff]  ;;  %s6807_s3 = scalar_lea.vmem %s10161_s8, 3200 }
 0x1af   : > { %v5060_v8 = vcombine.low %v10514_v43, %v9254_v22  ;;  %v5062_v16 = vcombine.low %v9316_v38, %v9566_v29  ;;  %v6000_v18 = vsel %vm5996_vm3, %v5973_v1, %v10515_v9  ;;  %v5985_v42 = vsel %vm5969_vm2, %v5958_v17, %v10516_v58  ;;  %v10518_v17 = vld [vmem:[#allocation46_spill] sm:$0xff]  ;;  %v10519_v43 = vld [vmem:[#allocation45_spill] sm:$0xff]  ;;  %p6808_p12 = scmp.ne.s32.totalorder %s10161_s8, %s6807_s3  ;;  %p6815_p5 = scmp.lt.s32.totalorder %s6813_s27, %s6807_s3 }
 0x1b0   : > { %5126 = vrot.lane.b32.xlu1 %v4958_v40, %s6888_s17  ;;  %v4798_v33 = vrot.slane %v4770_v5, %v7083_v6  ;;  %v9619_v39 = vsel %vm6023_vm4, %v6000_v18, %v10517_v53  ;;  %v9623_v22 = vcombine.high %v9129_v48, %v9129_v48  ;;  %v5243_v23 = vcombine.low %v5235_v10, %v5242_v13  ;;  %v9633_v53 = vpop.permute.xlu0 %5702  ;;  %v10524_v13 = vld [vmem:[#allocation112_spill] sm:$0xff] }
 0x1b1   : > { %v5069_v1 = vrot.slane %v5060_v8, %v7083_v6  ;;  %v5083_v54 = vrot.slane %v5062_v16, %v7083_v6  ;;  %v1430_v40 = vshrl.u32 %v9439_v56, 16  ;;  %v5505_v9 = vcombine.low %v10519_v43, %v10518_v17  ;;  %10521 = vst [vmem:[#allocation85_spill] sm:$0xff] %v9633_v53  ;;  %p6809_p2 = pnand %p6808_p12, %p10616_p0  ;;  %p6816_p10 = por %p6815_p5, %p6814_p4 }
 0x1b2   : > { %v4800_v25 = vcombine.low %v4791_v28, %v4798_v33  ;;  %v1435_v5 = vshll.u32 %v9623_v22, 16  ;;  %v10520_v18 = vmov 0   ;;  %v9639_v8 = vsel %vm5996_vm3, %v5985_v42, %v10524_v13  ;;  %v9642_v28 = vpop.permute.xlu1 %4208 }
 0x1b3   : > { %v265_v58 = vmax.bf16 %v10520_v18, %v233_v63  ;;  %v5084_v31 = vcombine.low %v10522_v2, %v5069_v1  ;;  %v5085_v10 = vcombine.low %v10523_v55, %v5083_v54  ;;  %v266_v16 = vmax.bf16 %v10520_v18, %v234_v45  ;;  %10525 = vst [vmem:[#allocation59_spill] sm:$0xff] %v9642_v28  ;;  %p6810_p9 = pneg %p6809_p2 }
 0x1b4   : > { %v4814_v33 = vrot.slane %v4800_v25, %v7083_v6  ;;  %5403 = vrot.lane.b32.xlu1 %v5243_v23, %s6886_s5  ;;  %v9648_v63 = vsel %vm7422_vm14, %v1430_v40, %v1435_v5  ;;  %v9652_v1 = vcombine.high %v9316_v38, %v9316_v38  ;;  %v5519_v43 = vrot.slane %v5505_v9, %v7083_v6 }
 0x1b5   : > { %v1895_v55 = vrot.slane %v265_v58, %v7083_v6  ;;  %v5092_v42 = vrot.slane %v5084_v31, %v7083_v6  ;;  %v5099_v45 = vrot.slane %v5085_v10, %v7083_v6  ;;  %v2894_v17 = vcombine.low %v9467_v32, %v9648_v63  ;;  %v10526_v10 = vld [vmem:[#allocation63_spill] sm:$0xff]  ;;  %p6817_p11 = pnand %p6816_p10, %p6810_p9 }
 0x1b6   : > { %v1919_v25 = vrot.slane %v266_v16, %v7083_v6  ;;  %v4815_v23 = vcombine.low %v4807_v47, %v4814_v33  ;;  %v10527_v16 = vld [vmem:[#allocation53_spill] sm:$0xff]  ;;  %v9688_v62 = vpop.permute.xlu1 %4837 }
 0x1b7   : > { %v1896_v40 = vcombine.high %v1895_v55, %v1895_v55  ;;  %v9662_v5 = vrot.slane %v1895_v55, %v7083_v6  ;;  %v5100_v18 = vcombine.low %v5092_v42, %v5099_v45  ;;  %v2922_v13 = vrot.slane %v2894_v17, %v7083_v6  ;;  %v9678_v55 = vpop.permute.xlu0 %3218  ;;  %v10529_v42 = vld [vmem:[#allocation44_spill] sm:$0xff]  ;;  %v10530_v17 = vld [vmem:[#allocation110_spill] sm:$0xff]  ;;  %10533 = vst [vmem:[#allocation15_spill] sm:$0xff] %v9688_v62 }
 0x1b8   : > { %v1920_v58 = vcombine.high %v1919_v25, %v1919_v25  ;;  %v9666_v31 = vrot.slane %v1919_v25, %v7083_v6  ;;  %4853 = vrot.lane.b32.xlu0 %v4815_v23, %s6890_s24  ;;  %v5721_v33 = vcombine.low %v10527_v16, %v10526_v10  ;;  %10528 = vst [vmem:[#allocation27_spill] sm:$0xff] %v9678_v55  ;;  %v10531_v25 = vld [vmem:[#allocation109_spill] sm:$0xff]  ;;  %v10532_v23 = vld [vmem:[#allocation111_spill] sm:$0xff] }
 0x1b9   : > { %v9670_v32 = vrot.slane %v1896_v40, %v7083_v6  ;;  %v1911_v47 = vcombine.high %v9662_v5, %v9662_v5  ;;  %v5337_v9 = vcombine.low %v9652_v1, %v9662_v5  ;;  %v5504_v45 = vcombine.low %v2922_v13, %v10529_v42 }
 0x1ba   : > { %v2923_v2 = vcombine.low %v10531_v25, %v10530_v17  ;;  %v2924_v61 = vcombine.low %v10532_v23, %v2922_v13  ;;  %v9686_v40 = vcombine.high %v9566_v29, %v9566_v29  ;;  %v5728_v42 = vrot.slane %v5721_v33, %v7083_v6 }
 0x1bb   : > { %v1912_v28 = vcombine.high %v9670_v32, %v9670_v32  ;;  %v5338_v10 = vcombine.low %v9670_v32, %v1911_v47  ;;  %v5346_v16 = vrot.slane %v5337_v9, %v7083_v6  ;;  %v5512_v55 = vrot.slane %v5504_v45, %v7083_v6 }
 0x1bc   : > { %v2931_v17 = vrot.slane %v2923_v2, %v7083_v6  ;;  %v2938_v13 = vrot.slane %v2924_v61, %v7083_v6  ;;  %v1871_v25 = vshrl.u32 %v9566_v29, 16  ;;  %5138 = vrot.lane.b32.xlu0 %v5100_v18, %s6888_s17  ;;  %v5729_v57 = vcombine.low %v10534_v0, %v5728_v42 }
 0x1bd   : > { %v5339_v23 = vcombine.low %v1912_v28, %v9666_v31  ;;  %v5353_v62 = vrot.slane %v5338_v10, %v7083_v6  ;;  %v5361_v34 = vcombine.low %v5083_v54, %v5346_v16  ;;  %v5520_v9 = vcombine.low %v5512_v55, %v5519_v43  ;;  %v9712_v54 = vpop.permute.xlu0 %3847 }
 0x1be   : > { %v2939_v19 = vcombine.low %v2931_v17, %v2938_v13  ;;  %v1876_v33 = vshll.u32 %v9652_v1, 16  ;;  %v1879_v45 = vshrl.u32 %v9652_v1, 16  ;;  %6635 = vmatprep.mubr.msk.bf16.mxu0 %vm5875_vm15, %v5729_v57  ;;  %v1884_v18 = vshll.u32 %v9686_v40, 16  ;;  %v9722_v57 = vpop.permute.xlu1 %5122 }
 0x1bf   : > { %v5360_v2 = vrot.slane %v5339_v23, %v7083_v6  ;;  %v5369_v61 = vrot.slane %v5361_v34, %v7083_v6  ;;  %v9710_v53 = vrot.slane %v1920_v58, %v7083_v6  ;;  %5696 = vrot.lane.b32.xlu1 %v5520_v9, %s6891_s25  ;;  %v1938_v43 = vshrl.u32 %v9662_v5, 16 }
 0x1c0   : > { %v9717_v0 = vsel %vm7422_vm14, %v1871_v25, %v1876_v33  ;;  %v1943_v55 = vshll.u32 %v9670_v32, 16  ;;  %v1946_v34 = vshrl.u32 %v9670_v32, 16  ;;  %v9726_v58 = vsel %vm7422_vm14, %v1879_v45, %v1884_v18 }
 0x1c1   : > { %v5362_v10 = vcombine.low %v5353_v62, %v5360_v2  ;;  %v1951_v16 = vshll.u32 %v1911_v47, 16  ;;  %v1954_v42 = vshrl.u32 %v1911_v47, 16  ;;  %v1959_v13 = vshll.u32 %v1912_v28, 16 }
 0x1c2   : > { %v1945_v17 = vsel %vm7422_vm14, %v1938_v43, %v1943_v55  ;;  %v1962_v25 = vshrl.u32 %v1912_v28, 16  ;;  %v1967_v23 = vshll.u32 %v9666_v31, 16  ;;  %v1970_v62 = vshrl.u32 %v9666_v31, 16 }
 0x1c3   : > { %v5376_v9 = vrot.slane %v5362_v10, %v7083_v6  ;;  %v1953_v33 = vsel %vm7422_vm14, %v1946_v34, %v1951_v16  ;;  %v1975_v2 = vshll.u32 %v9710_v53, 16  ;;  %3212 = vrot.lane.b32.xlu1 %v2939_v19, %s6889_s28  ;;  %v1961_v47 = vsel %vm7422_vm14, %v1954_v42, %v1959_v13  ;;  %v10535_v10 = vld [vmem:[#allocation108_spill] sm:$0xff]  ;;  %v9749_v16 = vpop.permute.xlu0 %4220 }
 0x1c4   : > { %v1969_v45 = vsel %vm7422_vm14, %v1962_v25, %v1967_v23  ;;  %v5622_v28 = vcombine.low %v9591_v52, %v9717_v0  ;;  %v5623_v18 = vcombine.low %v9726_v58, %v1945_v17  ;;  %v5624_v34 = vcombine.low %v1953_v33, %v1961_v47  ;;  %v10536_v52 = vld [vmem:[#allocation25_spill] sm:$0xff]  ;;  %v10537_v23 = vld [vmem:[#allocation16_spill] sm:$0xff]  ;;  %v10538_v33 = vld [vmem:[#allocation75_spill] sm:$0xff] }
 0x1c5   : > { %v5377_v43 = vcombine.low %v5369_v61, %v5376_v9  ;;  %v1977_v55 = vsel %vm7422_vm14, %v1970_v62, %v1975_v2  ;;  %v6055_v19 = vsel %vm6050_vm5, %v9619_v39, %v10535_v10  ;;  %v2125_v17 = vcombine.low %v10537_v23, %v10536_v52  ;;  %v9755_v61 = vpop.permute.xlu1 %5399  ;;  %v10539_v62 = vld [vmem:[#allocation66_spill] sm:$0xff]  ;;  %v10540_v2 = vld [vmem:[#allocation100_spill] sm:$0xff] }
 0x1c6   : > { %v5625_v42 = vcombine.low %v1969_v45, %v1977_v55  ;;  %v5632_v13 = vrot.slane %v5622_v28, %v7083_v6  ;;  %v5639_v25 = vrot.slane %v5623_v18, %v7083_v6  ;;  %6242 = vmatmul.mubr.bf16.gmra.mrb[4].mxu0 %v6055_v19  ;;  %v5646_v9 = vrot.slane %v5624_v34, %v7083_v6  ;;  %v10541_v28 = vld [vmem:[#allocation117_spill] sm:$0xff] }
 0x1c7   : > { %5415 = vrot.lane.b32.xlu0 %v5377_v43, %s6886_s5  ;;  %v5783_v39 = vcombine.low %v10539_v62, %v10538_v33  ;;  %v3520_v47 = vcombine.low %v10540_v2, %v9119_v20  ;;  %v6608_v45 = vcombine.high %v9110_v14, %v9129_v48  ;;  %v6039_v18 = vsel %vm6023_vm4, %v9639_v8, %v10541_v28  ;;  %v10542_v20 = vld [vmem:[#allocation80_spill] sm:$0xff]  ;;  %v10543_v8 = vld [vmem:[#allocation23_spill] sm:$0xff] }
 0x1c8   : > { %v5653_v55 = vrot.slane %v5625_v42, %v7083_v6  ;;  %v5654_v10 = vcombine.low %v5632_v13, %v5639_v25  ;;  %v2139_v43 = vrot.slane %v2125_v17, %v7083_v6  ;;  %v6073_v14 = vsel %vm6050_vm5, %v6039_v18, %v10542_v20  ;;  %v10544_v42 = vld [vmem:[#allocation55_spill] sm:$0xff]  ;;  %v10545_v13 = vld [vmem:[#allocation50_spill] sm:$0xff]  ;;  %v10546_v17 = vld [vmem:[#allocation68_spill] sm:$0xff] }
 0x1c9   : > { %v5790_v34 = vrot.slane %v5783_v39, %v7083_v6  ;;  %v9772_v19 = vrot.slane %v3520_v47, %v7083_v6  ;;  %v9775_v52 = vrot.slane %v6608_v45, %v7083_v6  ;;  %v2419_v25 = vcombine.low %v10545_v13, %v10544_v42  ;;  %v9790_v45 = vpop.permute.xlu0 %4849  ;;  %v10547_v18 = vld [vmem:[#allocation35_spill] sm:$0xff] }
 0x1ca   : > { %v5655_v48 = vcombine.low %v5646_v9, %v5653_v55  ;;  %v5662_v23 = vrot.slane %v5654_v10, %v7083_v6  ;;  %v2140_v33 = vcombine.low %v10543_v8, %v2139_v43  ;;  %v4013_v47 = vcombine.low %v9439_v56, %v10493_v51  ;;  %v10548_v55 = vld [vmem:[#allocation34_spill] sm:$0xff]  ;;  %v9796_v43 = vpop.permute.xlu1 %5692  ;;  %v10549_v51 = vld [vmem:[#allocation113_spill] sm:$0xff] }
 0x1cb   : > { %v5791_v62 = vcombine.low %v10546_v17, %v5790_v34  ;;  %v3552_v39 = vcombine.low %v9772_v19, %v9412_v44  ;;  %v3553_v2 = vcombine.low %v9415_v49, %v9775_v52  ;;  %v2433_v28 = vrot.slane %v2419_v25, %v7083_v6  ;;  %v10551_v17 = vld [vmem:[#allocation32_spill] sm:$0xff] }
 0x1cc   : > { %v5669_v9 = vrot.slane %v5655_v48, %v7083_v6  ;;  %v4022_v10 = vcombine.low %v10548_v55, %v10547_v18  ;;  %v4020_v34 = vrot.slane %v4013_v47, %v7083_v6  ;;  %v5884_v20 = vsel %vm5875_vm15, %v2140_v33, %v10549_v51  ;;  %v10550_v48 = vld [vmem:[#allocation51_spill] sm:$0xff] }
 0x1cd   : > { %6641 = vmatprep.mubr.msk.bf16.mxu1 %vm5875_vm15, %v5791_v62  ;;  %v3560_v44 = vrot.slane %v3552_v39, %v7083_v6  ;;  %v3567_v49 = vrot.slane %v3553_v2, %v7083_v6  ;;  %v2434_v8 = vcombine.low %v10550_v48, %v2433_v28  ;;  %v6614_v42 = vcombine.high %v9070_v59, %v9238_v30  ;;  %v10552_v39 = vld [vmem:[#allocation37_spill] sm:$0xff]  ;;  %v10554_v47 = vld [vmem:[#allocation39_spill] sm:$0xff]  ;;  %v10557_v28 = vld [vmem:[#allocation40_spill] sm:$0xff]  ;;  %v9830_v48 = vpop.permute.xlu0 %5134 }
 0x1ce   : > { %v5670_v56 = vcombine.low %v5662_v23, %v5669_v9  ;;  %6290 = vmatmul.mubr.bf16.vlgmr.msra.gmra.mrb[0].mxu1 %v6073_v14  ;;  %v4021_v18 = vcombine.low %v4020_v34, %v10551_v17  ;;  %v9809_v62 = vrot.slane %v4022_v10, %v7083_v6  ;;  %v4522_v2 = vcombine.low %v9648_v63, %v10552_v39  ;;  %v10553_v23 = vld [vmem:[#allocation121_spill] sm:$0xff]  ;;  %v10555_v9 = vld [vmem:[#allocation38_spill] sm:$0xff] }
 0x1cf   : > { %v3568_v25 = vcombine.low %v3560_v44, %v3567_v49  ;;  %v3199_v33 = vrot.slane %v10553_v23, %v7083_v6  ;;  %v9817_v14 = vrot.slane %v6614_v42, %v7083_v6  ;;  %v4523_v59 = vcombine.low %v10555_v9, %v10554_v47  ;;  %v10556_v30 = vld [vmem:[#allocation41_spill] sm:$0xff]  ;;  %v10558_v10 = vld [vmem:[#allocation118_spill] sm:$0xff]  ;;  %v10559_v49 = vld [vmem:[#allocation43_spill] sm:$0xff] }
 0x1d0   : > { %5708 = vrot.lane.b32.xlu0 %v5670_v56, %s6891_s25  ;;  %v4524_v55 = vcombine.low %v10557_v28, %v10556_v30  ;;  %v5921_v44 = vsel %vm5915_vm0, %v5884_v20, %v10558_v10  ;;  %v4029_v63 = vrot.slane %v4021_v18, %v7083_v6  ;;  %v10560_v34 = vld [vmem:[#allocation42_spill] sm:$0xff]  ;;  %v4532_v51 = vrot.slane %v4522_v2, %v7083_v6 }
 0x1d1   : > { %3841 = vrot.lane.b32.xlu1 %v3568_v25, %s6887_s14  ;;  %v4525_v56 = vcombine.low %v10560_v34, %v10559_v49  ;;  %v10561_v42 = vld [vmem:[#allocation122_spill] sm:$0xff]  ;;  %v4539_v23 = vrot.slane %v4523_v59, %v7083_v6  ;;  %v9836_v25 = vpop.permute.xlu1 %3208  ;;  %v5902_v20 = vsel %vm5875_vm15, %v2434_v8, %v9392_v37  ;;  %v4187_v2 = vcombine.low %v9566_v29, %v9652_v1 }
 0x1d2   : > { %v5948_v39 = vsel %vm5942_vm1, %v5921_v44, %v10561_v42  ;;  %v4546_v47 = vrot.slane %v4524_v55, %v7083_v6  ;;  %v4037_v18 = vcombine.low %v4029_v63, %v9809_v62  ;;  %v3828_v30 = vrot.slane %v9817_v14, %v7083_v6 }
 0x1d3   : > { %v4553_v9 = vrot.slane %v4525_v56, %v7083_v6  ;;  %v5933_v59 = vsel %vm5915_vm0, %v5902_v20, %v9425_v27  ;;  %v4554_v28 = vcombine.low %v4532_v51, %v4539_v23  ;;  %v4959_v55 = vcombine.low %v9623_v22, %v10492_v11 }
 0x1d4   : > { %3224 = vrot.lane.b32.xlu0 %v3199_v33, %s6889_s28  ;;  %v9853_v8 = vrot.slane %v4187_v2, %v7083_v6  ;;  %v5975_v1 = vsel %vm5969_vm2, %v5948_v39, %v9397_v3  ;;  %v6618_v33 = vcombine.high %v10495_v24, %v10494_v4  ;;  %v5960_v27 = vsel %vm5942_vm1, %v5933_v59, %v9470_v36  ;;  %v9871_v24 = vpop.permute.xlu0 %5411  ;;  %v10566_v2 = vld [vmem:[#allocation62_spill] sm:$0xff] }
 0x1d5   : > { %4214 = vrot.lane.b32.xlu1 %v4037_v18, %s6885_s20  ;;  %v4555_v37 = vcombine.low %v4546_v47, %v4553_v9  ;;  %v4562_v10 = vrot.slane %v4554_v28, %v7083_v6  ;;  %v4967_v44 = vrot.slane %v4959_v55, %v7083_v6  ;;  %v4816_v11 = vcombine.low %v9717_v0, %v9726_v58  ;;  %v10562_v58 = vld [vmem:[#allocation48_spill] sm:$0xff]  ;;  %v9880_v56 = vpop.permute.xlu1 %3837  ;;  %v10565_v18 = vld [vmem:[#allocation47_spill] sm:$0xff] }
 0x1d6   : > { %v4201_v63 = vrot.slane %v9853_v8, %v7083_v6  ;;  %v4974_v3 = vrot.slane %v6618_v33, %v7083_v6  ;;  %v6002_v4 = vsel %vm5996_vm3, %v5975_v1, %v9432_v15  ;;  %v5987_v0 = vsel %vm5969_vm2, %v5960_v27, %v9508_v21  ;;  %v10563_v15 = vld [vmem:[#allocation49_spill] sm:$0xff]  ;;  %v10568_v33 = vld [vmem:[#allocation56_spill] sm:$0xff] }
 0x1d7   : > { %v4569_v22 = vrot.slane %v4555_v37, %v7083_v6  ;;  %v4975_v36 = vcombine.low %v4967_v44, %v9520_v41  ;;  %v4823_v49 = vrot.slane %v4816_v11, %v7083_v6  ;;  %v5244_v34 = vcombine.low %v9530_v35, %v10562_v58 }
 0x1d8   : > { %3853 = vrot.lane.b32.xlu0 %v3828_v30, %s6887_s14  ;;  %v4976_v42 = vcombine.low %v9527_v50, %v4974_v3  ;;  %v5245_v39 = vcombine.low %v10563_v15, %v10545_v13  ;;  %v6622_v23 = vcombine.high %v9316_v38, %v9566_v29  ;;  %v6029_v35 = vsel %vm6023_vm4, %v6002_v4, %v9477_v60  ;;  %v10564_v29 = vld [vmem:[#allocation60_spill] sm:$0xff]  ;;  %v10567_v30 = vld [vmem:[#allocation61_spill] sm:$0xff]  ;;  %v9910_v27 = vpop.permute.xlu0 %5704 }
 0x1d9   : > { %v4570_v51 = vcombine.low %v4562_v10, %v4569_v22  ;;  %v4983_v41 = vrot.slane %v4975_v36, %v7083_v6  ;;  %v4830_v47 = vrot.slane %v4823_v49, %v7083_v6  ;;  %v5252_v21 = vrot.slane %v5244_v34, %v7083_v6  ;;  %v9917_v3 = vpop.permute.xlu1 %4210 }
 0x1da   : > { %v4990_v20 = vrot.slane %v4976_v42, %v7083_v6  ;;  %v5259_v50 = vrot.slane %v5245_v39, %v7083_v6  ;;  %v5108_v13 = vrot.slane %v6622_v23, %v7083_v6  ;;  %v6014_v38 = vsel %vm5996_vm3, %v5987_v0, %v9550_v7  ;;  %v10569_v7 = vld [vmem:[#allocation91_spill] sm:$0xff]  ;;  %v10570_v42 = vld [vmem:[#allocation57_spill] sm:$0xff] }
 0x1db   : > { %4843 = vrot.lane.b32.xlu1 %v4570_v51, %s6890_s24  ;;  %v5521_v9 = vcombine.low %v10565_v18, %v10564_v29  ;;  %v5522_v59 = vcombine.low %v10567_v30, %v10566_v2  ;;  %v1935_v60 = vcombine.high %v9666_v31, %v9666_v31  ;;  %v6041_v28 = vsel %vm6023_vm4, %v6014_v38, %v9587_v12  ;;  %v10571_v23 = vld [vmem:[#allocation67_spill] sm:$0xff]  ;;  %v10575_v29 = vld [vmem:[#allocation85_spill] sm:$0xff] }
 0x1dc   : > { %4226 = vrot.lane.b32.xlu0 %v4201_v63, %s6885_s20  ;;  %v4991_v55 = vcombine.low %v4983_v41, %v4990_v20  ;;  %v5260_v37 = vcombine.low %v5252_v21, %v5259_v50  ;;  %v5115_v1 = vrot.slane %v5108_v13, %v7083_v6  ;;  %v5730_v10 = vcombine.low %v10569_v7, %v10568_v33  ;;  %v10572_v41 = vld [vmem:[#allocation52_spill] sm:$0xff]  ;;  %v10573_v20 = vld [vmem:[#allocation77_spill] sm:$0xff]  ;;  %v10574_v50 = vld [vmem:[#allocation94_spill] sm:$0xff] }
 0x1dd   : > { %v5529_v44 = vrot.slane %v5521_v9, %v7083_v6  ;;  %v5536_v11 = vrot.slane %v5522_v59, %v7083_v6  ;;  %v5378_v22 = vcombine.low %v9710_v53, %v1935_v60  ;;  %v1936_v63 = vcombine.high %v9710_v53, %v9710_v53  ;;  %v10580_v7 = vld [vmem:[#allocation74_spill] sm:$0xff] }
 0x1de   : > { %v5737_v12 = vrot.slane %v5730_v10, %v7083_v6  ;;  %v1978_v4 = vshrl.u32 %v9710_v53, 16  ;;  %v1983_v36 = vshll.u32 %v1935_v60, 16  ;;  %v1986_v49 = vshrl.u32 %v1935_v60, 16  ;;  %v9944_v60 = vpop.permute.xlu0 %3220  ;;  %v10581_v10 = vld [vmem:[#allocation73_spill] sm:$0xff] }
 0x1df   : > { %5128 = vrot.lane.b32.xlu1 %v4991_v55, %s6888_s17  ;;  %v5537_v0 = vcombine.low %v5529_v44, %v5536_v11  ;;  %v5385_v58 = vrot.slane %v5378_v22, %v7083_v6  ;;  %v1991_v34 = vshll.u32 %v1936_v63, 16  ;;  %v6058_v51 = vsel %vm6050_vm5, %v6029_v35, %v9514_v46  ;;  %v10576_v46 = vld [vmem:[#allocation70_spill] sm:$0xff]  ;;  %v10579_v55 = vld [vmem:[#allocation92_spill] sm:$0xff]  ;;  %v4840_v44 = vpop.permute.xlu1 %4839  ;;  %v10582_v22 = vld [vmem:[#allocation69_spill] sm:$0xff] }
 0x1e0   : > { %4855 = vrot.lane.b32.xlu0 %v4830_v47, %s6890_s24  ;;  %v5738_v15 = vcombine.low %v10570_v42, %v5737_v12  ;;  %v1985_v39 = vsel %vm7422_vm14, %v1978_v4, %v1983_v36  ;;  %v2174_v21 = vcombine.low %v10572_v41, %v10571_v23  ;;  %v5792_v13 = vcombine.low %v10574_v50, %v10573_v20  ;;  %v10577_v35 = vld [vmem:[#allocation58_spill] sm:$0xff]  ;;  %v10584_v36 = vld [vmem:[#allocation97_spill] sm:$0xff]  ;;  %v10589_v50 = vld [vmem:[#allocation27_spill] sm:$0xff] }
 0x1e1   : > { %v5392_v47 = vrot.slane %v5385_v58, %v7083_v6  ;;  %v1993_v38 = vsel %vm7422_vm14, %v1986_v49, %v1991_v34  ;;  %v6076_v18 = vsel %vm6050_vm5, %v6041_v28, %v10575_v29  ;;  %v2468_v9 = vcombine.low %v10577_v35, %v10576_v46  ;;  %v10578_v28 = vld [vmem:[#allocation123_spill] sm:$0xff]  ;;  %v10583_v12 = vld [vmem:[#allocation78_spill] sm:$0xff] }
 0x1e2   : > { %6636 = vmatprep.mubr.msk.bf16.mxu0 %vm5875_vm15, %v5738_v15  ;;  %v5671_v2 = vcombine.low %v1985_v39, %v1993_v38  ;;  %v2188_v30 = vrot.slane %v2174_v21, %v7083_v6  ;;  %v5799_v59 = vrot.slane %v5792_v13, %v7083_v6  ;;  %v5739_v33 = vcombine.low %v10579_v55, %v10578_v28  ;;  %v10585_v49 = vld [vmem:[#allocation19_spill] sm:$0xff]  ;;  %v10587_v39 = vld [vmem:[#allocation12_spill] sm:$0xff]  ;;  %v10588_v21 = vld [vmem:[#allocation86_spill] sm:$0xff] }
 0x1e3   : > { %5405 = vrot.lane.b32.xlu1 %v5260_v37, %s6886_s5  ;;  %6250 = vmatmul.mubr.bf16.gmra.mrb[8].mxu0 %v6058_v51  ;;  %v2482_v26 = vrot.slane %v2468_v9, %v7083_v6  ;;  %v2222_v37 = vcombine.low %v10581_v10, %v10580_v7  ;;  %v5801_v58 = vcombine.low %v10585_v49, %v10584_v36  ;;  %v10590_v38 = vld [vmem:[#allocation95_spill] sm:$0xff]  ;;  %v10592_v9 = vld [vmem:[#allocation98_spill] sm:$0xff]  ;;  %v5125_v28 = vpop.permute.xlu1 %5124  ;;  %v10594_v55 = vld [vmem:[#allocation124_spill] sm:$0xff] }
 0x1e4   : > { %5140 = vrot.lane.b32.xlu0 %v5115_v1, %s6888_s17  ;;  %v5678_v11 = vrot.slane %v5671_v2, %v7083_v6  ;;  %v2189_v63 = vcombine.low %v10582_v22, %v2188_v30  ;;  %v5800_v4 = vcombine.low %v10583_v12, %v5799_v59  ;;  %v10586_v1 = vld [vmem:[#allocation71_spill] sm:$0xff]  ;;  %v5746_v51 = vrot.slane %v5739_v33, %v7083_v6  ;;  %v3850_v30 = vpop.permute.xlu0 %3849 }
 0x1e5   : > { %v2483_v34 = vcombine.low %v10586_v1, %v2482_v26  ;;  %v2230_v42 = vrot.slane %v2222_v37, %v7083_v6  ;;  %v5808_v41 = vrot.slane %v5801_v58, %v7083_v6  ;;  %v10591_v29 = vld [vmem:[#allocation59_spill] sm:$0xff]  ;;  %v5748_v33 = vcombine.low %v10594_v55, %v9772_v19 }
 0x1e6   : > { %v5685_v15 = vrot.slane %v5678_v11, %v7083_v6  ;;  %v5887_v23 = vsel %vm5875_vm15, %v2189_v63, %v10587_v39  ;;  %6642 = vmatprep.mubr.msk.bf16.mxu1 %vm5875_vm15, %v5800_v4  ;;  %v10596_v37 = vld [vmem:[#allocation79_spill] sm:$0xff]  ;;  %v10597_v4 = vld [vmem:[#allocation20_spill] sm:$0xff]  ;;  %v5757_v58 = vcombine.low %v9775_v52, %v10551_v17  ;;  %v10599_v39 = vld [vmem:[#allocation81_spill] sm:$0xff] }
 0x1e7   : > { %5698 = vrot.lane.b32.xlu1 %v5537_v0, %s6891_s25  ;;  %6298 = vmatmul.mubr.bf16.gmra.mrb[4].mxu1 %v6076_v18  ;;  %v5923_v20 = vsel %vm5915_vm0, %v5887_v23, %v10588_v21  ;;  %v5905_v13 = vsel %vm5875_vm15, %v2483_v34, %v10589_v50  ;;  %v5747_v0 = vcombine.low %v5746_v51, %v10590_v38  ;;  %v10593_v18 = vld [vmem:[#allocation15_spill] sm:$0xff] }
 0x1e8   : > { %5417 = vrot.lane.b32.xlu0 %v5392_v47, %s6886_s5  ;;  %v5950_v46 = vsel %vm5942_vm1, %v5923_v20, %v10591_v29  ;;  %v5935_v35 = vsel %vm5915_vm0, %v5905_v13, %v9712_v54  ;;  %v5809_v2 = vcombine.low %v10592_v9, %v5808_v41  ;;  %v5819_v47 = vcombine.low %v9686_v40, %v9670_v32  ;;  %v10595_v54 = vld [vmem:[#allocation17_spill] sm:$0xff]  ;;  %v4223_v12 = vpop.permute.xlu0 %4222 }
 0x1e9   : > { %v5977_v59 = vsel %vm5969_vm2, %v5950_v46, %v10593_v18  ;;  %v5962_v26 = vsel %vm5942_vm1, %v5935_v35, %v9749_v16  ;;  %6637 = vmatprep.mubr.msk.bf16.mxu0 %vm5875_vm15, %v5747_v0  ;;  %v5810_v7 = vcombine.low %v10595_v54, %v9817_v14  ;;  %v2238_v11 = vcombine.low %v2230_v42, %v10596_v37  ;;  %v10602_v54 = vld [vmem:[#allocation84_spill] sm:$0xff] }
 0x1ea   : > { %v6004_v10 = vsel %vm5996_vm3, %v5977_v59, %v9722_v57  ;;  %v5989_v40 = vsel %vm5969_vm2, %v5962_v26, %v9790_v45  ;;  %6643 = vmatprep.mubr.msk.bf16.mxu1 %vm5875_vm15, %v5809_v2  ;;  %v5755_v45 = vrot.slane %v5748_v33, %v7083_v6  ;;  %v5828_v22 = vrot.slane %v5819_v47, %v7083_v6 }
 0x1eb   : > { %v6031_v16 = vsel %vm6023_vm4, %v6004_v10, %v9755_v61  ;;  %v6016_v19 = vsel %vm5996_vm3, %v5989_v40, %v9830_v48  ;;  %v5890_v61 = vsel %vm5875_vm15, %v2238_v11, %v9836_v25  ;;  %v5817_v36 = vrot.slane %v5810_v7, %v7083_v6 }
 0x1ec   : > { %5710 = vrot.lane.b32.xlu0 %v5685_v15, %s6891_s25  ;;  %v6043_v14 = vsel %vm6023_vm4, %v6016_v19, %v9871_v24  ;;  %v6061_v57 = vsel %vm6050_vm5, %v6031_v16, %v9796_v43  ;;  %v5756_v48 = vcombine.low %v5755_v45, %v10597_v4  ;;  %v10598_v43 = vld [vmem:[#allocation18_spill] sm:$0xff]  ;;  %v5843_v1 = vcombine.low %v9853_v8, %v5828_v22  ;;  %v4852_v15 = vpop.permute.xlu0 %4851  ;;  %v10604_v16 = vld [vmem:[#allocation99_spill] sm:$0xff]  ;;  %v10607_v22 = vld [vmem:[#allocation64_spill] sm:$0xff] }
 0x1ed   : > { %6258 = vmatmul.mubr.bf16.gmra.mrb[12].mxu0 %v6061_v57  ;;  %v6079_v63 = vsel %vm6050_vm5, %v6043_v14, %v9910_v27  ;;  %v5818_v49 = vcombine.low %v5817_v36, %v10598_v43  ;;  %v5925_v27 = vsel %vm5915_vm0, %v5890_v61, %v9880_v56  ;;  %v6623_v25 = vcombine.high %v9662_v5, %v9670_v32  ;;  %v10605_v14 = vld [vmem:[#allocation13_spill] sm:$0xff]  ;;  %v10606_v57 = vld [vmem:[#allocation36_spill] sm:$0xff] }
 0x1ee   : > { %v5402_v24 = vpop.permute.xlu1 %5401  ;;  %6638 = vmatprep.mubr.msk.bf16.mxu0 %vm5875_vm15, %v5756_v48  ;;  %v5821_v34 = vcombine.low %v9666_v31, %v9710_v53  ;;  %v5952_v51 = vsel %vm5942_vm1, %v5925_v27, %v9917_v3  ;;  %v5764_v42 = vrot.slane %v5757_v58, %v7083_v6  ;;  %v6624_v32 = vcombine.high %v9666_v31, %v9710_v53  ;;  %v10600_v3 = vld [vmem:[#allocation54_spill] sm:$0xff]  ;;  %v10609_v27 = vld [vmem:[#allocation88_spill] sm:$0xff] }
 0x1ef   : > { %6306 = vmatmul.mubr.bf16.gmra.mrb[8].mxu1 %v6079_v63  ;;  %v5979_v52 = vsel %vm5969_vm2, %v5952_v51, %v4840_v44  ;;  %v5835_v17 = vrot.slane %v6623_v25, %v7083_v6  ;;  %v2517_v23 = vcombine.low %v10600_v3, %v10599_v39  ;;  %v5851_v44 = vrot.slane %v5843_v1, %v7083_v6  ;;  %v10601_v31 = vld [vmem:[#allocation82_spill] sm:$0xff]  ;;  %v10610_v25 = vld [vmem:[#allocation87_spill] sm:$0xff] }
 0x1f0   : > { %6644 = vmatprep.mubr.msk.bf16.mxu1 %vm5875_vm15, %v5818_v49  ;;  %v5842_v8 = vrot.slane %v5821_v34, %v7083_v6  ;;  %v6006_v56 = vsel %vm5996_vm3, %v5979_v52, %v5125_v28  ;;  %v5765_v5 = vcombine.low %v5764_v42, %v9809_v62  ;;  %v5137_v53 = vpop.permute.xlu0 %5136  ;;  %v5766_v45 = vcombine.low %v10606_v57, %v10605_v14  ;;  %v10608_v63 = vld [vmem:[#allocation14_spill] sm:$0xff] }
 0x1f1   : > { %v6033_v41 = vsel %vm6023_vm4, %v6006_v56, %v5402_v24  ;;  %v2531_v62 = vrot.slane %v2517_v23, %v7083_v6  ;;  %v5767_v61 = vcombine.low %v10608_v63, %v10607_v22  ;;  %v2565_v34 = vcombine.low %v10610_v25, %v10609_v27 }
 0x1f2   : > { %v5844_v20 = vcombine.low %v5835_v17, %v5842_v8  ;;  %v5774_v36 = vrot.slane %v5766_v45, %v7083_v6 }
 0x1f3   : > { %v2532_v0 = vcombine.low %v10601_v31, %v2531_v62  ;;  %v5781_v24 = vrot.slane %v5767_v61, %v7083_v6  ;;  %v2573_v56 = vrot.slane %v2565_v34, %v7083_v6 }
 0x1f4   : > { %v5858_v13 = vrot.slane %v5844_v20, %v7083_v6 }
 0x1f5   : > { %v5908_v46 = vsel %vm5875_vm15, %v2532_v0, %v9944_v60  ;;  %v5782_v42 = vcombine.low %v5774_v36, %v5781_v24 }
 0x1f6   : > { %v5695_v21 = vpop.permute.xlu1 %5694  ;;  %v5859_v38 = vcombine.low %v5851_v44, %v5858_v13  ;;  %v5937_v35 = vsel %vm5915_vm0, %v5908_v46, %v3850_v30  ;;  %v10603_v30 = vld [vmem:[#allocation83_spill] sm:$0xff] }
 0x1f7   : > { %v6064_v50 = vsel %vm6050_vm5, %v6033_v41, %v5695_v21  ;;  %v5964_v9 = vsel %vm5942_vm1, %v5937_v35, %v4223_v12  ;;  %v2271_v7 = vcombine.low %v10603_v30, %v10602_v54  ;;  %v5867_v21 = vrot.slane %v6624_v32, %v7083_v6  ;;  %v10612_v32 = vld [vmem:[#allocation105_spill] sm:$0xff]  ;;  %v10615_v30 = vld [vmem:[#allocation115_spill] sm:$0xff] }
 0x1f8   : > { %6266 = vmatmul.mubr.bf16.gmra.mrb[16].mxu0 %v6064_v50  ;;  %v5991_v2 = vsel %vm5969_vm2, %v5964_v9, %v4852_v15 }
 0x1f9   : > { %6639 = vmatprep.mubr.msk.bf16.mxu0 %vm5875_vm15, %v5765_v5  ;;  %v6018_v47 = vsel %vm5996_vm3, %v5991_v2, %v5137_v53  ;;  %v2279_v40 = vrot.slane %v2271_v7, %v7083_v6  ;;  %v10611_v5 = vld [vmem:[#allocation103_spill] sm:$0xff]  ;;  %v5874_v62 = vrot.slane %v5867_v21, %v7083_v6  ;;  %v2596_v7 = vrot.slane %v10615_v30, %v7083_v6 }
 0x1fa   : > { %v3211_v28 = vpop.permute.xlu1 %3210  ;;  %v2581_v39 = vcombine.low %v2573_v56, %v10611_v5 }
 0x1fb   : > { %v2287_v19 = vcombine.low %v2279_v40, %v10604_v16 }
 0x1fd   : > { %v5414_v29 = vpop.permute.xlu0 %5413  ;;  %v5893_v4 = vsel %vm5875_vm15, %v2287_v19, %v3211_v28 }
 0x1fe   : > { %v6045_v18 = vsel %vm6023_vm4, %v6018_v47, %v5414_v29  ;;  %v10613_v29 = vld [vmem:[#allocation102_spill] sm:$0xff] }
 0x1ff   : > { %v2320_v46 = vcombine.low %v10613_v29, %v10612_v32 }
 0x201   : > { %v2328_v2 = vrot.slane %v2320_v46, %v7083_v6 }
 0x206   : > { %v3840_v55 = vpop.permute.xlu1 %3839 }
 0x207   : > { %v5707_v59 = vpop.permute.xlu0 %5706  ;;  %v5927_v43 = vsel %vm5915_vm0, %v5893_v4, %v3840_v55 }
 0x208   : > { %v6082_v26 = vsel %vm6050_vm5, %v6045_v18, %v5707_v59  ;;  %v10614_v59 = vld [vmem:[#allocation21_spill] sm:$0xff] }
 0x209   : > { %6314 = vmatmul.mubr.bf16.gmra.mrb[12].mxu1 %v6082_v26  ;;  %v2336_v26 = vcombine.low %v2328_v2, %v10614_v59 }
 0x20a   : > { %6645 = vmatprep.mubr.msk.bf16.mxu1 %vm5875_vm15, %v5859_v38 }
 0x20b   : > { %v3223_v60 = vpop.permute.xlu0 %3222 }
 0x20c   : > { %v5911_v23 = vsel %vm5875_vm15, %v2581_v39, %v3223_v60 }
 0x20e   : > { %v4213_v33 = vpop.permute.xlu1 %4212 }
 0x20f   : > { %v5954_v49 = vsel %vm5942_vm1, %v5927_v43, %v4213_v33 }
 0x210   : > { %v3852_v37 = vpop.permute.xlu0 %3851 }
 0x211   : > { %v5939_v20 = vsel %vm5915_vm0, %v5911_v23, %v3852_v37 }
 0x217   : > { %v4842_v10 = vpop.permute.xlu1 %4841 }
 0x218   : > { %v5981_v58 = vsel %vm5969_vm2, %v5954_v49, %v4842_v10 }
 0x219   : > { %v4225_v12 = vpop.permute.xlu0 %4224 }
 0x21a   : > { %v5966_v44 = vsel %vm5942_vm1, %v5939_v20, %v4225_v12 }
 0x222   : > { %v5127_v11 = vpop.permute.xlu1 %5126 }
 0x223   : > { %v6008_v51 = vsel %vm5996_vm3, %v5981_v58, %v5127_v11 }
 0x226   : > { %v5404_v48 = vpop.permute.xlu1 %5403 }
 0x227   : > { %v6035_v52 = vsel %vm6023_vm4, %v6008_v51, %v5404_v48 }
 0x22a   : > { %v4854_v1 = vpop.permute.xlu0 %4853 }
 0x22b   : > { %v5993_v50 = vsel %vm5969_vm2, %v5966_v44, %v4854_v1 }
 0x22e   : > { %v5139_v15 = vpop.permute.xlu0 %5138 }
 0x22f   : > { %v6020_v13 = vsel %vm5996_vm3, %v5993_v50, %v5139_v15 }
 0x231   : > { %v5697_v17 = vpop.permute.xlu1 %5696 }
 0x232   : > { %v6067_v8 = vsel %vm6050_vm5, %v6035_v52, %v5697_v17 }
 0x233   : > { %6274 = vmatmul.mubr.bf16.gmra.mrb[20].mxu0 %v6067_v8 }
 0x234   : > { %6640 = vmatprep.mubr.msk.bf16.mxu0 %vm5875_vm15, %v5782_v42 }
 0x235   : > { %v3213_v41 = vpop.permute.xlu1 %3212 }
 0x236   : > { %v5896_v33 = vsel %vm5875_vm15, %v2336_v26, %v3213_v41 }
 0x239   : > { %v5416_v3 = vpop.permute.xlu0 %5415 }
 0x23a   : > { %v6047_v38 = vsel %vm6023_vm4, %v6020_v13, %v5416_v3 }
 0x242   : > { %v5709_v53 = vpop.permute.xlu0 %5708 }
 0x243   : > { %v6085_v31 = vsel %vm6050_vm5, %v6047_v38, %v5709_v53  ;;  %v3842_v0 = vpop.permute.xlu1 %3841 }
 0x244   : > { %6322 = vmatmul.mubr.bf16.gmra.mrb[16].mxu1 %v6085_v31  ;;  %v5929_v54 = vsel %vm5915_vm0, %v5896_v33, %v3842_v0 }
 0x245   : > { %6646 = vmatprep.mubr.msk.bf16.mxu1 %vm5875_vm15, %v5874_v62 }
 0x246   : > { %v3225_v35 = vpop.permute.xlu0 %3224 }
 0x247   : > { %v4215_v9 = vpop.permute.xlu1 %4214  ;;  %v5914_v19 = vsel %vm5875_vm15, %v2596_v7, %v3225_v35 }
 0x248   : > { %v5956_v40 = vsel %vm5942_vm1, %v5929_v54, %v4215_v9 }
 0x24a   : > { %v3854_v47 = vpop.permute.xlu0 %3853 }
 0x24b   : > { %v5941_v45 = vsel %vm5915_vm0, %v5914_v19, %v3854_v47 }
 0x24d   : > { %v4844_v18 = vpop.permute.xlu1 %4843 }
 0x24e   : > { %v4227_v28 = vpop.permute.xlu0 %4226  ;;  %v5983_v11 = vsel %vm5969_vm2, %v5956_v40, %v4844_v18 }
 0x24f   : > { %v5968_v6 = vsel %vm5942_vm1, %v5941_v45, %v4227_v28 }
 0x251   : > { %v5129_v55 = vpop.permute.xlu1 %5128 }
 0x252   : > { %v4856_v60 = vpop.permute.xlu0 %4855  ;;  %v6010_v16 = vsel %vm5996_vm3, %v5983_v11, %v5129_v55 }
 0x253   : > { %v5995_v61 = vsel %vm5969_vm2, %v5968_v6, %v4856_v60 }
 0x255   : > { %v5406_v10 = vpop.permute.xlu1 %5405 }
 0x256   : > { %v5141_v37 = vpop.permute.xlu0 %5140  ;;  %v6037_v14 = vsel %vm6023_vm4, %v6010_v16, %v5406_v10 }
 0x257   : > { %v6022_v12 = vsel %vm5996_vm3, %v5995_v61, %v5141_v37 }
 0x259   : > { %v5699_v57 = vpop.permute.xlu1 %5698 }
 0x25a   : > { %v5418_v22 = vpop.permute.xlu0 %5417  ;;  %v6070_v63 = vsel %vm6050_vm5, %v6037_v14, %v5699_v57 }
 0x25b   : > { %6282 = vmatmul.mubr.bf16.gmra.mrb[24].mxu0 %v6070_v63  ;;  %v6049_v4 = vsel %vm6023_vm4, %v6022_v12, %v5418_v22 }
 0x25e   : > { %v5711_v48 = vpop.permute.xlu0 %5710 }
 0x25f   : > { %v6088_v36 = vsel %vm6050_vm5, %v6049_v4, %v5711_v48 }
 0x260   : > { %6330 = vmatmul.mubr.bf16.gmra.mrb[20].mxu1 %v6088_v36 }
 0x27a   : > { %v6235_v24 = vpop.f32.mrb[0].mxu0 }
 0x27b   : > { %6337 = vst.msk [vmem:[%s10104_s29] sm:$0xff] %vm5875_vm15, %v6235_v24  ;;  %v6237_v43 = vpop.f32.mrb[1].mxu0 }
 0x27c   : > { %v6238_v49 = vpop.f32.mrb[2].mxu0 }
 0x27d   : > { %6338 = vst.msk [vmem:[%s10104_s29 + $0x8] sm:$0xff] %vm5875_vm15, %v6238_v49  ;;  %v6240_v58 = vpop.f32.mrb[3].mxu0 }
 0x299   : > { %v6243_v1 = vpop.f32.mrb[4].mxu0 }
 0x29a   : > { %6339 = vst.msk [vmem:[%s10104_s29 + $0x10] sm:$0xff] %vm5875_vm15, %v6243_v1  ;;  %v6245_v27 = vpop.f32.mrb[5].mxu0 }
 0x29b   : > { %v6246_v25 = vpop.f32.mrb[6].mxu0 }
 0x29c   : > { %6340 = vst.msk [vmem:[%s10104_s29 + $0x18] sm:$0xff] %vm5875_vm15, %v6246_v25  ;;  %v6248_v34 = vpop.f32.mrb[7].mxu0 }
 0x2a1   : > { %v6291_v51 = vpop.f32.mrb[0].mxu1 }
 0x2a2   : > { %6351 = vst.msk [vmem:[%s10104_s29 + $0x70] sm:$0xff] %vm5875_vm15, %v6291_v51  ;;  %v6293_v42 = vpop.f32.mrb[1].mxu1 }
 0x2a3   : > { %v6294_v52 = vpop.f32.mrb[2].mxu1 }
 0x2a4   : > { %6352 = vst.msk [vmem:[%s10104_s29 + $0x78] sm:$0xff] %vm5875_vm15, %v6294_v52  ;;  %v6296_v17 = vpop.f32.mrb[3].mxu1 }
 0x2b6   : > { %v6251_v8 = vpop.f32.mrb[8].mxu0 }
 0x2b7   : > { %6341 = vst.msk [vmem:[%s10104_s29 + $0x20] sm:$0xff] %vm5875_vm15, %v6251_v8  ;;  %v6253_v56 = vpop.f32.mrb[9].mxu0 }
 0x2b8   : > { %v6254_v15 = vpop.f32.mrb[10].mxu0 }
 0x2b9   : > { %6342 = vst.msk [vmem:[%s10104_s29 + $0x28] sm:$0xff] %vm5875_vm15, %v6254_v15  ;;  %v6256_v5 = vpop.f32.mrb[11].mxu0 }
 0x2ba   : > { %v6299_v39 = vpop.f32.mrb[4].mxu1 }
 0x2bb   : > { %6353 = vst.msk [vmem:[%s10104_s29 + $0x80] sm:$0xff] %vm5875_vm15, %v6299_v39  ;;  %v6301_v3 = vpop.f32.mrb[5].mxu1 }
 0x2bc   : > { %v6302_v23 = vpop.f32.mrb[6].mxu1 }
 0x2bd   : > { %6354 = vst.msk [vmem:[%s10104_s29 + $0x88] sm:$0xff] %vm5875_vm15, %v6302_v23  ;;  %v6304_v41 = vpop.f32.mrb[7].mxu1 }
 0x2c0   : > { %v6259_v21 = vpop.f32.mrb[12].mxu0 }
 0x2c1   : > { %6343 = vst.msk [vmem:[%s10104_s29 + $0x30] sm:$0xff] %vm5875_vm15, %v6259_v21  ;;  %v6261_v20 = vpop.f32.mrb[13].mxu0 }
 0x2c2   : > { %v6262_v44 = vpop.f32.mrb[14].mxu0  ;;  %v6307_v50 = vpop.f32.mrb[8].mxu1 }
 0x2c3   : > { %6344 = vst.msk [vmem:[%s10104_s29 + $0x38] sm:$0xff] %vm5875_vm15, %v6262_v44  ;;  %v6264_v13 = vpop.f32.mrb[15].mxu0  ;;  %6355 = vst.msk [vmem:[%s10104_s29 + $0x90] sm:$0xff] %vm5875_vm15, %v6307_v50  ;;  %v6309_v62 = vpop.f32.mrb[9].mxu1 }
 0x2c4   : > { %v6310_v38 = vpop.f32.mrb[10].mxu1 }
 0x2c5   : > { %6356 = vst.msk [vmem:[%s10104_s29 + $0x98] sm:$0xff] %vm5875_vm15, %v6310_v38  ;;  %v6312_v53 = vpop.f32.mrb[11].mxu1 }
 0x2cb   : > { %v6267_v31 = vpop.f32.mrb[16].mxu0 }
 0x2cc   : > { %6345 = vst.msk [vmem:[%s10104_s29 + $0x40] sm:$0xff] %vm5875_vm15, %v6267_v31  ;;  %v6269_v0 = vpop.f32.mrb[17].mxu0 }
 0x2cd   : > { %v6270_v32 = vpop.f32.mrb[18].mxu0 }
 0x2ce   : > { %6346 = vst.msk [vmem:[%s10104_s29 + $0x48] sm:$0xff] %vm5875_vm15, %v6270_v32  ;;  %v6272_v29 = vpop.f32.mrb[19].mxu0 }
 0x2dc   : > { %v6315_v46 = vpop.f32.mrb[12].mxu1 }
 0x2dd   : > { %6357 = vst.msk [vmem:[%s10104_s29 + $0xa0] sm:$0xff] %vm5875_vm15, %v6315_v46  ;;  %v6317_v35 = vpop.f32.mrb[13].mxu1 }
 0x2de   : > { %v6318_v9 = vpop.f32.mrb[14].mxu1 }
 0x2df   : > { %6358 = vst.msk [vmem:[%s10104_s29 + $0xa8] sm:$0xff] %vm5875_vm15, %v6318_v9  ;;  %v6320_v2 = vpop.f32.mrb[15].mxu1 }
 0x306   : > { %v6275_v47 = vpop.f32.mrb[20].mxu0 }
 0x307   : > { %6347 = vst.msk [vmem:[%s10104_s29 + $0x50] sm:$0xff] %vm5875_vm15, %v6275_v47  ;;  %v6277_v18 = vpop.f32.mrb[21].mxu0 }
 0x308   : > { %v6278_v59 = vpop.f32.mrb[22].mxu0 }
 0x309   : > { %6348 = vst.msk [vmem:[%s10104_s29 + $0x58] sm:$0xff] %vm5875_vm15, %v6278_v59  ;;  %v6280_v26 = vpop.f32.mrb[23].mxu0 }
 0x317   : > { %v6323_v28 = vpop.f32.mrb[16].mxu1 }
 0x318   : > { %6359 = vst.msk [vmem:[%s10104_s29 + $0xb0] sm:$0xff] %vm5875_vm15, %v6323_v28  ;;  %v6325_v55 = vpop.f32.mrb[17].mxu1 }
 0x319   : > { %v6326_v33 = vpop.f32.mrb[18].mxu1 }
 0x31a   : > { %6360 = vst.msk [vmem:[%s10104_s29 + $0xb8] sm:$0xff] %vm5875_vm15, %v6326_v33  ;;  %v6328_v60 = vpop.f32.mrb[19].mxu1 }
 0x32e   : > { %v6283_v54 = vpop.f32.mrb[24].mxu0 }
 0x32f   : > { %6349 = vst.msk [vmem:[%s10104_s29 + $0x60] sm:$0xff] %vm5875_vm15, %v6283_v54  ;;  %v6285_v30 = vpop.f32.mrb[25].mxu0 }
 0x330   : > { %v6286_v7 = vpop.f32.mrb[26].mxu0 }
 0x331   : > { %6350 = vst.msk [vmem:[%s10104_s29 + $0x68] sm:$0xff] %vm5875_vm15, %v6286_v7  ;;  %v6288_v10 = vpop.f32.mrb[27].mxu0 }
 0x333   : > { %v6331_v40 = vpop.f32.mrb[20].mxu1 }
 0x334   : > { %6362 = vst.msk [vmem:[%s10104_s29 + $0xc0] sm:$0xf] %vm6361_vm6, %v6331_v40  ;;  %v6333_v37 = vpop.f32.mrb[21].mxu1 }
 0x335   : > { %v6334_v11 = vpop.f32.mrb[22].mxu1 }
 0x336   : > { %6820 = shalt.err (!%p6817_p11)
}
 0x337   : > { %s6821_s20 = scalar_lea.hbm %s10159_s19, 3200  ;;  %s6825_s17 = scalar_lea.hbm %s10207_s2, 35200 }
 0x338   : > { %p6822_p7 = scmp.ne.s32.totalorder %s10159_s19, %s6821_s20  ;;  %p6826_p1 = scmp.lt.u32.totalorder %s10159_s19, %s10207_s2 }
 0x339   : > { %p6827_p3 = scmp.lt.u32.totalorder %s6825_s17, %s6821_s20  ;;  %p6829_p12 = scmp.lt.u32.totalorder %s6821_s20, %s10159_s19 }
 0x33a   : > { %p6823_p8 = pnand %p6822_p7, %p10616_p0 }
 0x33b   : > { %p6828_p6 = por %p6827_p3, %p6826_p1 }
 0x33c   : > { %p6824_p13 = pneg %p6823_p8 }
 0x33d   : > { %p6830_p2 = por %p6829_p12, %p6828_p6 }
 0x33f   : > { %p6831_p9 = pnand %p6830_p2, %p6824_p13 }
 0x341   : > { %6834 = shalt.err (!%p6831_p9)
}
 0x342   : > { %s6893_s25 = smov 128   ;;  %s6894_s6 = smov 8   ;;  %v6335_v16 = vpop.f32.mrb[23].mxu1 }
 0x343   : > { %6678 = dma.vmem_to_hbm [thread:$0]  (%p10616_p0), %s10161_s8, 3200, %s10159_s19, %s6364_s13, %s6893_s25, %s6893_s25, %s6894_s6  }
 0x344 PF: > { %p6692_p4 = scmp.ge.s32.totalorder %s6877_s12, 2  ;;  %s6392_s29 = sand.u32 1, %s6865_s9  }
 0x345   : > { %p10617_p5 = scmp.ne.s32.totalorder %s10335_s22, 0  ;;  %s6393_s7 = scalar_lea.sflag [#allocation4], %s6392_s29 }
 0x347   : > { %p6688_p10 = pnand %p6692_p4, %p10617_p5 }
 0x349   : > { %6860 = dma.done.wait (!%p6688_p10), %s6393_s7, 3200  }
 0x34a   : > { %6862 = vsyncadd (!%p6688_p10), %s6393_s7, 4294964096  ;;  %p18_p11 = scmp.ge.s32.totalorder %s6935_s15, 13   ;;  %s10618_s9 = smov %s6869_s10 }
 0x34b   : > { %s10619_s10 = smov %s6873_s11  ;;  %s10620_s11 = smov %s6947_s18 }
 0x34c   : > { %s10621_s12 = smov %s6935_s15  ;;  %20 = sbr.rel (!%p18_p11) target bundleno = 7 (0x7), region = 86 }
 0x353   :  { %6398 = vsyncpa [#allocation3], 1 }
 0x354   :  { %6400 = vsyncpa [#allocation3 + $0x1], 1 }
 0x355   :  { %6401 = vsyncpa [#allocation6], 1 }
 0x356   :  { %6403 = vsyncpa [#allocation6 + $0x1], 1 }
 0x357   :  { %6404 = vsyncpa [#allocation4], 1 }
 0x358   :  { %6406 = vsyncpa [#allocation4 + $0x1], 1 }

</bundles_post_ra>
